<compile_context>
chip_gen: v7x
topology: tpu7x:2x2x1
jax: 0.10.0
libtpu: 0.0.40
codegen_flags: <defaults>
</compile_context>

<pallas_src>
import math

import jax
import jax.numpy as jnp
from jax.experimental import pallas as pl
from jax.experimental.pallas import tpu as pltpu

# ----------------------------- tiny-BERT config ------------------------------
VOCAB = 64
SEQ = 128          # stands in for the 512-token segments of the original model
HIDDEN = 32
NUM_HEADS = 4
HEAD_DIM = HIDDEN // NUM_HEADS
INTERMEDIATE = 64
NUM_LAYERS = 2
NUM_CLASSES = 4    # num_classes[task_idx]
MAX_SEGS = 3
LN_EPS = 1e-12
ATTN_SCALE = 1.0 / math.sqrt(HEAD_DIM)


# ------------------------------- kernel helpers -------------------------------
def _layernorm_t(x, g, b):
    """LayerNorm over the hidden dim, which is axis 0 in the (H, S) layout."""
    mu = jnp.mean(x, axis=0, keepdims=True)
    var = jnp.mean((x - mu) ** 2, axis=0, keepdims=True)
    return (x - mu) * jax.lax.rsqrt(var + LN_EPS) * g + b


def _gelu(x):
    # tanh-approximation GELU (HF "gelu_new").
    # TODO(synk): exact erf-based GELU to bit-match HF default "gelu" activation.
    return 0.5 * x * (1.0 + jnp.tanh(0.7978845608028654 * (x + 0.044715 * x * x * x)))


def _wx(w_t, x):
    """(out,in) bf16 weight @ (in, S) activation — MXU matmul, f32 accumulate."""
    return jnp.dot(w_t, x.astype(jnp.bfloat16), preferred_element_type=jnp.float32)


# --------------------------- per-segment fused kernel --------------------------
def hibert_seg_kernel(x_ref, mask_ref, emb_g_ref, emb_b_ref,
                      wqkv_ref, bqkv_ref, wo_ref, bo_ref, g1_ref, b1_ref,
                      wi_ref, bi_ref, w2_ref, b2_ref, g2_ref, bln2_ref,
                      wp_ref, bp_ref, wc_ref, bc_ref,
                      out_ref, ctx_ref):
    n_layers = wqkv_ref.shape[0]            # static layer count

    x = _layernorm_t(x_ref[0], emb_g_ref[...], emb_b_ref[...])      # (H, S) f32
    bias = mask_ref[0]                                               # (1, S) additive

    for l in range(n_layers):                                        # static unroll
        # Fused QKV projection in transposed layout: (3H, H) @ (H, S) -> (3H, S).
        qkv = _wx(wqkv_ref[l], x) + bqkv_ref[l]                      # f32

        # One full-width Q transpose per layer (replaces the per-head K.T of the
        # old row-major version); K/V stay column-major so per-head slices are
        # sublane-tile slices (free).
        q_rows = qkv[:HIDDEN, :].T.astype(jnp.bfloat16)              # (S, H)

        # NOTE: heads stay a small static loop — at HEAD_DIM=8 a batched
        # (NUM_HEADS, ...) contraction would waste lanes and add relayouts; at
        # production HEAD_DIM=64 switch to one batched dot_general instead.
        for h in range(NUM_HEADS):
            c0 = h * HEAD_DIM
            q_h = q_rows[:, c0:c0 + HEAD_DIM]                                    # (S, D)
            k_h = qkv[HIDDEN + c0:HIDDEN + c0 + HEAD_DIM, :].astype(jnp.bfloat16)        # (D, S)
            v_h = qkv[2 * HIDDEN + c0:2 * HIDDEN + c0 + HEAD_DIM, :].astype(jnp.bfloat16)  # (D, S)

            # Canonical (S,D)@(D,S) MXU matmul — no per-head transposes.
            s = jnp.dot(q_h, k_h, preferred_element_type=jnp.float32)
            s = s * ATTN_SCALE + bias                                # (S, S) f32
            s = s - jnp.max(s, axis=-1, keepdims=True)
            p = jnp.exp(s)
            p = p * pl.reciprocal(jnp.sum(p, axis=-1, keepdims=True), approx=True)

            # ctx^T[d, i] = sum_j v[d, j] * p[i, j]  (trans_b MXU feed), stored
            # straight into the VMEM scratch — no list accumulation / concat.
            ctx_h = jax.lax.dot_general(
                v_h, p.astype(jnp.bfloat16),
                dimension_numbers=(((1,), (1,)), ((), ())),
                preferred_element_type=jnp.float32)                  # (D, S)
            ctx_ref[c0:c0 + HEAD_DIM, :] = ctx_h

        # Attention output projection + residual + LayerNorm.
        x = _layernorm_t(_wx(wo_ref[l], ctx_ref[...]) + bo_ref[l] + x,
                         g1_ref[l], b1_ref[l])

        # FFN + residual + LayerNorm.
        hmid = _gelu(_wx(wi_ref[l], x) + bi_ref[l])                  # (I, S)
        x = _layernorm_t(_wx(w2_ref[l], hmid) + b2_ref[l] + x,
                         g2_ref[l], bln2_ref[l])

    # Pooler on the [CLS] column only, then classifier (per-segment logits).
    cls = x[:, 0:1]                                                  # (H, 1)
    pooled = jnp.tanh(_wx(wp_ref[...], cls) + bp_ref[...])           # (H, 1)
    logits = _wx(wc_ref[...], pooled) + bc_ref[...]                  # (C, 1)
    out_ref[0] = logits                                              # block (1, C, 1)


def pallas_hibert(embT, mask_bias, params, n_segs):
    """Per-segment fused forward; returns (n_segs, NUM_CLASSES) logits."""
    weight_names = ("emb_g", "emb_b", "wqkv", "bqkv", "wo", "bo", "g1", "b1",
                    "wi", "bi", "w2", "b2", "g2", "bln2", "wp", "bp", "wc", "bc")
    weights = [params[k] for k in weight_names]

    def resident(arr):
        # Full-array block with a constant block index: stays VMEM-resident
        # across the segment grid (no per-step re-DMA).
        nd = arr.ndim
        return pl.BlockSpec(arr.shape, lambda b, _nd=nd: (0,) * _nd)

    in_specs = ([pl.BlockSpec((1, HIDDEN, SEQ), lambda b: (b, 0, 0)),   # embT
                 pl.BlockSpec((1, 1, SEQ), lambda b: (b, 0, 0))]        # mask bias
                + [resident(w) for w in weights])

    seg_logits = pl.pallas_call(
        hibert_seg_kernel,
        out_shape=jax.ShapeDtypeStruct((n_segs, NUM_CLASSES, 1), jnp.float32),
        grid=(n_segs,),
        in_specs=in_specs,
        out_specs=pl.BlockSpec((1, NUM_CLASSES, 1), lambda b: (b, 0, 0)),
        scratch_shapes=[pltpu.VMEM((HIDDEN, SEQ), jnp.float32)],       # ctx buffer
        compiler_params=pltpu.CompilerParams(
            dimension_semantics=("parallel",)),
    )(embT, mask_bias, *weights)
    return seg_logits[..., 0]                                          # (n_segs, C)


# ------------------------------- params & forward ------------------------------
def init_params(key):
    def nrm(k, shape, dtype):
        return (0.02 * jax.random.normal(k, shape)).astype(dtype)

    keys = iter(jax.random.split(key, 16))
    L, H, I, C = NUM_LAYERS, HIDDEN, INTERMEDIATE, NUM_CLASSES
    p = {
        # embeddings (used by plain-JAX gather glue) — keep f32
        "word_emb": nrm(next(keys), (VOCAB, H), jnp.float32),
        "pos_emb": nrm(next(keys), (SEQ, H), jnp.float32),
        "type_emb": nrm(next(keys), (2, H), jnp.float32),
        # LayerNorm / bias params in transposed (dim, 1) layout
        "emb_g": jnp.ones((H, 1), jnp.float32),
        "emb_b": jnp.zeros((H, 1), jnp.float32),
        # encoder weights stacked along layer axis, PRE-TRANSPOSED (out, in), bf16
        "wqkv": nrm(next(keys), (L, 3 * H, H), jnp.bfloat16),
        "bqkv": jnp.zeros((L, 3 * H, 1), jnp.float32),
        "wo": nrm(next(keys), (L, H, H), jnp.bfloat16),
        "bo": jnp.zeros((L, H, 1), jnp.float32),
        "g1": jnp.ones((L, H, 1), jnp.float32),
        "b1": jnp.zeros((L, H, 1), jnp.float32),
        "wi": nrm(next(keys), (L, I, H), jnp.bfloat16),
        "bi": jnp.zeros((L, I, 1), jnp.float32),
        "w2": nrm(next(keys), (L, H, I), jnp.bfloat16),
        "b2": jnp.zeros((L, H, 1), jnp.float32),
        "g2": jnp.ones((L, H, 1), jnp.float32),
        "bln2": jnp.zeros((L, H, 1), jnp.float32),
        # pooler + classifier (pre-transposed: (out, in))
        "wp": nrm(next(keys), (H, H), jnp.bfloat16),
        "bp": jnp.zeros((H, 1), jnp.float32),
        "wc": nrm(next(keys), (C, H), jnp.bfloat16),
        "bc": jnp.zeros((C, 1), jnp.float32),
    }
    return p


def hibert_forward(params, input_ids, input_mask, segment_ids, n_segs):
    # --- glue: mirrors the PyTorch view/slice semantics ---
    # TODO(synk): n_segs is resolved to a host-side int (trace-time constant),
    # matching the PyTorch `[:n_segs]` slice but not a dynamic-shape impl.
    n = int(jnp.reshape(n_segs, (-1,))[0])
    ids = jnp.reshape(input_ids, (-1, SEQ))[:n]        # (n, S)
    mask = jnp.reshape(input_mask, (-1, SEQ))[:n]      # (n, S)
    segs = jnp.reshape(segment_ids, (-1, SEQ))[:n]     # (n, S)

    # --- embeddings (gather glue), flipped to the kernel's (H, S) layout ---
    # TODO(synk): at production scale fuse the embedding gather into the kernel
    # (PrefetchScalarGridSpec row-gather) instead of materializing embT in HBM.
    emb = (params["word_emb"][ids]
           + params["pos_emb"][None, :, :]
           + params["type_emb"][segs]).astype(jnp.float32)          # (n, S, H)
    embT = jnp.transpose(emb, (0, 2, 1))                            # (n, H, S)

    # additive attention bias, HF-style: (1 - mask) * -10000, shape (n, 1, S)
    mask_bias = ((1.0 - mask.astype(jnp.float32)) * -10000.0)[:, None, :]

    # --- fused per-segment Pallas kernel, then max-pool over segments ---
    seg_logits = pallas_hibert(embT, mask_bias, params, n)          # (n, C)
    return jnp.max(seg_logits, axis=0)                              # (NUM_CLASSES,)


# ------------------------------------ main -------------------------------------
if __name__ == "__main__":
    key = jax.random.PRNGKey(0)
    k_param, k_ids, k_mask = jax.random.split(key, 3)

    params = init_params(k_param)

    # document split into MAX_SEGS segments; only the first n_segs are used.
    input_ids = jax.random.randint(k_ids, (1, MAX_SEGS, SEQ), 0, VOCAB, dtype=jnp.int32)
    input_mask = jnp.ones((1, MAX_SEGS, SEQ), jnp.int32)
    # pad out the tail of every segment so the attention mask is exercised
    input_mask = input_mask.at[:, :, SEQ - 16:].set(0)
    segment_ids = jnp.zeros((1, MAX_SEGS, SEQ), jnp.int32)
    n_segs = jnp.array([2], jnp.int32)

    logits = hibert_forward(params, input_ids, input_mask, segment_ids, n_segs)
    logits = jax.block_until_ready(logits)
    assert logits.shape == (NUM_CLASSES,)
    print("KERNEL_OK")
</pallas_src>

<mosaic_0001>
module attributes {stable_mosaic.version = 11 : i64} {
  func.func @hibert_seg_kernel(%arg0: i32, %arg1: memref<1x32x128xf32, #tpu.memory_space<vmem>>, %arg2: memref<1x1x128xf32, #tpu.memory_space<vmem>>, %arg3: memref<32x1xf32, #tpu.memory_space<vmem>>, %arg4: memref<32x1xf32, #tpu.memory_space<vmem>>, %arg5: memref<2x96x32xbf16, #tpu.memory_space<vmem>>, %arg6: memref<2x96x1xf32, #tpu.memory_space<vmem>>, %arg7: memref<2x32x32xbf16, #tpu.memory_space<vmem>>, %arg8: memref<2x32x1xf32, #tpu.memory_space<vmem>>, %arg9: memref<2x32x1xf32, #tpu.memory_space<vmem>>, %arg10: memref<2x32x1xf32, #tpu.memory_space<vmem>>, %arg11: memref<2x64x32xbf16, #tpu.memory_space<vmem>>, %arg12: memref<2x64x1xf32, #tpu.memory_space<vmem>>, %arg13: memref<2x32x64xbf16, #tpu.memory_space<vmem>>, %arg14: memref<2x32x1xf32, #tpu.memory_space<vmem>>, %arg15: memref<2x32x1xf32, #tpu.memory_space<vmem>>, %arg16: memref<2x32x1xf32, #tpu.memory_space<vmem>>, %arg17: memref<32x32xbf16, #tpu.memory_space<vmem>>, %arg18: memref<32x1xf32, #tpu.memory_space<vmem>>, %arg19: memref<4x32xbf16, #tpu.memory_space<vmem>>, %arg20: memref<4x1xf32, #tpu.memory_space<vmem>>, %arg21: memref<1x4x1xf32, #tpu.memory_space<vmem>>, %arg22: memref<32x128xf32, #tpu.memory_space<vmem>>) attributes {dimension_semantics = [#tpu.dimension_semantics<parallel>], iteration_bounds = array<i64: 2>, scalar_prefetch = 0 : i64, scratch_operands = 1 : i64, tpu.core_type = #tpu.core_type<tc>, window_params = [{transform_indices = @transform_0, window_bounds = array<i64: 1, 32, 128>}, {transform_indices = @transform_1, window_bounds = array<i64: 1, 1, 128>}, {pipeline_mode = #tpu.pipeline_mode<synchronous>, transform_indices = @transform_2, window_bounds = array<i64: 32, 1>}, {pipeline_mode = #tpu.pipeline_mode<synchronous>, transform_indices = @transform_3, window_bounds = array<i64: 32, 1>}, {pipeline_mode = #tpu.pipeline_mode<synchronous>, transform_indices = @transform_4, window_bounds = array<i64: 2, 96, 32>}, {pipeline_mode = #tpu.pipeline_mode<synchronous>, transform_indices = @transform_5, window_bounds = array<i64: 2, 96, 1>}, {pipeline_mode = #tpu.pipeline_mode<synchronous>, transform_indices = @transform_6, window_bounds = array<i64: 2, 32, 32>}, {pipeline_mode = #tpu.pipeline_mode<synchronous>, transform_indices = @transform_7, window_bounds = array<i64: 2, 32, 1>}, {pipeline_mode = #tpu.pipeline_mode<synchronous>, transform_indices = @transform_8, window_bounds = array<i64: 2, 32, 1>}, {pipeline_mode = #tpu.pipeline_mode<synchronous>, transform_indices = @transform_9, window_bounds = array<i64: 2, 32, 1>}, {pipeline_mode = #tpu.pipeline_mode<synchronous>, transform_indices = @transform_10, window_bounds = array<i64: 2, 64, 32>}, {pipeline_mode = #tpu.pipeline_mode<synchronous>, transform_indices = @transform_11, window_bounds = array<i64: 2, 64, 1>}, {pipeline_mode = #tpu.pipeline_mode<synchronous>, transform_indices = @transform_12, window_bounds = array<i64: 2, 32, 64>}, {pipeline_mode = #tpu.pipeline_mode<synchronous>, transform_indices = @transform_13, window_bounds = array<i64: 2, 32, 1>}, {pipeline_mode = #tpu.pipeline_mode<synchronous>, transform_indices = @transform_14, window_bounds = array<i64: 2, 32, 1>}, {pipeline_mode = #tpu.pipeline_mode<synchronous>, transform_indices = @transform_15, window_bounds = array<i64: 2, 32, 1>}, {pipeline_mode = #tpu.pipeline_mode<synchronous>, transform_indices = @transform_16, window_bounds = array<i64: 32, 32>}, {pipeline_mode = #tpu.pipeline_mode<synchronous>, transform_indices = @transform_17, window_bounds = array<i64: 32, 1>}, {pipeline_mode = #tpu.pipeline_mode<synchronous>, transform_indices = @transform_18, window_bounds = array<i64: 4, 32>}, {pipeline_mode = #tpu.pipeline_mode<synchronous>, transform_indices = @transform_19, window_bounds = array<i64: 4, 1>}, {transform_indices = @transform_20, window_bounds = array<i64: 1, 4, 1>}]} {
    %c0 = arith.constant 0 : index
    %c0_0 = arith.constant 0 : index
    %c0_1 = arith.constant 0 : index
    %0 = vector.load %arg1[%c0, %c0_0, %c0_1] : memref<1x32x128xf32, #tpu.memory_space<vmem>>, vector<1x32x128xf32>
    %1 = vector.shape_cast %0 : vector<1x32x128xf32> to vector<32x128xf32>
    %c0_2 = arith.constant 0 : index
    %c0_3 = arith.constant 0 : index
    %2 = vector.load %arg3[%c0_2, %c0_3] : memref<32x1xf32, #tpu.memory_space<vmem>>, vector<32x1xf32>
    %c0_4 = arith.constant 0 : index
    %c0_5 = arith.constant 0 : index
    %3 = vector.load %arg4[%c0_4, %c0_5] : memref<32x1xf32, #tpu.memory_space<vmem>>, vector<32x1xf32>
    %cst = arith.constant dense<0.000000e+00> : vector<128xf32>
    %4 = vector.multi_reduction <add>, %1, %cst [0] : vector<32x128xf32> to vector<128xf32>
    %5 = vector.shape_cast %4 : vector<128xf32> to vector<1x128xf32>
    %cst_6 = arith.constant 3.200000e+01 : f32
    %6 = vector.broadcast %cst_6 : f32 to vector<1x128xf32>
    %7 = arith.divf %5, %6 : vector<1x128xf32>
    %8 = vector.broadcast %7 : vector<1x128xf32> to vector<32x128xf32>
    %9 = arith.subf %1, %8 : vector<32x128xf32>
    %10 = arith.mulf %9, %9 : vector<32x128xf32>
    %cst_7 = arith.constant dense<0.000000e+00> : vector<128xf32>
    %11 = vector.multi_reduction <add>, %10, %cst_7 [0] : vector<32x128xf32> to vector<128xf32>
    %12 = vector.shape_cast %11 : vector<128xf32> to vector<1x128xf32>
    %cst_8 = arith.constant 3.200000e+01 : f32
    %13 = vector.broadcast %cst_8 : f32 to vector<1x128xf32>
    %14 = arith.divf %12, %13 : vector<1x128xf32>
    %15 = vector.broadcast %7 : vector<1x128xf32> to vector<32x128xf32>
    %16 = arith.subf %1, %15 : vector<32x128xf32>
    %cst_9 = arith.constant 9.99999996E-13 : f32
    %17 = vector.broadcast %cst_9 : f32 to vector<1x128xf32>
    %18 = arith.addf %14, %17 : vector<1x128xf32>
    %19 = math.rsqrt %18 : vector<1x128xf32>
    %20 = vector.broadcast %19 : vector<1x128xf32> to vector<32x128xf32>
    %21 = arith.mulf %16, %20 : vector<32x128xf32>
    %22 = vector.broadcast %2 : vector<32x1xf32> to vector<32x128xf32>
    %23 = arith.mulf %21, %22 : vector<32x128xf32>
    %24 = vector.broadcast %3 : vector<32x1xf32> to vector<32x128xf32>
    %25 = arith.addf %23, %24 : vector<32x128xf32>
    %c0_10 = arith.constant 0 : index
    %c0_11 = arith.constant 0 : index
    %c0_12 = arith.constant 0 : index
    %26 = vector.load %arg2[%c0_10, %c0_11, %c0_12] : memref<1x1x128xf32, #tpu.memory_space<vmem>>, vector<1x1x128xf32>
    %27 = vector.shape_cast %26 : vector<1x1x128xf32> to vector<1x128xf32>
    %c0_13 = arith.constant 0 : index
    %c0_14 = arith.constant 0 : index
    %c0_15 = arith.constant 0 : index
    %28 = vector.load %arg5[%c0_13, %c0_14, %c0_15] : memref<2x96x32xbf16, #tpu.memory_space<vmem>>, vector<1x96x32xbf16>
    %29 = vector.shape_cast %28 : vector<1x96x32xbf16> to vector<96x32xbf16>
    %30 = arith.truncf %25 : vector<32x128xf32> to vector<32x128xbf16>
    %cst_16 = arith.constant dense<0.000000e+00> : vector<96x128xf32>
    %31 = tpu.matmul %29, %30, %cst_16 {dimension_numbers = #tpu.dot_dimension_numbers<[1], [0], [0], [1], [0, 0, 1, 1], [], []>} : vector<96x32xbf16>, vector<32x128xbf16>, vector<96x128xf32> -> vector<96x128xf32>
    %c0_17 = arith.constant 0 : index
    %c0_18 = arith.constant 0 : index
    %c0_19 = arith.constant 0 : index
    %32 = vector.load %arg6[%c0_17, %c0_18, %c0_19] : memref<2x96x1xf32, #tpu.memory_space<vmem>>, vector<1x96x1xf32>
    %33 = vector.shape_cast %32 : vector<1x96x1xf32> to vector<96x1xf32>
    %34 = vector.broadcast %33 : vector<96x1xf32> to vector<96x128xf32>
    %35 = arith.addf %31, %34 : vector<96x128xf32>
    %36 = vector.extract_strided_slice %35 {offsets = [0, 0], sizes = [32, 128], strides = [1, 1]} : vector<96x128xf32> to vector<32x128xf32>
    %37 = tpu.transpose %36, [1, 0] : vector<32x128xf32> -> vector<128x32xf32>
    %38 = arith.truncf %37 : vector<128x32xf32> to vector<128x32xbf16>
    %39 = vector.extract_strided_slice %38 {offsets = [0, 0], sizes = [128, 8], strides = [1, 1]} : vector<128x32xbf16> to vector<128x8xbf16>
    %40 = vector.extract_strided_slice %35 {offsets = [32, 0], sizes = [8, 128], strides = [1, 1]} : vector<96x128xf32> to vector<8x128xf32>
    %41 = arith.truncf %40 : vector<8x128xf32> to vector<8x128xbf16>
    %42 = vector.extract_strided_slice %35 {offsets = [64, 0], sizes = [8, 128], strides = [1, 1]} : vector<96x128xf32> to vector<8x128xf32>
    %43 = arith.truncf %42 : vector<8x128xf32> to vector<8x128xbf16>
    %cst_20 = arith.constant dense<0.000000e+00> : vector<128x128xf32>
    %44 = tpu.matmul %39, %41, %cst_20 {dimension_numbers = #tpu.dot_dimension_numbers<[1], [0], [0], [1], [0, 0, 1, 1], [], []>} : vector<128x8xbf16>, vector<8x128xbf16>, vector<128x128xf32> -> vector<128x128xf32>
    %cst_21 = arith.constant 0.353553385 : f32
    %45 = vector.broadcast %cst_21 : f32 to vector<128x128xf32>
    %46 = arith.mulf %44, %45 : vector<128x128xf32>
    %47 = vector.broadcast %27 : vector<1x128xf32> to vector<128x128xf32>
    %48 = arith.addf %46, %47 : vector<128x128xf32>
    %cst_22 = arith.constant dense<0xFF800000> : vector<128xf32>
    %49 = vector.multi_reduction <maximumf>, %48, %cst_22 [1] : vector<128x128xf32> to vector<128xf32>
    %50 = vector.shape_cast %49 : vector<128xf32> to vector<128x1xf32>
    %51 = vector.broadcast %50 : vector<128x1xf32> to vector<128x128xf32>
    %52 = arith.subf %48, %51 : vector<128x128xf32>
    %53 = math.exp %52 : vector<128x128xf32>
    %cst_23 = arith.constant dense<0.000000e+00> : vector<128xf32>
    %54 = vector.multi_reduction <add>, %53, %cst_23 [1] : vector<128x128xf32> to vector<128xf32>
    %55 = vector.shape_cast %54 : vector<128xf32> to vector<128x1xf32>
    %56 = tpu.reciprocal %55 {approx = true} : vector<128x1xf32> -> vector<128x1xf32>
    %57 = vector.broadcast %56 : vector<128x1xf32> to vector<128x128xf32>
    %58 = arith.mulf %53, %57 : vector<128x128xf32>
    %59 = arith.truncf %58 : vector<128x128xf32> to vector<128x128xbf16>
    %cst_24 = arith.constant dense<0.000000e+00> : vector<8x128xf32>
    %60 = tpu.matmul %43, %59, %cst_24 {dimension_numbers = #tpu.dot_dimension_numbers<[1], [1], [0], [0], [0, 0, 1, 0], [], []>} : vector<8x128xbf16>, vector<128x128xbf16>, vector<8x128xf32> -> vector<8x128xf32>
    %c0_25 = arith.constant 0 : index
    %c0_26 = arith.constant 0 : index
    %61 = vector.load %arg22[%c0_25, %c0_26] : memref<32x128xf32, #tpu.memory_space<vmem>>, vector<8x128xf32>
    tpu.vector_store %arg22[%c0_25, %c0_26], %60 {strides = array<i32>} : memref<32x128xf32, #tpu.memory_space<vmem>>, vector<8x128xf32>,
    %62 = vector.extract_strided_slice %38 {offsets = [0, 8], sizes = [128, 8], strides = [1, 1]} : vector<128x32xbf16> to vector<128x8xbf16>
    %63 = vector.extract_strided_slice %35 {offsets = [40, 0], sizes = [8, 128], strides = [1, 1]} : vector<96x128xf32> to vector<8x128xf32>
    %64 = arith.truncf %63 : vector<8x128xf32> to vector<8x128xbf16>
    %65 = vector.extract_strided_slice %35 {offsets = [72, 0], sizes = [8, 128], strides = [1, 1]} : vector<96x128xf32> to vector<8x128xf32>
    %66 = arith.truncf %65 : vector<8x128xf32> to vector<8x128xbf16>
    %cst_27 = arith.constant dense<0.000000e+00> : vector<128x128xf32>
    %67 = tpu.matmul %62, %64, %cst_27 {dimension_numbers = #tpu.dot_dimension_numbers<[1], [0], [0], [1], [0, 0, 1, 1], [], []>} : vector<128x8xbf16>, vector<8x128xbf16>, vector<128x128xf32> -> vector<128x128xf32>
    %cst_28 = arith.constant 0.353553385 : f32
    %68 = vector.broadcast %cst_28 : f32 to vector<128x128xf32>
    %69 = arith.mulf %67, %68 : vector<128x128xf32>
    %70 = vector.broadcast %27 : vector<1x128xf32> to vector<128x128xf32>
    %71 = arith.addf %69, %70 : vector<128x128xf32>
    %cst_29 = arith.constant dense<0xFF800000> : vector<128xf32>
    %72 = vector.multi_reduction <maximumf>, %71, %cst_29 [1] : vector<128x128xf32> to vector<128xf32>
    %73 = vector.shape_cast %72 : vector<128xf32> to vector<128x1xf32>
    %74 = vector.broadcast %73 : vector<128x1xf32> to vector<128x128xf32>
    %75 = arith.subf %71, %74 : vector<128x128xf32>
    %76 = math.exp %75 : vector<128x128xf32>
    %cst_30 = arith.constant dense<0.000000e+00> : vector<128xf32>
    %77 = vector.multi_reduction <add>, %76, %cst_30 [1] : vector<128x128xf32> to vector<128xf32>
    %78 = vector.shape_cast %77 : vector<128xf32> to vector<128x1xf32>
    %79 = tpu.reciprocal %78 {approx = true} : vector<128x1xf32> -> vector<128x1xf32>
    %80 = vector.broadcast %79 : vector<128x1xf32> to vector<128x128xf32>
    %81 = arith.mulf %76, %80 : vector<128x128xf32>
    %82 = arith.truncf %81 : vector<128x128xf32> to vector<128x128xbf16>
    %cst_31 = arith.constant dense<0.000000e+00> : vector<8x128xf32>
    %83 = tpu.matmul %66, %82, %cst_31 {dimension_numbers = #tpu.dot_dimension_numbers<[1], [1], [0], [0], [0, 0, 1, 0], [], []>} : vector<8x128xbf16>, vector<128x128xbf16>, vector<8x128xf32> -> vector<8x128xf32>
    %c8 = arith.constant 8 : index
    %c0_32 = arith.constant 0 : index
    %84 = vector.load %arg22[%c8, %c0_32] : memref<32x128xf32, #tpu.memory_space<vmem>>, vector<8x128xf32>
    tpu.vector_store %arg22[%c8, %c0_32], %83 {strides = array<i32>} : memref<32x128xf32, #tpu.memory_space<vmem>>, vector<8x128xf32>,
    %85 = vector.extract_strided_slice %38 {offsets = [0, 16], sizes = [128, 8], strides = [1, 1]} : vector<128x32xbf16> to vector<128x8xbf16>
    %86 = vector.extract_strided_slice %35 {offsets = [48, 0], sizes = [8, 128], strides = [1, 1]} : vector<96x128xf32> to vector<8x128xf32>
    %87 = arith.truncf %86 : vector<8x128xf32> to vector<8x128xbf16>
    %88 = vector.extract_strided_slice %35 {offsets = [80, 0], sizes = [8, 128], strides = [1, 1]} : vector<96x128xf32> to vector<8x128xf32>
    %89 = arith.truncf %88 : vector<8x128xf32> to vector<8x128xbf16>
    %cst_33 = arith.constant dense<0.000000e+00> : vector<128x128xf32>
    %90 = tpu.matmul %85, %87, %cst_33 {dimension_numbers = #tpu.dot_dimension_numbers<[1], [0], [0], [1], [0, 0, 1, 1], [], []>} : vector<128x8xbf16>, vector<8x128xbf16>, vector<128x128xf32> -> vector<128x128xf32>
    %cst_34 = arith.constant 0.353553385 : f32
    %91 = vector.broadcast %cst_34 : f32 to vector<128x128xf32>
    %92 = arith.mulf %90, %91 : vector<128x128xf32>
    %93 = vector.broadcast %27 : vector<1x128xf32> to vector<128x128xf32>
    %94 = arith.addf %92, %93 : vector<128x128xf32>
    %cst_35 = arith.constant dense<0xFF800000> : vector<128xf32>
    %95 = vector.multi_reduction <maximumf>, %94, %cst_35 [1] : vector<128x128xf32> to vector<128xf32>
    %96 = vector.shape_cast %95 : vector<128xf32> to vector<128x1xf32>
    %97 = vector.broadcast %96 : vector<128x1xf32> to vector<128x128xf32>
    %98 = arith.subf %94, %97 : vector<128x128xf32>
    %99 = math.exp %98 : vector<128x128xf32>
    %cst_36 = arith.constant dense<0.000000e+00> : vector<128xf32>
    %100 = vector.multi_reduction <add>, %99, %cst_36 [1] : vector<128x128xf32> to vector<128xf32>
    %101 = vector.shape_cast %100 : vector<128xf32> to vector<128x1xf32>
    %102 = tpu.reciprocal %101 {approx = true} : vector<128x1xf32> -> vector<128x1xf32>
    %103 = vector.broadcast %102 : vector<128x1xf32> to vector<128x128xf32>
    %104 = arith.mulf %99, %103 : vector<128x128xf32>
    %105 = arith.truncf %104 : vector<128x128xf32> to vector<128x128xbf16>
    %cst_37 = arith.constant dense<0.000000e+00> : vector<8x128xf32>
    %106 = tpu.matmul %89, %105, %cst_37 {dimension_numbers = #tpu.dot_dimension_numbers<[1], [1], [0], [0], [0, 0, 1, 0], [], []>} : vector<8x128xbf16>, vector<128x128xbf16>, vector<8x128xf32> -> vector<8x128xf32>
    %c16 = arith.constant 16 : index
    %c0_38 = arith.constant 0 : index
    %107 = vector.load %arg22[%c16, %c0_38] : memref<32x128xf32, #tpu.memory_space<vmem>>, vector<8x128xf32>
    tpu.vector_store %arg22[%c16, %c0_38], %106 {strides = array<i32>} : memref<32x128xf32, #tpu.memory_space<vmem>>, vector<8x128xf32>,
    %108 = vector.extract_strided_slice %38 {offsets = [0, 24], sizes = [128, 8], strides = [1, 1]} : vector<128x32xbf16> to vector<128x8xbf16>
    %109 = vector.extract_strided_slice %35 {offsets = [56, 0], sizes = [8, 128], strides = [1, 1]} : vector<96x128xf32> to vector<8x128xf32>
    %110 = arith.truncf %109 : vector<8x128xf32> to vector<8x128xbf16>
    %111 = vector.extract_strided_slice %35 {offsets = [88, 0], sizes = [8, 128], strides = [1, 1]} : vector<96x128xf32> to vector<8x128xf32>
    %112 = arith.truncf %111 : vector<8x128xf32> to vector<8x128xbf16>
    %cst_39 = arith.constant dense<0.000000e+00> : vector<128x128xf32>
    %113 = tpu.matmul %108, %110, %cst_39 {dimension_numbers = #tpu.dot_dimension_numbers<[1], [0], [0], [1], [0, 0, 1, 1], [], []>} : vector<128x8xbf16>, vector<8x128xbf16>, vector<128x128xf32> -> vector<128x128xf32>
    %cst_40 = arith.constant 0.353553385 : f32
    %114 = vector.broadcast %cst_40 : f32 to vector<128x128xf32>
    %115 = arith.mulf %113, %114 : vector<128x128xf32>
    %116 = vector.broadcast %27 : vector<1x128xf32> to vector<128x128xf32>
    %117 = arith.addf %115, %116 : vector<128x128xf32>
    %cst_41 = arith.constant dense<0xFF800000> : vector<128xf32>
    %118 = vector.multi_reduction <maximumf>, %117, %cst_41 [1] : vector<128x128xf32> to vector<128xf32>
    %119 = vector.shape_cast %118 : vector<128xf32> to vector<128x1xf32>
    %120 = vector.broadcast %119 : vector<128x1xf32> to vector<128x128xf32>
    %121 = arith.subf %117, %120 : vector<128x128xf32>
    %122 = math.exp %121 : vector<128x128xf32>
    %cst_42 = arith.constant dense<0.000000e+00> : vector<128xf32>
    %123 = vector.multi_reduction <add>, %122, %cst_42 [1] : vector<128x128xf32> to vector<128xf32>
    %124 = vector.shape_cast %123 : vector<128xf32> to vector<128x1xf32>
    %125 = tpu.reciprocal %124 {approx = true} : vector<128x1xf32> -> vector<128x1xf32>
    %126 = vector.broadcast %125 : vector<128x1xf32> to vector<128x128xf32>
    %127 = arith.mulf %122, %126 : vector<128x128xf32>
    %128 = arith.truncf %127 : vector<128x128xf32> to vector<128x128xbf16>
    %cst_43 = arith.constant dense<0.000000e+00> : vector<8x128xf32>
    %129 = tpu.matmul %112, %128, %cst_43 {dimension_numbers = #tpu.dot_dimension_numbers<[1], [1], [0], [0], [0, 0, 1, 0], [], []>} : vector<8x128xbf16>, vector<128x128xbf16>, vector<8x128xf32> -> vector<8x128xf32>
    %c24 = arith.constant 24 : index
    %c0_44 = arith.constant 0 : index
    %130 = vector.load %arg22[%c24, %c0_44] : memref<32x128xf32, #tpu.memory_space<vmem>>, vector<8x128xf32>
    tpu.vector_store %arg22[%c24, %c0_44], %129 {strides = array<i32>} : memref<32x128xf32, #tpu.memory_space<vmem>>, vector<8x128xf32>,
    %c0_45 = arith.constant 0 : index
    %c0_46 = arith.constant 0 : index
    %c0_47 = arith.constant 0 : index
    %131 = vector.load %arg7[%c0_45, %c0_46, %c0_47] : memref<2x32x32xbf16, #tpu.memory_space<vmem>>, vector<1x32x32xbf16>
    %132 = vector.shape_cast %131 : vector<1x32x32xbf16> to vector<32x32xbf16>
    %c0_48 = arith.constant 0 : index
    %c0_49 = arith.constant 0 : index
    %133 = vector.load %arg22[%c0_48, %c0_49] : memref<32x128xf32, #tpu.memory_space<vmem>>, vector<32x128xf32>
    %134 = arith.truncf %133 : vector<32x128xf32> to vector<32x128xbf16>
    %cst_50 = arith.constant dense<0.000000e+00> : vector<32x128xf32>
    %135 = tpu.matmul %132, %134, %cst_50 {dimension_numbers = #tpu.dot_dimension_numbers<[1], [0], [0], [1], [0, 0, 1, 1], [], []>} : vector<32x32xbf16>, vector<32x128xbf16>, vector<32x128xf32> -> vector<32x128xf32>
    %c0_51 = arith.constant 0 : index
    %c0_52 = arith.constant 0 : index
    %c0_53 = arith.constant 0 : index
    %136 = vector.load %arg8[%c0_51, %c0_52, %c0_53] : memref<2x32x1xf32, #tpu.memory_space<vmem>>, vector<1x32x1xf32>
    %137 = vector.shape_cast %136 : vector<1x32x1xf32> to vector<32x1xf32>
    %138 = vector.broadcast %137 : vector<32x1xf32> to vector<32x128xf32>
    %139 = arith.addf %135, %138 : vector<32x128xf32>
    %140 = arith.addf %139, %25 : vector<32x128xf32>
    %c0_54 = arith.constant 0 : index
    %c0_55 = arith.constant 0 : index
    %c0_56 = arith.constant 0 : index
    %141 = vector.load %arg9[%c0_54, %c0_55, %c0_56] : memref<2x32x1xf32, #tpu.memory_space<vmem>>, vector<1x32x1xf32>
    %142 = vector.shape_cast %141 : vector<1x32x1xf32> to vector<32x1xf32>
    %c0_57 = arith.constant 0 : index
    %c0_58 = arith.constant 0 : index
    %c0_59 = arith.constant 0 : index
    %143 = vector.load %arg10[%c0_57, %c0_58, %c0_59] : memref<2x32x1xf32, #tpu.memory_space<vmem>>, vector<1x32x1xf32>
    %144 = vector.shape_cast %143 : vector<1x32x1xf32> to vector<32x1xf32>
    %cst_60 = arith.constant dense<0.000000e+00> : vector<128xf32>
    %145 = vector.multi_reduction <add>, %140, %cst_60 [0] : vector<32x128xf32> to vector<128xf32>
    %146 = vector.shape_cast %145 : vector<128xf32> to vector<1x128xf32>
    %cst_61 = arith.constant 3.200000e+01 : f32
    %147 = vector.broadcast %cst_61 : f32 to vector<1x128xf32>
    %148 = arith.divf %146, %147 : vector<1x128xf32>
    %149 = vector.broadcast %148 : vector<1x128xf32> to vector<32x128xf32>
    %150 = arith.subf %140, %149 : vector<32x128xf32>
    %151 = arith.mulf %150, %150 : vector<32x128xf32>
    %cst_62 = arith.constant dense<0.000000e+00> : vector<128xf32>
    %152 = vector.multi_reduction <add>, %151, %cst_62 [0] : vector<32x128xf32> to vector<128xf32>
    %153 = vector.shape_cast %152 : vector<128xf32> to vector<1x128xf32>
    %cst_63 = arith.constant 3.200000e+01 : f32
    %154 = vector.broadcast %cst_63 : f32 to vector<1x128xf32>
    %155 = arith.divf %153, %154 : vector<1x128xf32>
    %156 = vector.broadcast %148 : vector<1x128xf32> to vector<32x128xf32>
    %157 = arith.subf %140, %156 : vector<32x128xf32>
    %cst_64 = arith.constant 9.99999996E-13 : f32
    %158 = vector.broadcast %cst_64 : f32 to vector<1x128xf32>
    %159 = arith.addf %155, %158 : vector<1x128xf32>
    %160 = math.rsqrt %159 : vector<1x128xf32>
    %161 = vector.broadcast %160 : vector<1x128xf32> to vector<32x128xf32>
    %162 = arith.mulf %157, %161 : vector<32x128xf32>
    %163 = vector.broadcast %142 : vector<32x1xf32> to vector<32x128xf32>
    %164 = arith.mulf %162, %163 : vector<32x128xf32>
    %165 = vector.broadcast %144 : vector<32x1xf32> to vector<32x128xf32>
    %166 = arith.addf %164, %165 : vector<32x128xf32>
    %c0_65 = arith.constant 0 : index
    %c0_66 = arith.constant 0 : index
    %c0_67 = arith.constant 0 : index
    %167 = vector.load %arg11[%c0_65, %c0_66, %c0_67] : memref<2x64x32xbf16, #tpu.memory_space<vmem>>, vector<1x64x32xbf16>
    %168 = vector.shape_cast %167 : vector<1x64x32xbf16> to vector<64x32xbf16>
    %169 = arith.truncf %166 : vector<32x128xf32> to vector<32x128xbf16>
    %cst_68 = arith.constant dense<0.000000e+00> : vector<64x128xf32>
    %170 = tpu.matmul %168, %169, %cst_68 {dimension_numbers = #tpu.dot_dimension_numbers<[1], [0], [0], [1], [0, 0, 1, 1], [], []>} : vector<64x32xbf16>, vector<32x128xbf16>, vector<64x128xf32> -> vector<64x128xf32>
    %c0_69 = arith.constant 0 : index
    %c0_70 = arith.constant 0 : index
    %c0_71 = arith.constant 0 : index
    %171 = vector.load %arg12[%c0_69, %c0_70, %c0_71] : memref<2x64x1xf32, #tpu.memory_space<vmem>>, vector<1x64x1xf32>
    %172 = vector.shape_cast %171 : vector<1x64x1xf32> to vector<64x1xf32>
    %173 = vector.broadcast %172 : vector<64x1xf32> to vector<64x128xf32>
    %174 = arith.addf %170, %173 : vector<64x128xf32>
    %cst_72 = arith.constant 5.000000e-01 : f32
    %175 = vector.broadcast %cst_72 : f32 to vector<64x128xf32>
    %176 = arith.mulf %175, %174 : vector<64x128xf32>
    %cst_73 = arith.constant 4.471500e-02 : f32
    %177 = vector.broadcast %cst_73 : f32 to vector<64x128xf32>
    %178 = arith.mulf %177, %174 : vector<64x128xf32>
    %179 = arith.mulf %178, %174 : vector<64x128xf32>
    %180 = arith.mulf %179, %174 : vector<64x128xf32>
    %181 = arith.addf %174, %180 : vector<64x128xf32>
    %cst_74 = arith.constant 0.797884583 : f32
    %182 = vector.broadcast %cst_74 : f32 to vector<64x128xf32>
    %183 = arith.mulf %182, %181 : vector<64x128xf32>
    %184 = math.tanh %183 : vector<64x128xf32>
    %cst_75 = arith.constant 1.000000e+00 : f32
    %185 = vector.broadcast %cst_75 : f32 to vector<64x128xf32>
    %186 = arith.addf %185, %184 : vector<64x128xf32>
    %187 = arith.mulf %176, %186 : vector<64x128xf32>
    %c0_76 = arith.constant 0 : index
    %c0_77 = arith.constant 0 : index
    %c0_78 = arith.constant 0 : index
    %188 = vector.load %arg13[%c0_76, %c0_77, %c0_78] : memref<2x32x64xbf16, #tpu.memory_space<vmem>>, vector<1x32x64xbf16>
    %189 = vector.shape_cast %188 : vector<1x32x64xbf16> to vector<32x64xbf16>
    %190 = arith.truncf %187 : vector<64x128xf32> to vector<64x128xbf16>
    %cst_79 = arith.constant dense<0.000000e+00> : vector<32x128xf32>
    %191 = tpu.matmul %189, %190, %cst_79 {dimension_numbers = #tpu.dot_dimension_numbers<[1], [0], [0], [1], [0, 0, 1, 1], [], []>} : vector<32x64xbf16>, vector<64x128xbf16>, vector<32x128xf32> -> vector<32x128xf32>
    %c0_80 = arith.constant 0 : index
    %c0_81 = arith.constant 0 : index
    %c0_82 = arith.constant 0 : index
    %192 = vector.load %arg14[%c0_80, %c0_81, %c0_82] : memref<2x32x1xf32, #tpu.memory_space<vmem>>, vector<1x32x1xf32>
    %193 = vector.shape_cast %192 : vector<1x32x1xf32> to vector<32x1xf32>
    %194 = vector.broadcast %193 : vector<32x1xf32> to vector<32x128xf32>
    %195 = arith.addf %191, %194 : vector<32x128xf32>
    %196 = arith.addf %195, %166 : vector<32x128xf32>
    %c0_83 = arith.constant 0 : index
    %c0_84 = arith.constant 0 : index
    %c0_85 = arith.constant 0 : index
    %197 = vector.load %arg15[%c0_83, %c0_84, %c0_85] : memref<2x32x1xf32, #tpu.memory_space<vmem>>, vector<1x32x1xf32>
    %198 = vector.shape_cast %197 : vector<1x32x1xf32> to vector<32x1xf32>
    %c0_86 = arith.constant 0 : index
    %c0_87 = arith.constant 0 : index
    %c0_88 = arith.constant 0 : index
    %199 = vector.load %arg16[%c0_86, %c0_87, %c0_88] : memref<2x32x1xf32, #tpu.memory_space<vmem>>, vector<1x32x1xf32>
    %200 = vector.shape_cast %199 : vector<1x32x1xf32> to vector<32x1xf32>
    %cst_89 = arith.constant dense<0.000000e+00> : vector<128xf32>
    %201 = vector.multi_reduction <add>, %196, %cst_89 [0] : vector<32x128xf32> to vector<128xf32>
    %202 = vector.shape_cast %201 : vector<128xf32> to vector<1x128xf32>
    %cst_90 = arith.constant 3.200000e+01 : f32
    %203 = vector.broadcast %cst_90 : f32 to vector<1x128xf32>
    %204 = arith.divf %202, %203 : vector<1x128xf32>
    %205 = vector.broadcast %204 : vector<1x128xf32> to vector<32x128xf32>
    %206 = arith.subf %196, %205 : vector<32x128xf32>
    %207 = arith.mulf %206, %206 : vector<32x128xf32>
    %cst_91 = arith.constant dense<0.000000e+00> : vector<128xf32>
    %208 = vector.multi_reduction <add>, %207, %cst_91 [0] : vector<32x128xf32> to vector<128xf32>
    %209 = vector.shape_cast %208 : vector<128xf32> to vector<1x128xf32>
    %cst_92 = arith.constant 3.200000e+01 : f32
    %210 = vector.broadcast %cst_92 : f32 to vector<1x128xf32>
    %211 = arith.divf %209, %210 : vector<1x128xf32>
    %212 = vector.broadcast %204 : vector<1x128xf32> to vector<32x128xf32>
    %213 = arith.subf %196, %212 : vector<32x128xf32>
    %cst_93 = arith.constant 9.99999996E-13 : f32
    %214 = vector.broadcast %cst_93 : f32 to vector<1x128xf32>
    %215 = arith.addf %211, %214 : vector<1x128xf32>
    %216 = math.rsqrt %215 : vector<1x128xf32>
    %217 = vector.broadcast %216 : vector<1x128xf32> to vector<32x128xf32>
    %218 = arith.mulf %213, %217 : vector<32x128xf32>
    %219 = vector.broadcast %198 : vector<32x1xf32> to vector<32x128xf32>
    %220 = arith.mulf %218, %219 : vector<32x128xf32>
    %221 = vector.broadcast %200 : vector<32x1xf32> to vector<32x128xf32>
    %222 = arith.addf %220, %221 : vector<32x128xf32>
    %c1 = arith.constant 1 : index
    %c0_94 = arith.constant 0 : index
    %c0_95 = arith.constant 0 : index
    %223 = vector.load %arg5[%c1, %c0_94, %c0_95] : memref<2x96x32xbf16, #tpu.memory_space<vmem>>, vector<1x96x32xbf16>
    %224 = vector.shape_cast %223 : vector<1x96x32xbf16> to vector<96x32xbf16>
    %225 = arith.truncf %222 : vector<32x128xf32> to vector<32x128xbf16>
    %cst_96 = arith.constant dense<0.000000e+00> : vector<96x128xf32>
    %226 = tpu.matmul %224, %225, %cst_96 {dimension_numbers = #tpu.dot_dimension_numbers<[1], [0], [0], [1], [0, 0, 1, 1], [], []>} : vector<96x32xbf16>, vector<32x128xbf16>, vector<96x128xf32> -> vector<96x128xf32>
    %c1_97 = arith.constant 1 : index
    %c0_98 = arith.constant 0 : index
    %c0_99 = arith.constant 0 : index
    %227 = vector.load %arg6[%c1_97, %c0_98, %c0_99] : memref<2x96x1xf32, #tpu.memory_space<vmem>>, vector<1x96x1xf32>
    %228 = vector.shape_cast %227 : vector<1x96x1xf32> to vector<96x1xf32>
    %229 = vector.broadcast %228 : vector<96x1xf32> to vector<96x128xf32>
    %230 = arith.addf %226, %229 : vector<96x128xf32>
    %231 = vector.extract_strided_slice %230 {offsets = [0, 0], sizes = [32, 128], strides = [1, 1]} : vector<96x128xf32> to vector<32x128xf32>
    %232 = tpu.transpose %231, [1, 0] : vector<32x128xf32> -> vector<128x32xf32>
    %233 = arith.truncf %232 : vector<128x32xf32> to vector<128x32xbf16>
    %234 = vector.extract_strided_slice %233 {offsets = [0, 0], sizes = [128, 8], strides = [1, 1]} : vector<128x32xbf16> to vector<128x8xbf16>
    %235 = vector.extract_strided_slice %230 {offsets = [32, 0], sizes = [8, 128], strides = [1, 1]} : vector<96x128xf32> to vector<8x128xf32>
    %236 = arith.truncf %235 : vector<8x128xf32> to vector<8x128xbf16>
    %237 = vector.extract_strided_slice %230 {offsets = [64, 0], sizes = [8, 128], strides = [1, 1]} : vector<96x128xf32> to vector<8x128xf32>
    %238 = arith.truncf %237 : vector<8x128xf32> to vector<8x128xbf16>
    %cst_100 = arith.constant dense<0.000000e+00> : vector<128x128xf32>
    %239 = tpu.matmul %234, %236, %cst_100 {dimension_numbers = #tpu.dot_dimension_numbers<[1], [0], [0], [1], [0, 0, 1, 1], [], []>} : vector<128x8xbf16>, vector<8x128xbf16>, vector<128x128xf32> -> vector<128x128xf32>
    %cst_101 = arith.constant 0.353553385 : f32
    %240 = vector.broadcast %cst_101 : f32 to vector<128x128xf32>
    %241 = arith.mulf %239, %240 : vector<128x128xf32>
    %242 = vector.broadcast %27 : vector<1x128xf32> to vector<128x128xf32>
    %243 = arith.addf %241, %242 : vector<128x128xf32>
    %cst_102 = arith.constant dense<0xFF800000> : vector<128xf32>
    %244 = vector.multi_reduction <maximumf>, %243, %cst_102 [1] : vector<128x128xf32> to vector<128xf32>
    %245 = vector.shape_cast %244 : vector<128xf32> to vector<128x1xf32>
    %246 = vector.broadcast %245 : vector<128x1xf32> to vector<128x128xf32>
    %247 = arith.subf %243, %246 : vector<128x128xf32>
    %248 = math.exp %247 : vector<128x128xf32>
    %cst_103 = arith.constant dense<0.000000e+00> : vector<128xf32>
    %249 = vector.multi_reduction <add>, %248, %cst_103 [1] : vector<128x128xf32> to vector<128xf32>
    %250 = vector.shape_cast %249 : vector<128xf32> to vector<128x1xf32>
    %251 = tpu.reciprocal %250 {approx = true} : vector<128x1xf32> -> vector<128x1xf32>
    %252 = vector.broadcast %251 : vector<128x1xf32> to vector<128x128xf32>
    %253 = arith.mulf %248, %252 : vector<128x128xf32>
    %254 = arith.truncf %253 : vector<128x128xf32> to vector<128x128xbf16>
    %cst_104 = arith.constant dense<0.000000e+00> : vector<8x128xf32>
    %255 = tpu.matmul %238, %254, %cst_104 {dimension_numbers = #tpu.dot_dimension_numbers<[1], [1], [0], [0], [0, 0, 1, 0], [], []>} : vector<8x128xbf16>, vector<128x128xbf16>, vector<8x128xf32> -> vector<8x128xf32>
    %c0_105 = arith.constant 0 : index
    %c0_106 = arith.constant 0 : index
    %256 = vector.load %arg22[%c0_105, %c0_106] : memref<32x128xf32, #tpu.memory_space<vmem>>, vector<8x128xf32>
    tpu.vector_store %arg22[%c0_105, %c0_106], %255 {strides = array<i32>} : memref<32x128xf32, #tpu.memory_space<vmem>>, vector<8x128xf32>,
    %257 = vector.extract_strided_slice %233 {offsets = [0, 8], sizes = [128, 8], strides = [1, 1]} : vector<128x32xbf16> to vector<128x8xbf16>
    %258 = vector.extract_strided_slice %230 {offsets = [40, 0], sizes = [8, 128], strides = [1, 1]} : vector<96x128xf32> to vector<8x128xf32>
    %259 = arith.truncf %258 : vector<8x128xf32> to vector<8x128xbf16>
    %260 = vector.extract_strided_slice %230 {offsets = [72, 0], sizes = [8, 128], strides = [1, 1]} : vector<96x128xf32> to vector<8x128xf32>
    %261 = arith.truncf %260 : vector<8x128xf32> to vector<8x128xbf16>
    %cst_107 = arith.constant dense<0.000000e+00> : vector<128x128xf32>
    %262 = tpu.matmul %257, %259, %cst_107 {dimension_numbers = #tpu.dot_dimension_numbers<[1], [0], [0], [1], [0, 0, 1, 1], [], []>} : vector<128x8xbf16>, vector<8x128xbf16>, vector<128x128xf32> -> vector<128x128xf32>
    %cst_108 = arith.constant 0.353553385 : f32
    %263 = vector.broadcast %cst_108 : f32 to vector<128x128xf32>
    %264 = arith.mulf %262, %263 : vector<128x128xf32>
    %265 = vector.broadcast %27 : vector<1x128xf32> to vector<128x128xf32>
    %266 = arith.addf %264, %265 : vector<128x128xf32>
    %cst_109 = arith.constant dense<0xFF800000> : vector<128xf32>
    %267 = vector.multi_reduction <maximumf>, %266, %cst_109 [1] : vector<128x128xf32> to vector<128xf32>
    %268 = vector.shape_cast %267 : vector<128xf32> to vector<128x1xf32>
    %269 = vector.broadcast %268 : vector<128x1xf32> to vector<128x128xf32>
    %270 = arith.subf %266, %269 : vector<128x128xf32>
    %271 = math.exp %270 : vector<128x128xf32>
    %cst_110 = arith.constant dense<0.000000e+00> : vector<128xf32>
    %272 = vector.multi_reduction <add>, %271, %cst_110 [1] : vector<128x128xf32> to vector<128xf32>
    %273 = vector.shape_cast %272 : vector<128xf32> to vector<128x1xf32>
    %274 = tpu.reciprocal %273 {approx = true} : vector<128x1xf32> -> vector<128x1xf32>
    %275 = vector.broadcast %274 : vector<128x1xf32> to vector<128x128xf32>
    %276 = arith.mulf %271, %275 : vector<128x128xf32>
    %277 = arith.truncf %276 : vector<128x128xf32> to vector<128x128xbf16>
    %cst_111 = arith.constant dense<0.000000e+00> : vector<8x128xf32>
    %278 = tpu.matmul %261, %277, %cst_111 {dimension_numbers = #tpu.dot_dimension_numbers<[1], [1], [0], [0], [0, 0, 1, 0], [], []>} : vector<8x128xbf16>, vector<128x128xbf16>, vector<8x128xf32> -> vector<8x128xf32>
    %c8_112 = arith.constant 8 : index
    %c0_113 = arith.constant 0 : index
    %279 = vector.load %arg22[%c8_112, %c0_113] : memref<32x128xf32, #tpu.memory_space<vmem>>, vector<8x128xf32>
    tpu.vector_store %arg22[%c8_112, %c0_113], %278 {strides = array<i32>} : memref<32x128xf32, #tpu.memory_space<vmem>>, vector<8x128xf32>,
    %280 = vector.extract_strided_slice %233 {offsets = [0, 16], sizes = [128, 8], strides = [1, 1]} : vector<128x32xbf16> to vector<128x8xbf16>
    %281 = vector.extract_strided_slice %230 {offsets = [48, 0], sizes = [8, 128], strides = [1, 1]} : vector<96x128xf32> to vector<8x128xf32>
    %282 = arith.truncf %281 : vector<8x128xf32> to vector<8x128xbf16>
    %283 = vector.extract_strided_slice %230 {offsets = [80, 0], sizes = [8, 128], strides = [1, 1]} : vector<96x128xf32> to vector<8x128xf32>
    %284 = arith.truncf %283 : vector<8x128xf32> to vector<8x128xbf16>
    %cst_114 = arith.constant dense<0.000000e+00> : vector<128x128xf32>
    %285 = tpu.matmul %280, %282, %cst_114 {dimension_numbers = #tpu.dot_dimension_numbers<[1], [0], [0], [1], [0, 0, 1, 1], [], []>} : vector<128x8xbf16>, vector<8x128xbf16>, vector<128x128xf32> -> vector<128x128xf32>
    %cst_115 = arith.constant 0.353553385 : f32
    %286 = vector.broadcast %cst_115 : f32 to vector<128x128xf32>
    %287 = arith.mulf %285, %286 : vector<128x128xf32>
    %288 = vector.broadcast %27 : vector<1x128xf32> to vector<128x128xf32>
    %289 = arith.addf %287, %288 : vector<128x128xf32>
    %cst_116 = arith.constant dense<0xFF800000> : vector<128xf32>
    %290 = vector.multi_reduction <maximumf>, %289, %cst_116 [1] : vector<128x128xf32> to vector<128xf32>
    %291 = vector.shape_cast %290 : vector<128xf32> to vector<128x1xf32>
    %292 = vector.broadcast %291 : vector<128x1xf32> to vector<128x128xf32>
    %293 = arith.subf %289, %292 : vector<128x128xf32>
    %294 = math.exp %293 : vector<128x128xf32>
    %cst_117 = arith.constant dense<0.000000e+00> : vector<128xf32>
    %295 = vector.multi_reduction <add>, %294, %cst_117 [1] : vector<128x128xf32> to vector<128xf32>
    %296 = vector.shape_cast %295 : vector<128xf32> to vector<128x1xf32>
    %297 = tpu.reciprocal %296 {approx = true} : vector<128x1xf32> -> vector<128x1xf32>
    %298 = vector.broadcast %297 : vector<128x1xf32> to vector<128x128xf32>
    %299 = arith.mulf %294, %298 : vector<128x128xf32>
    %300 = arith.truncf %299 : vector<128x128xf32> to vector<128x128xbf16>
    %cst_118 = arith.constant dense<0.000000e+00> : vector<8x128xf32>
    %301 = tpu.matmul %284, %300, %cst_118 {dimension_numbers = #tpu.dot_dimension_numbers<[1], [1], [0], [0], [0, 0, 1, 0], [], []>} : vector<8x128xbf16>, vector<128x128xbf16>, vector<8x128xf32> -> vector<8x128xf32>
    %c16_119 = arith.constant 16 : index
    %c0_120 = arith.constant 0 : index
    %302 = vector.load %arg22[%c16_119, %c0_120] : memref<32x128xf32, #tpu.memory_space<vmem>>, vector<8x128xf32>
    tpu.vector_store %arg22[%c16_119, %c0_120], %301 {strides = array<i32>} : memref<32x128xf32, #tpu.memory_space<vmem>>, vector<8x128xf32>,
    %303 = vector.extract_strided_slice %233 {offsets = [0, 24], sizes = [128, 8], strides = [1, 1]} : vector<128x32xbf16> to vector<128x8xbf16>
    %304 = vector.extract_strided_slice %230 {offsets = [56, 0], sizes = [8, 128], strides = [1, 1]} : vector<96x128xf32> to vector<8x128xf32>
    %305 = arith.truncf %304 : vector<8x128xf32> to vector<8x128xbf16>
    %306 = vector.extract_strided_slice %230 {offsets = [88, 0], sizes = [8, 128], strides = [1, 1]} : vector<96x128xf32> to vector<8x128xf32>
    %307 = arith.truncf %306 : vector<8x128xf32> to vector<8x128xbf16>
    %cst_121 = arith.constant dense<0.000000e+00> : vector<128x128xf32>
    %308 = tpu.matmul %303, %305, %cst_121 {dimension_numbers = #tpu.dot_dimension_numbers<[1], [0], [0], [1], [0, 0, 1, 1], [], []>} : vector<128x8xbf16>, vector<8x128xbf16>, vector<128x128xf32> -> vector<128x128xf32>
    %cst_122 = arith.constant 0.353553385 : f32
    %309 = vector.broadcast %cst_122 : f32 to vector<128x128xf32>
    %310 = arith.mulf %308, %309 : vector<128x128xf32>
    %311 = vector.broadcast %27 : vector<1x128xf32> to vector<128x128xf32>
    %312 = arith.addf %310, %311 : vector<128x128xf32>
    %cst_123 = arith.constant dense<0xFF800000> : vector<128xf32>
    %313 = vector.multi_reduction <maximumf>, %312, %cst_123 [1] : vector<128x128xf32> to vector<128xf32>
    %314 = vector.shape_cast %313 : vector<128xf32> to vector<128x1xf32>
    %315 = vector.broadcast %314 : vector<128x1xf32> to vector<128x128xf32>
    %316 = arith.subf %312, %315 : vector<128x128xf32>
    %317 = math.exp %316 : vector<128x128xf32>
    %cst_124 = arith.constant dense<0.000000e+00> : vector<128xf32>
    %318 = vector.multi_reduction <add>, %317, %cst_124 [1] : vector<128x128xf32> to vector<128xf32>
    %319 = vector.shape_cast %318 : vector<128xf32> to vector<128x1xf32>
    %320 = tpu.reciprocal %319 {approx = true} : vector<128x1xf32> -> vector<128x1xf32>
    %321 = vector.broadcast %320 : vector<128x1xf32> to vector<128x128xf32>
    %322 = arith.mulf %317, %321 : vector<128x128xf32>
    %323 = arith.truncf %322 : vector<128x128xf32> to vector<128x128xbf16>
    %cst_125 = arith.constant dense<0.000000e+00> : vector<8x128xf32>
    %324 = tpu.matmul %307, %323, %cst_125 {dimension_numbers = #tpu.dot_dimension_numbers<[1], [1], [0], [0], [0, 0, 1, 0], [], []>} : vector<8x128xbf16>, vector<128x128xbf16>, vector<8x128xf32> -> vector<8x128xf32>
    %c24_126 = arith.constant 24 : index
    %c0_127 = arith.constant 0 : index
    %325 = vector.load %arg22[%c24_126, %c0_127] : memref<32x128xf32, #tpu.memory_space<vmem>>, vector<8x128xf32>
    tpu.vector_store %arg22[%c24_126, %c0_127], %324 {strides = array<i32>} : memref<32x128xf32, #tpu.memory_space<vmem>>, vector<8x128xf32>,
    %c1_128 = arith.constant 1 : index
    %c0_129 = arith.constant 0 : index
    %c0_130 = arith.constant 0 : index
    %326 = vector.load %arg7[%c1_128, %c0_129, %c0_130] : memref<2x32x32xbf16, #tpu.memory_space<vmem>>, vector<1x32x32xbf16>
    %327 = vector.shape_cast %326 : vector<1x32x32xbf16> to vector<32x32xbf16>
    %c0_131 = arith.constant 0 : index
    %c0_132 = arith.constant 0 : index
    %328 = vector.load %arg22[%c0_131, %c0_132] : memref<32x128xf32, #tpu.memory_space<vmem>>, vector<32x128xf32>
    %329 = arith.truncf %328 : vector<32x128xf32> to vector<32x128xbf16>
    %cst_133 = arith.constant dense<0.000000e+00> : vector<32x128xf32>
    %330 = tpu.matmul %327, %329, %cst_133 {dimension_numbers = #tpu.dot_dimension_numbers<[1], [0], [0], [1], [0, 0, 1, 1], [], []>} : vector<32x32xbf16>, vector<32x128xbf16>, vector<32x128xf32> -> vector<32x128xf32>
    %c1_134 = arith.constant 1 : index
    %c0_135 = arith.constant 0 : index
    %c0_136 = arith.constant 0 : index
    %331 = vector.load %arg8[%c1_134, %c0_135, %c0_136] : memref<2x32x1xf32, #tpu.memory_space<vmem>>, vector<1x32x1xf32>
    %332 = vector.shape_cast %331 : vector<1x32x1xf32> to vector<32x1xf32>
    %333 = vector.broadcast %332 : vector<32x1xf32> to vector<32x128xf32>
    %334 = arith.addf %330, %333 : vector<32x128xf32>
    %335 = arith.addf %334, %222 : vector<32x128xf32>
    %c1_137 = arith.constant 1 : index
    %c0_138 = arith.constant 0 : index
    %c0_139 = arith.constant 0 : index
    %336 = vector.load %arg9[%c1_137, %c0_138, %c0_139] : memref<2x32x1xf32, #tpu.memory_space<vmem>>, vector<1x32x1xf32>
    %337 = vector.shape_cast %336 : vector<1x32x1xf32> to vector<32x1xf32>
    %c1_140 = arith.constant 1 : index
    %c0_141 = arith.constant 0 : index
    %c0_142 = arith.constant 0 : index
    %338 = vector.load %arg10[%c1_140, %c0_141, %c0_142] : memref<2x32x1xf32, #tpu.memory_space<vmem>>, vector<1x32x1xf32>
    %339 = vector.shape_cast %338 : vector<1x32x1xf32> to vector<32x1xf32>
    %cst_143 = arith.constant dense<0.000000e+00> : vector<128xf32>
    %340 = vector.multi_reduction <add>, %335, %cst_143 [0] : vector<32x128xf32> to vector<128xf32>
    %341 = vector.shape_cast %340 : vector<128xf32> to vector<1x128xf32>
    %cst_144 = arith.constant 3.200000e+01 : f32
    %342 = vector.broadcast %cst_144 : f32 to vector<1x128xf32>
    %343 = arith.divf %341, %342 : vector<1x128xf32>
    %344 = vector.broadcast %343 : vector<1x128xf32> to vector<32x128xf32>
    %345 = arith.subf %335, %344 : vector<32x128xf32>
    %346 = arith.mulf %345, %345 : vector<32x128xf32>
    %cst_145 = arith.constant dense<0.000000e+00> : vector<128xf32>
    %347 = vector.multi_reduction <add>, %346, %cst_145 [0] : vector<32x128xf32> to vector<128xf32>
    %348 = vector.shape_cast %347 : vector<128xf32> to vector<1x128xf32>
    %cst_146 = arith.constant 3.200000e+01 : f32
    %349 = vector.broadcast %cst_146 : f32 to vector<1x128xf32>
    %350 = arith.divf %348, %349 : vector<1x128xf32>
    %351 = vector.broadcast %343 : vector<1x128xf32> to vector<32x128xf32>
    %352 = arith.subf %335, %351 : vector<32x128xf32>
    %cst_147 = arith.constant 9.99999996E-13 : f32
    %353 = vector.broadcast %cst_147 : f32 to vector<1x128xf32>
    %354 = arith.addf %350, %353 : vector<1x128xf32>
    %355 = math.rsqrt %354 : vector<1x128xf32>
    %356 = vector.broadcast %355 : vector<1x128xf32> to vector<32x128xf32>
    %357 = arith.mulf %352, %356 : vector<32x128xf32>
    %358 = vector.broadcast %337 : vector<32x1xf32> to vector<32x128xf32>
    %359 = arith.mulf %357, %358 : vector<32x128xf32>
    %360 = vector.broadcast %339 : vector<32x1xf32> to vector<32x128xf32>
    %361 = arith.addf %359, %360 : vector<32x128xf32>
    %c1_148 = arith.constant 1 : index
    %c0_149 = arith.constant 0 : index
    %c0_150 = arith.constant 0 : index
    %362 = vector.load %arg11[%c1_148, %c0_149, %c0_150] : memref<2x64x32xbf16, #tpu.memory_space<vmem>>, vector<1x64x32xbf16>
    %363 = vector.shape_cast %362 : vector<1x64x32xbf16> to vector<64x32xbf16>
    %364 = arith.truncf %361 : vector<32x128xf32> to vector<32x128xbf16>
    %cst_151 = arith.constant dense<0.000000e+00> : vector<64x128xf32>
    %365 = tpu.matmul %363, %364, %cst_151 {dimension_numbers = #tpu.dot_dimension_numbers<[1], [0], [0], [1], [0, 0, 1, 1], [], []>} : vector<64x32xbf16>, vector<32x128xbf16>, vector<64x128xf32> -> vector<64x128xf32>
    %c1_152 = arith.constant 1 : index
    %c0_153 = arith.constant 0 : index
    %c0_154 = arith.constant 0 : index
    %366 = vector.load %arg12[%c1_152, %c0_153, %c0_154] : memref<2x64x1xf32, #tpu.memory_space<vmem>>, vector<1x64x1xf32>
    %367 = vector.shape_cast %366 : vector<1x64x1xf32> to vector<64x1xf32>
    %368 = vector.broadcast %367 : vector<64x1xf32> to vector<64x128xf32>
    %369 = arith.addf %365, %368 : vector<64x128xf32>
    %cst_155 = arith.constant 5.000000e-01 : f32
    %370 = vector.broadcast %cst_155 : f32 to vector<64x128xf32>
    %371 = arith.mulf %370, %369 : vector<64x128xf32>
    %cst_156 = arith.constant 4.471500e-02 : f32
    %372 = vector.broadcast %cst_156 : f32 to vector<64x128xf32>
    %373 = arith.mulf %372, %369 : vector<64x128xf32>
    %374 = arith.mulf %373, %369 : vector<64x128xf32>
    %375 = arith.mulf %374, %369 : vector<64x128xf32>
    %376 = arith.addf %369, %375 : vector<64x128xf32>
    %cst_157 = arith.constant 0.797884583 : f32
    %377 = vector.broadcast %cst_157 : f32 to vector<64x128xf32>
    %378 = arith.mulf %377, %376 : vector<64x128xf32>
    %379 = math.tanh %378 : vector<64x128xf32>
    %cst_158 = arith.constant 1.000000e+00 : f32
    %380 = vector.broadcast %cst_158 : f32 to vector<64x128xf32>
    %381 = arith.addf %380, %379 : vector<64x128xf32>
    %382 = arith.mulf %371, %381 : vector<64x128xf32>
    %c1_159 = arith.constant 1 : index
    %c0_160 = arith.constant 0 : index
    %c0_161 = arith.constant 0 : index
    %383 = vector.load %arg13[%c1_159, %c0_160, %c0_161] : memref<2x32x64xbf16, #tpu.memory_space<vmem>>, vector<1x32x64xbf16>
    %384 = vector.shape_cast %383 : vector<1x32x64xbf16> to vector<32x64xbf16>
    %385 = arith.truncf %382 : vector<64x128xf32> to vector<64x128xbf16>
    %cst_162 = arith.constant dense<0.000000e+00> : vector<32x128xf32>
    %386 = tpu.matmul %384, %385, %cst_162 {dimension_numbers = #tpu.dot_dimension_numbers<[1], [0], [0], [1], [0, 0, 1, 1], [], []>} : vector<32x64xbf16>, vector<64x128xbf16>, vector<32x128xf32> -> vector<32x128xf32>
    %c1_163 = arith.constant 1 : index
    %c0_164 = arith.constant 0 : index
    %c0_165 = arith.constant 0 : index
    %387 = vector.load %arg14[%c1_163, %c0_164, %c0_165] : memref<2x32x1xf32, #tpu.memory_space<vmem>>, vector<1x32x1xf32>
    %388 = vector.shape_cast %387 : vector<1x32x1xf32> to vector<32x1xf32>
    %389 = vector.broadcast %388 : vector<32x1xf32> to vector<32x128xf32>
    %390 = arith.addf %386, %389 : vector<32x128xf32>
    %391 = arith.addf %390, %361 : vector<32x128xf32>
    %c1_166 = arith.constant 1 : index
    %c0_167 = arith.constant 0 : index
    %c0_168 = arith.constant 0 : index
    %392 = vector.load %arg15[%c1_166, %c0_167, %c0_168] : memref<2x32x1xf32, #tpu.memory_space<vmem>>, vector<1x32x1xf32>
    %393 = vector.shape_cast %392 : vector<1x32x1xf32> to vector<32x1xf32>
    %c1_169 = arith.constant 1 : index
    %c0_170 = arith.constant 0 : index
    %c0_171 = arith.constant 0 : index
    %394 = vector.load %arg16[%c1_169, %c0_170, %c0_171] : memref<2x32x1xf32, #tpu.memory_space<vmem>>, vector<1x32x1xf32>
    %395 = vector.shape_cast %394 : vector<1x32x1xf32> to vector<32x1xf32>
    %cst_172 = arith.constant dense<0.000000e+00> : vector<128xf32>
    %396 = vector.multi_reduction <add>, %391, %cst_172 [0] : vector<32x128xf32> to vector<128xf32>
    %397 = vector.shape_cast %396 : vector<128xf32> to vector<1x128xf32>
    %cst_173 = arith.constant 3.200000e+01 : f32
    %398 = vector.broadcast %cst_173 : f32 to vector<1x128xf32>
    %399 = arith.divf %397, %398 : vector<1x128xf32>
    %400 = vector.broadcast %399 : vector<1x128xf32> to vector<32x128xf32>
    %401 = arith.subf %391, %400 : vector<32x128xf32>
    %402 = arith.mulf %401, %401 : vector<32x128xf32>
    %cst_174 = arith.constant dense<0.000000e+00> : vector<128xf32>
    %403 = vector.multi_reduction <add>, %402, %cst_174 [0] : vector<32x128xf32> to vector<128xf32>
    %404 = vector.shape_cast %403 : vector<128xf32> to vector<1x128xf32>
    %cst_175 = arith.constant 3.200000e+01 : f32
    %405 = vector.broadcast %cst_175 : f32 to vector<1x128xf32>
    %406 = arith.divf %404, %405 : vector<1x128xf32>
    %407 = vector.broadcast %399 : vector<1x128xf32> to vector<32x128xf32>
    %408 = arith.subf %391, %407 : vector<32x128xf32>
    %cst_176 = arith.constant 9.99999996E-13 : f32
    %409 = vector.broadcast %cst_176 : f32 to vector<1x128xf32>
    %410 = arith.addf %406, %409 : vector<1x128xf32>
    %411 = math.rsqrt %410 : vector<1x128xf32>
    %412 = vector.broadcast %411 : vector<1x128xf32> to vector<32x128xf32>
    %413 = arith.mulf %408, %412 : vector<32x128xf32>
    %414 = vector.broadcast %393 : vector<32x1xf32> to vector<32x128xf32>
    %415 = arith.mulf %413, %414 : vector<32x128xf32>
    %416 = vector.broadcast %395 : vector<32x1xf32> to vector<32x128xf32>
    %417 = arith.addf %415, %416 : vector<32x128xf32>
    %418 = vector.extract_strided_slice %417 {offsets = [0, 0], sizes = [32, 1], strides = [1, 1]} : vector<32x128xf32> to vector<32x1xf32>
    %c0_177 = arith.constant 0 : index
    %c0_178 = arith.constant 0 : index
    %419 = vector.load %arg17[%c0_177, %c0_178] : memref<32x32xbf16, #tpu.memory_space<vmem>>, vector<32x32xbf16>
    %420 = arith.truncf %418 : vector<32x1xf32> to vector<32x1xbf16>
    %cst_179 = arith.constant dense<0.000000e+00> : vector<32x1xf32>
    %421 = tpu.matmul %419, %420, %cst_179 {dimension_numbers = #tpu.dot_dimension_numbers<[1], [0], [0], [1], [0, 0, 1, 1], [], []>} : vector<32x32xbf16>, vector<32x1xbf16>, vector<32x1xf32> -> vector<32x1xf32>
    %c0_180 = arith.constant 0 : index
    %c0_181 = arith.constant 0 : index
    %422 = vector.load %arg18[%c0_180, %c0_181] : memref<32x1xf32, #tpu.memory_space<vmem>>, vector<32x1xf32>
    %423 = arith.addf %421, %422 : vector<32x1xf32>
    %424 = math.tanh %423 : vector<32x1xf32>
    %c0_182 = arith.constant 0 : index
    %c0_183 = arith.constant 0 : index
    %425 = vector.load %arg19[%c0_182, %c0_183] : memref<4x32xbf16, #tpu.memory_space<vmem>>, vector<4x32xbf16>
    %426 = arith.truncf %424 : vector<32x1xf32> to vector<32x1xbf16>
    %cst_184 = arith.constant dense<0.000000e+00> : vector<4x1xf32>
    %427 = tpu.matmul %425, %426, %cst_184 {dimension_numbers = #tpu.dot_dimension_numbers<[1], [0], [0], [1], [0, 0, 1, 1], [], []>} : vector<4x32xbf16>, vector<32x1xbf16>, vector<4x1xf32> -> vector<4x1xf32>
    %c0_185 = arith.constant 0 : index
    %c0_186 = arith.constant 0 : index
    %428 = vector.load %arg20[%c0_185, %c0_186] : memref<4x1xf32, #tpu.memory_space<vmem>>, vector<4x1xf32>
    %429 = arith.addf %427, %428 : vector<4x1xf32>
    %c0_187 = arith.constant 0 : index
    %c0_188 = arith.constant 0 : index
    %c0_189 = arith.constant 0 : index
    %430 = vector.load %arg21[%c0_187, %c0_188, %c0_189] : memref<1x4x1xf32, #tpu.memory_space<vmem>>, vector<1x4x1xf32>
    %431 = vector.shape_cast %430 : vector<1x4x1xf32> to vector<4x1xf32>
    %432 = vector.shape_cast %429 : vector<4x1xf32> to vector<1x4x1xf32>
    tpu.vector_store %arg21[%c0_187, %c0_188, %c0_189], %432 {strides = array<i32>} : memref<1x4x1xf32, #tpu.memory_space<vmem>>, vector<1x4x1xf32>,
    return
  }
  func.func @transform_0(%arg0: i32) -> (i32, i32, i32) {
    %c0_i32 = arith.constant 0 : i32
    %c0_i32_0 = arith.constant 0 : i32
    %c0_i32_1 = arith.constant 0 : i32
    return %arg0, %c0_i32, %c0_i32_0 : i32, i32, i32
  }
  func.func @transform_1(%arg0: i32) -> (i32, i32, i32) {
    %c0_i32 = arith.constant 0 : i32
    %c0_i32_0 = arith.constant 0 : i32
    %c0_i32_1 = arith.constant 0 : i32
    return %arg0, %c0_i32, %c0_i32_0 : i32, i32, i32
  }
  func.func @transform_2(%arg0: i32) -> (i32, i32) {
    %c0_i32 = arith.constant 0 : i32
    %c0_i32_0 = arith.constant 0 : i32
    %c0_i32_1 = arith.constant 0 : i32
    return %c0_i32, %c0_i32_0 : i32, i32
  }
  func.func @transform_3(%arg0: i32) -> (i32, i32) {
    %c0_i32 = arith.constant 0 : i32
    %c0_i32_0 = arith.constant 0 : i32
    %c0_i32_1 = arith.constant 0 : i32
    return %c0_i32, %c0_i32_0 : i32, i32
  }
  func.func @transform_4(%arg0: i32) -> (i32, i32, i32) {
    %c0_i32 = arith.constant 0 : i32
    %c0_i32_0 = arith.constant 0 : i32
    %c0_i32_1 = arith.constant 0 : i32
    %c0_i32_2 = arith.constant 0 : i32
    return %c0_i32, %c0_i32_0, %c0_i32_1 : i32, i32, i32
  }
  func.func @transform_5(%arg0: i32) -> (i32, i32, i32) {
    %c0_i32 = arith.constant 0 : i32
    %c0_i32_0 = arith.constant 0 : i32
    %c0_i32_1 = arith.constant 0 : i32
    %c0_i32_2 = arith.constant 0 : i32
    return %c0_i32, %c0_i32_0, %c0_i32_1 : i32, i32, i32
  }
  func.func @transform_6(%arg0: i32) -> (i32, i32, i32) {
    %c0_i32 = arith.constant 0 : i32
    %c0_i32_0 = arith.constant 0 : i32
    %c0_i32_1 = arith.constant 0 : i32
    %c0_i32_2 = arith.constant 0 : i32
    return %c0_i32, %c0_i32_0, %c0_i32_1 : i32, i32, i32
  }
  func.func @transform_7(%arg0: i32) -> (i32, i32, i32) {
    %c0_i32 = arith.constant 0 : i32
    %c0_i32_0 = arith.constant 0 : i32
    %c0_i32_1 = arith.constant 0 : i32
    %c0_i32_2 = arith.constant 0 : i32
    return %c0_i32, %c0_i32_0, %c0_i32_1 : i32, i32, i32
  }
  func.func @transform_8(%arg0: i32) -> (i32, i32, i32) {
    %c0_i32 = arith.constant 0 : i32
    %c0_i32_0 = arith.constant 0 : i32
    %c0_i32_1 = arith.constant 0 : i32
    %c0_i32_2 = arith.constant 0 : i32
    return %c0_i32, %c0_i32_0, %c0_i32_1 : i32, i32, i32
  }
  func.func @transform_9(%arg0: i32) -> (i32, i32, i32) {
    %c0_i32 = arith.constant 0 : i32
    %c0_i32_0 = arith.constant 0 : i32
    %c0_i32_1 = arith.constant 0 : i32
    %c0_i32_2 = arith.constant 0 : i32
    return %c0_i32, %c0_i32_0, %c0_i32_1 : i32, i32, i32
  }
  func.func @transform_10(%arg0: i32) -> (i32, i32, i32) {
    %c0_i32 = arith.constant 0 : i32
    %c0_i32_0 = arith.constant 0 : i32
    %c0_i32_1 = arith.constant 0 : i32
    %c0_i32_2 = arith.constant 0 : i32
    return %c0_i32, %c0_i32_0, %c0_i32_1 : i32, i32, i32
  }
  func.func @transform_11(%arg0: i32) -> (i32, i32, i32) {
    %c0_i32 = arith.constant 0 : i32
    %c0_i32_0 = arith.constant 0 : i32
    %c0_i32_1 = arith.constant 0 : i32
    %c0_i32_2 = arith.constant 0 : i32
    return %c0_i32, %c0_i32_0, %c0_i32_1 : i32, i32, i32
  }
  func.func @transform_12(%arg0: i32) -> (i32, i32, i32) {
    %c0_i32 = arith.constant 0 : i32
    %c0_i32_0 = arith.constant 0 : i32
    %c0_i32_1 = arith.constant 0 : i32
    %c0_i32_2 = arith.constant 0 : i32
    return %c0_i32, %c0_i32_0, %c0_i32_1 : i32, i32, i32
  }
  func.func @transform_13(%arg0: i32) -> (i32, i32, i32) {
    %c0_i32 = arith.constant 0 : i32
    %c0_i32_0 = arith.constant 0 : i32
    %c0_i32_1 = arith.constant 0 : i32
    %c0_i32_2 = arith.constant 0 : i32
    return %c0_i32, %c0_i32_0, %c0_i32_1 : i32, i32, i32
  }
  func.func @transform_14(%arg0: i32) -> (i32, i32, i32) {
    %c0_i32 = arith.constant 0 : i32
    %c0_i32_0 = arith.constant 0 : i32
    %c0_i32_1 = arith.constant 0 : i32
    %c0_i32_2 = arith.constant 0 : i32
    return %c0_i32, %c0_i32_0, %c0_i32_1 : i32, i32, i32
  }
  func.func @transform_15(%arg0: i32) -> (i32, i32, i32) {
    %c0_i32 = arith.constant 0 : i32
    %c0_i32_0 = arith.constant 0 : i32
    %c0_i32_1 = arith.constant 0 : i32
    %c0_i32_2 = arith.constant 0 : i32
    return %c0_i32, %c0_i32_0, %c0_i32_1 : i32, i32, i32
  }
  func.func @transform_16(%arg0: i32) -> (i32, i32) {
    %c0_i32 = arith.constant 0 : i32
    %c0_i32_0 = arith.constant 0 : i32
    %c0_i32_1 = arith.constant 0 : i32
    return %c0_i32, %c0_i32_0 : i32, i32
  }
  func.func @transform_17(%arg0: i32) -> (i32, i32) {
    %c0_i32 = arith.constant 0 : i32
    %c0_i32_0 = arith.constant 0 : i32
    %c0_i32_1 = arith.constant 0 : i32
    return %c0_i32, %c0_i32_0 : i32, i32
  }
  func.func @transform_18(%arg0: i32) -> (i32, i32) {
    %c0_i32 = arith.constant 0 : i32
    %c0_i32_0 = arith.constant 0 : i32
    %c0_i32_1 = arith.constant 0 : i32
    return %c0_i32, %c0_i32_0 : i32, i32
  }
  func.func @transform_19(%arg0: i32) -> (i32, i32) {
    %c0_i32 = arith.constant 0 : i32
    %c0_i32_0 = arith.constant 0 : i32
    %c0_i32_1 = arith.constant 0 : i32
    return %c0_i32, %c0_i32_0 : i32, i32
  }
  func.func @transform_20(%arg0: i32) -> (i32, i32, i32) {
    %c0_i32 = arith.constant 0 : i32
    %c0_i32_0 = arith.constant 0 : i32
    %c0_i32_1 = arith.constant 0 : i32
    return %arg0, %c0_i32, %c0_i32_0 : i32, i32, i32
  }
}

</mosaic_0001>

<bundles_post_ra>
// kernel: tpu_custom_call.1
= control target key start
LH: loop header
LB: loop body
LE: loop exit
PB: predicated region body
PF: predicated region fallthrough
CT: control target
= control target key end

     0   :  { %s9313_s0 = inlined_call_operand.vmem [shape: f32[2,32,128], index: 0, kind: input, shape index: {}]   ;;  %s9314_s1 = inlined_call_operand.vmem [shape: f32[2,1,128], index: 1, kind: input, shape index: {}]   ;;  %s9315_s2 = inlined_call_operand.vmem [shape: f32[32,1], index: 2, kind: input, shape index: {}]   ;;  %s9316_s3 = inlined_call_operand.vmem [shape: f32[32,1], index: 3, kind: input, shape index: {}]   ;;  %s9317_s4 = inlined_call_operand.vmem [shape: bf16[2,96,32], index: 4, kind: input, shape index: {}]   ;;  %s9318_s5 = inlined_call_operand.vmem [shape: f32[2,96,1], index: 5, kind: input, shape index: {}]   ;;  %s9319_s6 = inlined_call_operand.vmem [shape: bf16[2,32,32], index: 6, kind: input, shape index: {}]   ;;  %s9320_s7 = inlined_call_operand.vmem [shape: f32[2,32,1], index: 7, kind: input, shape index: {}]   ;;  %s9321_s8 = inlined_call_operand.vmem [shape: f32[2,32,1], index: 8, kind: input, shape index: {}]   ;;  %s9322_s9 = inlined_call_operand.vmem [shape: f32[2,32,1], index: 9, kind: input, shape index: {}]   ;;  %s9323_s10 = inlined_call_operand.vmem [shape: bf16[2,64,32], index: 10, kind: input, shape index: {}]   ;;  %s9324_s11 = inlined_call_operand.vmem [shape: f32[2,64,1], index: 11, kind: input, shape index: {}]   ;;  %s9325_s12 = inlined_call_operand.vmem [shape: bf16[2,32,64], index: 12, kind: input, shape index: {}]   ;;  %s9326_s13 = inlined_call_operand.vmem [shape: f32[2,32,1], index: 13, kind: input, shape index: {}]   ;;  %s9327_s14 = inlined_call_operand.vmem [shape: f32[2,32,1], index: 14, kind: input, shape index: {}]   ;;  %s9328_s15 = inlined_call_operand.vmem [shape: f32[2,32,1], index: 15, kind: input, shape index: {}]   ;;  %s9329_s16 = inlined_call_operand.vmem [shape: bf16[32,32], index: 16, kind: input, shape index: {}]   ;;  %s9330_s17 = inlined_call_operand.vmem [shape: f32[32,1], index: 17, kind: input, shape index: {}]   ;;  %s9331_s18 = inlined_call_operand.vmem [shape: bf16[4,32], index: 18, kind: input, shape index: {}]   ;;  %s9332_s19 = inlined_call_operand.vmem [shape: f32[4,1], index: 19, kind: input, shape index: {}]   ;;  %s9333_s20 = inlined_call_operand.vmem [shape: f32[2,4,1], index: 20, kind: output, shape index: {}]  }
   0x1   :  { %9346 = sst [smem:[#allocation5_spill]] %s9313_s0 }
   0x2   :  { %9347 = sst [smem:[#allocation6_spill]] %s9314_s1  ;;  %s7165_s1 = smov 0  }
   0x3   :  { %9348 = sst [smem:[#allocation7_spill]] %s9315_s2 }
   0x4   :  { %9349 = sst [smem:[#allocation8_spill]] %s9316_s3 }
   0x5   :  { %9350 = sst [smem:[#allocation9_spill]] %s9317_s4 }
   0x6 LB: > { %9351 = sst [smem:[#allocation3_spill]] %s7052_s1  ;;  %s5603_s22 = sadd.s32 4294967295, %s7052_s1   ;;  %s7052_s1 = sphi %s7165_s1, %s30_s1  }
   0x7   : > { %p5607_p0 = scmp.ge.s32.totalorder %s7052_s1, 1  ;;  %p570_p1 = scmp.lt.s32.totalorder %s7052_s1, 3 }
   0x9   : > { %p571_p2 = pnand %p5607_p0, %p570_p1 }
   0xb   : > { %574 = sbr.rel (%p571_p2) target bundleno = 6162 (0x1812), region = 100 }
  0x12   : > { %s9352_s2 = sld [smem:[#allocation8_spill]]  ;;  %s9353_s26 = sld [smem:[#allocation7_spill]]  ;;  %v7054_v2 = vmov 0   ;;  %v754_v9 = vld [vmem:[%s9318_s5 + $0x8] sm:$0xff]  ;;  %v753_v10 = vld [vmem:[%s9318_s5] sm:$0xff]  ;;  %v756_v11 = vld [vmem:[%s9318_s5 + $0x18] sm:$0xff] }
  0x13   : > { %p630_p3 = scmp.lt.s32.totalorder %s5603_s22, 1  ;;  %6450 = vset.pattern.permute.xlu1 %v7054_v2  ;;  %6449 = vset.pattern.permute.xlu0 %v7054_v2  ;;  %s9354_s25 = sld [smem:[#allocation5_spill]]  ;;  %v755_v12 = vld [vmem:[%s9318_s5 + $0x10] sm:$0xff]  ;;  %vm855_vm0 = vcmask 261120   ;;  %v757_v16 = vld [vmem:[%s9318_s5 + $0x20] sm:$0xff]  ;;  %v758_v19 = vld [vmem:[%s9318_s5 + $0x28] sm:$0xff] }
  0x14   : > { %s9355_s30 = sld [smem:[#allocation9_spill]]  ;;  %vm1022_vm1 = vcmask 1043456   ;;  %vm997_vm2 = vcmask 64512   ;;  %s7055_s1 = smov 120   ;;  %vm7059_vm3 = vmmov 0   ;;  %vm2925_vm4 = vcmask 523264  }
  0x15   : > { %s9364_s22 = smov (!%p630_p3, %s5603_s22), 1  ;;  %s9357_s23 = sld [smem:[#allocation6_spill]]  ;;  %vm5539_vm5 = vcmask 3072  }
  0x16   : > { %s5811_s24 = sshll.u32 %s9364_s22, 5  ;;  %s9342_s21 = smov 112  }
  0x17   : > { %s9360_s4 = smov 104   ;;  %s9361_s0 = smov 112  }
  0x18   : > { %v651_v0 = vld [vmem:[%s9352_s2] sm:$0xff]  ;;  %v652_v3 = vld [vmem:[%s9352_s2 + $0x8] sm:$0xff]  ;;  %v650_v5 = vld [vmem:[%s9353_s26 + $0x18] sm:$0xff] }
  0x19   : > { %v647_v1 = vld [vmem:[%s9353_s26] sm:$0xff]  ;;  %716 = vperm.xlu1 %6450, %v651_v0   ;;  %v648_v4 = vld [vmem:[%s9353_s26 + $0x8] sm:$0xff]  ;;  %v649_v6 = vld [vmem:[%s9353_s26 + $0x10] sm:$0xff]  ;;  %s634_s3 = scalar_lea.vmem %s9354_s25, %s5811_s24  ;;  %s5610_s24 = sshll.u32 %s9364_s22, 2 }
  0x1a   : > { %692 = vperm.xlu0 %6449, %v647_v1   ;;  %v654_v7 = vld [vmem:[%s9352_s2 + $0x18] sm:$0xff]  ;;  %v653_v8 = vld [vmem:[%s9352_s2 + $0x10] sm:$0xff]  ;;  %v643_v13 = vld [vmem:[%s634_s3] sm:$0xff]  ;;  %s641_s28 = scalar_lea.vmem %s9333_s20, %s5610_s24 }
  0x1b   : > { %v6451_v14 = vld [vmem:[%s9355_s30] sm:$0xff]   ;;  %v644_v15 = vld [vmem:[%s634_s3 + $0x8] sm:$0xff]  ;;  %v645_v17 = vld [vmem:[%s634_s3 + $0x10] sm:$0xff]  ;;  %s7333_s25 = scalar_lea.vmem %s9357_s23, %s9364_s22  ;;  %s9344_s23 = smov 104  }
  0x1c   : > { %6015 = vmatprep.mubr.msk.bf16.mxu0 %vm855_vm0, %v6451_v14  ;;  %v655_v18 = vadd.f32 %v644_v15, %v643_v13  ;;  %v646_v21 = vld [vmem:[%s634_s3 + $0x18] sm:$0xff] }
  0x1d   : > { %721 = vperm.xlu1 %6450, %v652_v3  }
  0x1e   : > { %697 = vperm.xlu0 %6449, %v648_v4   ;;  %v656_v20 = vadd.f32 %v655_v18, %v645_v17 }
  0x20   : > { %v657_v22 = vadd.f32 %v656_v20, %v646_v21 }
  0x21   : > { %707 = vperm.xlu1 %6450, %v650_v5  }
  0x22   : > { %702 = vperm.xlu0 %6449, %v649_v6   ;;  %v658_v23 = vrot.slane %v657_v22, 4 }
  0x24   : > { %v659_v24 = vadd.f32 %v658_v23, %v657_v22 }
  0x25   : > { %731 = vperm.xlu1 %6450, %v654_v7  }
  0x26   : > { %726 = vperm.xlu0 %6449, %v653_v8   ;;  %v660_v25 = vrot.slane %v659_v24, 2  ;;  %v6452_v8 = vld [vmem:[%s9355_s30 + $0x8] sm:$0xff]  }
  0x28   : > { %v661_v26 = vadd.f32 %v660_v25, %v659_v24 }
  0x29   : > { %772 = vperm.xlu1 %6450, %v754_v9   ;;  %v6453_v9 = vld [vmem:[%s9355_s30 + $0x10] sm:$0xff]  }
  0x2a   : > { %767 = vperm.xlu0 %6449, %v753_v10   ;;  %v662_v27 = vrot.slane %v661_v26, 1  ;;  %v6454_v10 = vld [vmem:[%s9355_s30 + $0x18] sm:$0xff]  }
  0x2c   : > { %v663_v28 = vadd.f32 %v662_v27, %v661_v26 }
  0x2d   : > { %782 = vperm.xlu1 %6450, %v756_v11  }
  0x2e   : > { %777 = vperm.xlu0 %6449, %v755_v12   ;;  %v665_v29 = vmul.f32 0.03125, %v663_v28 }
  0x30   : > { %v666_v30 = vsub.f32 %v643_v13, %v665_v29  ;;  %v667_v31 = vsub.f32 %v644_v15, %v665_v29  ;;  %v668_v32 = vsub.f32 %v645_v17, %v665_v29  ;;  %v669_v35 = vsub.f32 %v646_v21, %v665_v29 }
  0x31   : > { %787 = vperm.xlu1 %6450, %v757_v16  }
  0x32   : > { %v670_v33 = vmul.f32 %v666_v30, %v666_v30  ;;  %v671_v34 = vmul.f32 %v667_v31, %v667_v31  ;;  %v672_v36 = vmul.f32 %v668_v32, %v668_v32  ;;  %v673_v38 = vmul.f32 %v669_v35, %v669_v35 }
  0x34   : > { %v674_v37 = vadd.f32 %v671_v34, %v670_v33 }
  0x35   : > { %792 = vperm.xlu1 %6450, %v758_v19  }
  0x36   : > { %v675_v39 = vadd.f32 %v674_v37, %v672_v36  ;;  %v6456_v36 = vld [vmem:[%s9355_s30 + $0x28] sm:$0xff]  }
  0x38   : > { %v676_v40 = vadd.f32 %v675_v39, %v673_v38 }
  0x3a   : > { %v677_v41 = vrot.slane %v676_v40, 4 }
  0x3c   : > { %v678_v42 = vadd.f32 %v677_v41, %v676_v40 }
  0x3e   : > { %v679_v43 = vrot.slane %v678_v42, 2 }
  0x40   : > { %v680_v44 = vadd.f32 %v679_v43, %v678_v42 }
  0x42   : > { %v681_v45 = vrot.slane %v680_v44, 1 }
  0x44   : > { %v682_v46 = vadd.f32 %v681_v45, %v680_v44 }
  0x46   : > { %v683_v47 = vmul.f32 0.03125, %v682_v46 }
  0x48   : > { %v684_v48 = vadd.f32 1e-12, %v683_v47 }
  0x4a   : > { %6481 = vrsqrt.f32 %v684_v48 }
  0x54   : > { %v6482_v49 = vpop.eup %6481 }
  0x55   : > { %v686_v50 = vmul.f32 %v6482_v49, %v666_v30  ;;  %v687_v53 = vmul.f32 %v6482_v49, %v667_v31  ;;  %v689_v58 = vmul.f32 %v6482_v49, %v669_v35  ;;  %v688_v59 = vmul.f32 %v6482_v49, %v668_v32  ;;  %v6455_v35 = vld [vmem:[%s9355_s30 + $0x20] sm:$0xff]  }
  0x98   : > { %v717_v51 = vpop.permute.xlu1 %716 }
  0x99   : > { %v693_v52 = vpop.permute.xlu0 %692 }
  0x9a   : > { %v710_v54 = vmul.f32 %v693_v52, %v686_v50 }
  0x9c   : > { %v722_v55 = vpop.permute.xlu1 %721  ;;  %v7225_v60 = vadd.f32 %v717_v51, %v710_v54 }
  0x9d   : > { %v698_v56 = vpop.permute.xlu0 %697 }
  0x9e   : > { %v711_v57 = vmul.f32 %v698_v56, %v687_v53 }
  0xa0   : > { %v7227_v61 = vadd.f32 %v722_v55, %v711_v57  ;;  %v708_v62 = vpop.permute.xlu1 %707 }
  0xa1   : > { %v703_v63 = vpop.permute.xlu0 %702  ;;  %v713_v1 = vmul.f32 %v708_v62, %v689_v58 }
  0xa2   : > { %v751_v0 = vpack.c.bf16 %v7227_v61, %v7225_v60  ;;  %v712_v2 = vmul.f32 %v703_v63, %v688_v59 }
  0xa4   : > { %6011 = vmatprep.subr.bf16.mxu0 %v751_v0  ;;  %v732_v3 = vpop.permute.xlu1 %731 }
  0xa5   : > { %v727_v4 = vpop.permute.xlu0 %726  ;;  %6012 = vmatpush3.bf16.msra.mxu0 %v751_v0  ;;  %v7231_v5 = vadd.f32 %v732_v3, %v713_v1 }
  0xa6   : > { %v7233_v6 = vadd.f32 %v727_v4, %v712_v2 }
  0xa7   : > { %9356 = vst [vmem:[#allocation4_spill] sm:$0xff] %v7231_v5 }
  0xa8   : > { %v752_v7 = vpack.c.bf16 %v7231_v5, %v7233_v6  ;;  %v773_v11 = vpop.permute.xlu1 %772 }
  0xa9   : > { %v768_v14 = vpop.permute.xlu0 %767 }
  0xaa   : > { %6013 = vmatprep.subr.bf16.mxu0 %v752_v7 }
  0xab   : > { %6014 = vmatpush3.bf16.msra.mxu0 %v752_v7 }
  0xac   : > { %v783_v12 = vpop.permute.xlu1 %782 }
  0xad   : > { %v778_v22 = vpop.permute.xlu0 %777 }
  0xae   : > { %6016 = vmatmul.mubr.msk.bf16.vlgmr.msra.gmra.mrb[0].mxu0 %vm855_vm0, %v6452_v8 }
  0xaf   : > { %6019 = vmatprep.mubr.msk.bf16.mxu0 %vm855_vm0, %v6453_v9 }
  0xb0   : > { %v788_v19 = vpop.permute.xlu1 %787 }
  0xb4   : > { %v793_v27 = vpop.permute.xlu1 %792 }
  0xb6   : > { %6020 = vmatmul.mubr.msk.bf16.gmra.mrb[4].mxu0 %vm855_vm0, %v6454_v10 }
  0xb7   : > { %6023 = vmatprep.mubr.msk.bf16.mxu0 %vm855_vm0, %v6455_v35 }
  0xbe   : > { %6024 = vmatmul.mubr.msk.bf16.gmra.mrb[8].mxu0 %vm855_vm0, %v6456_v36 }
 0x181   : > { %v6017_v13 = vpop.f32.mrb[0].mxu0 }
 0x182   : > { %v908_v15 = vpop.f32.mrb[1].mxu0  ;;  %v917_v24 = vadd.f32 %v6017_v13, %v778_v22 }
 0x183   : > { %v909_v16 = vadd.f32 %v908_v15, %v768_v14  ;;  %v6018_v17 = vpop.f32.mrb[2].mxu0  ;;  %v7336_v14 = vld [vmem:[%s7333_s25] ss:$0 sm:$0xff] }
 0x184   : > { %v911_v18 = vpop.f32.mrb[3].mxu0  ;;  %v920_v31 = vadd.f32 %v6018_v17, %v783_v12 }
 0x185   : > { %955 = vxpose.xlu0.b32.start [1/4] (short) %v909_v16, 128  ;;  %v912_v20 = vadd.f32 %v911_v18, %v773_v11 }
 0x189   : > { %v7249_v21 = vpop.f32.mrb[4].mxu0  ;;  %956 = vxpose.xlu0.b32.cont [2/4] (short) %v912_v20, 128 }
 0x18a   : > { %v924_v23 = vpop.f32.mrb[5].mxu0 }
 0x18b   : > { %v925_v25 = vadd.f32 %v924_v23, %v788_v19  ;;  %v7251_v26 = vpop.f32.mrb[6].mxu0 }
 0x18c   : > { %v927_v28 = vpop.f32.mrb[7].mxu0 }
 0x18d   : > { %v995_v29 = vpack.c.bf16 %v925_v25, %v925_v25  ;;  %v928_v30 = vadd.f32 %v927_v28, %v793_v27  ;;  %957 = vxpose.xlu0.b32.cont [3/4] (short) %v917_v24, 128 }
 0x18f   : > { %v1354_v32 = vpack.c.bf16 %v928_v30, %v928_v30  ;;  %6427 = vmatprep.subr.msk.bf16.mxu1 %vm1022_vm1, %v995_v29  ;;  %v1024_v33 = vsel %vm1022_vm1, %v995_v29, 0 }
 0x190   : > { %6028 = vmatpush3.bf16.msra.mxu1 %v1024_v33 }
 0x191   : > { %v1405_v34 = vsel %vm1022_vm1, %v1354_v32, 0  ;;  %6428 = vmatprep.subr.msk.bf16.mxu0 %vm1022_vm1, %v1354_v32  ;;  %958 = vxpose.xlu0.b32.end [4/4] (short) %v920_v31, 128  ;;  %v7317_v3 = vpop.f32.mrb[8].mxu0 }
 0x192   : > { %6066 = vmatpush3.bf16.msra.mxu0 %v1405_v34  ;;  %v7319_v4 = vpop.f32.mrb[9].mxu0 }
 0x193   : > { %v7321_v7 = vpop.f32.mrb[10].mxu0 }
 0x194   : > { %v7323_v9 = vpop.f32.mrb[11].mxu0 }
 0x205   : > { %v971_v37 = vpop.trf.xlu0 }
 0x209   : > { %v972_v38 = vpop.trf.xlu0 }
 0x20a   : > { %v7265_v39 = vpack.c.bf16 %v972_v38, %v971_v37 }
 0x20c   : > { %1364 = vrot.lane.b32.xlu1 %v7265_v39, %s7055_s1  ;;  %6029 = vmatprep.mubr.msk.bf16.mxu1 %vm997_vm2, %v7265_v39 }
 0x20d   : > { %v973_v40 = vpop.trf.xlu0 }
 0x211   : > { %v974_v41 = vpop.trf.xlu0 }
 0x212   : > { %v7271_v42 = vpack.c.bf16 %v974_v41, %v973_v40 }
 0x214   : > { %1366 = vrot.lane.b32.xlu1 %v7271_v42, %s7055_s1  ;;  %6030 = vmatmul.mubr.msk.bf16.vlgmr.msra.gmra.mrb[0].mxu1 %vm997_vm2, %v7271_v42 }
 0x215   : > { %v975_v43 = vpop.trf.xlu0 }
 0x219   : > { %v976_v44 = vpop.trf.xlu0 }
 0x21a   : > { %v7277_v45 = vpack.c.bf16 %v976_v44, %v975_v43 }
 0x21c   : > { %1368 = vrot.lane.b32.xlu1 %v7277_v45, %s7055_s1  ;;  %6033 = vmatprep.mubr.msk.bf16.mxu1 %vm997_vm2, %v7277_v45 }
 0x21d   : > { %v977_v46 = vpop.trf.xlu0 }
 0x221   : > { %v978_v47 = vpop.trf.xlu0 }
 0x222   : > { %v7283_v48 = vpack.c.bf16 %v978_v47, %v977_v46 }
 0x224   : > { %1370 = vrot.lane.b32.xlu1 %v7283_v48, %s7055_s1  ;;  %6034 = vmatmul.mubr.msk.bf16.gmra.mrb[4].mxu1 %vm997_vm2, %v7283_v48 }
 0x225   : > { %v979_v49 = vpop.trf.xlu0 }
 0x229   : > { %v980_v50 = vpop.trf.xlu0 }
 0x22a   : > { %v7289_v51 = vpack.c.bf16 %v980_v50, %v979_v49 }
 0x22c   : > { %1372 = vrot.lane.b32.xlu1 %v7289_v51, %s7055_s1  ;;  %6037 = vmatprep.mubr.msk.bf16.mxu1 %vm997_vm2, %v7289_v51 }
 0x22d   : > { %v981_v52 = vpop.trf.xlu0 }
 0x231   : > { %v982_v53 = vpop.trf.xlu0 }
 0x232   : > { %v7295_v54 = vpack.c.bf16 %v982_v53, %v981_v52 }
 0x234   : > { %1374 = vrot.lane.b32.xlu1 %v7295_v54, %s7055_s1  ;;  %6038 = vmatmul.mubr.msk.bf16.gmra.mrb[8].mxu1 %vm997_vm2, %v7295_v54 }
 0x235   : > { %v983_v55 = vpop.trf.xlu0 }
 0x239   : > { %v984_v56 = vpop.trf.xlu0 }
 0x23a   : > { %v7301_v57 = vpack.c.bf16 %v984_v56, %v983_v55 }
 0x23c   : > { %1376 = vrot.lane.b32.xlu1 %v7301_v57, %s7055_s1  ;;  %6041 = vmatprep.mubr.msk.bf16.mxu1 %vm997_vm2, %v7301_v57 }
 0x23d   : > { %v985_v58 = vpop.trf.xlu0 }
 0x241   : > { %v986_v59 = vpop.trf.xlu0 }
 0x242   : > { %v7307_v62 = vpack.c.bf16 %v986_v59, %v985_v58 }
 0x244   : > { %1378 = vrot.lane.b32.xlu1 %v7307_v62, %s7055_s1  ;;  %6042 = vmatmul.mubr.msk.bf16.gmra.mrb[12].mxu1 %vm997_vm2, %v7307_v62 }
 0x27e   : > { %v1365_v63 = vpop.permute.xlu1 %1364 }
 0x27f   : > { %6067 = vmatprep.mubr.msk.bf16.mxu0 %vm997_vm2, %v1365_v63 }
 0x286   : > { %v1367_v0 = vpop.permute.xlu1 %1366 }
 0x287   : > { %6068 = vmatmul.mubr.msk.bf16.vlgmr.msra.gmra.mrb[12].mxu0 %vm997_vm2, %v1367_v0 }
 0x28e   : > { %v1369_v1 = vpop.permute.xlu1 %1368 }
 0x28f   : > { %6071 = vmatprep.mubr.msk.bf16.mxu0 %vm997_vm2, %v1369_v1 }
 0x296   : > { %v1371_v2 = vpop.permute.xlu1 %1370 }
 0x297   : > { %6072 = vmatmul.mubr.msk.bf16.gmra.mrb[16].mxu0 %vm997_vm2, %v1371_v2 }
 0x29e   : > { %v1373_v8 = vpop.permute.xlu1 %1372 }
 0x29f   : > { %6075 = vmatprep.mubr.msk.bf16.mxu0 %vm997_vm2, %v1373_v8 }
 0x2a6   : > { %v1375_v10 = vpop.permute.xlu1 %1374 }
 0x2a7   : > { %6076 = vmatmul.mubr.msk.bf16.gmra.mrb[20].mxu0 %vm997_vm2, %v1375_v10 }
 0x2ae   : > { %v1377_v11 = vpop.permute.xlu1 %1376 }
 0x2af   : > { %6079 = vmatprep.mubr.msk.bf16.mxu0 %vm997_vm2, %v1377_v11 }
 0x2b6   : > { %v1379_v12 = vpop.permute.xlu1 %1378 }
 0x2b7   : > { %6080 = vmatmul.mubr.msk.bf16.gmra.mrb[24].mxu0 %vm997_vm2, %v1379_v12 }
 0x2e7   : > { %v6031_v13 = vpop.f32.mrb[0].mxu1 }
 0x2e8   : > { %v1060_v15 = vpop.f32.mrb[1].mxu1  ;;  %v1125_v19 = vmul.f32 0.35355338, %v6031_v13 }
 0x2e9   : > { %v1123_v16 = vmul.f32 0.35355338, %v1060_v15  ;;  %v6032_v17 = vpop.f32.mrb[2].mxu1 }
 0x2ea   : > { %v1063_v18 = vpop.f32.mrb[3].mxu1  ;;  %v1126_v24 = vmul.f32 0.35355338, %v6032_v17  ;;  %v7347_v25 = vadd.f32 %v7336_v14, %v1125_v19 }
 0x2eb   : > { %v1124_v20 = vmul.f32 0.35355338, %v1063_v18  ;;  %v7339_v22 = vadd.f32 %v7336_v14, %v1123_v16 }
 0x2ec   : > { %v7351_v27 = vadd.f32 %v7336_v14, %v1126_v24 }
 0x2ed   : > { %1161 = vmax.xlane.f32.xlu1 %v7339_v22  ;;  %v7343_v23 = vadd.f32 %v7336_v14, %v1124_v20 }
 0x2ef   : > { %1163 = vmax.xlane.f32.xlu0 %v7343_v23 }
 0x2f1   : > { %1165 = vmax.xlane.f32.xlu1 %v7347_v25 }
 0x2f5   : > { %1167 = vmax.xlane.f32.xlu1 %v7351_v27 }
 0x2f7   : > { %v6035_v28 = vpop.f32.mrb[4].mxu1 }
 0x2f8   : > { %v1076_v29 = vpop.f32.mrb[5].mxu1  ;;  %v1129_v8 = vmul.f32 0.35355338, %v6035_v28 }
 0x2f9   : > { %v1127_v30 = vmul.f32 0.35355338, %v1076_v29  ;;  %v6036_v31 = vpop.f32.mrb[6].mxu1 }
 0x2fa   : > { %v1079_v32 = vpop.f32.mrb[7].mxu1  ;;  %v1130_v15 = vmul.f32 0.35355338, %v6036_v31  ;;  %v7391_v17 = vadd.f32 %v7336_v14, %v1129_v8 }
 0x2fb   : > { %v1128_v33 = vmul.f32 0.35355338, %v1079_v32  ;;  %v7355_v34 = vadd.f32 %v7336_v14, %v1127_v30 }
 0x2fc   : > { %v7395_v19 = vadd.f32 %v7336_v14, %v1130_v15 }
 0x2fd   : > { %1169 = vmax.xlane.f32.xlu1 %v7355_v34  ;;  %v7359_v35 = vadd.f32 %v7336_v14, %v1128_v33 }
 0x301   : > { %1171 = vmax.xlane.f32.xlu1 %v7359_v35 }
 0x307   : > { %v7362_v36 = vpop.f32.mrb[8].mxu1 }
 0x308   : > { %v1092_v37 = vpop.f32.mrb[9].mxu1  ;;  %v1133_v15 = vmul.f32 0.35355338, %v7362_v36 }
 0x309   : > { %v6040_v38 = vpop.f32.mrb[10].mxu1 }
 0x30a   : > { %v1095_v40 = vpop.f32.mrb[11].mxu1  ;;  %v7440_v36 = vadd.f32 %v7336_v14, %v1133_v15 }
 0x30b   : > { %v1132_v41 = vmul.f32 0.35355338, %v1095_v40 }
 0x30d   : > { %v7365_v43 = vadd.f32 %v7336_v14, %v1132_v41 }
 0x30f   : > { %1179 = vmax.xlane.f32.xlu0 %v7365_v43 }
 0x317   : > { %v7368_v44 = vpop.f32.mrb[12].mxu1 }
 0x318   : > { %v7370_v46 = vpop.f32.mrb[13].mxu1 }
 0x319   : > { %v7372_v47 = vpop.f32.mrb[14].mxu1 }
 0x31a   : > { %v1111_v49 = vpop.f32.mrb[15].mxu1 }
 0x35a   : > { %v6069_v50 = vpop.f32.mrb[12].mxu0 }
 0x35b   : > { %v1506_v52 = vmul.f32 0.35355338, %v6069_v50  ;;  %v1441_v53 = vpop.f32.mrb[13].mxu0 }
 0x35c   : > { %v6070_v55 = vpop.f32.mrb[14].mxu0  ;;  %v1504_v56 = vmul.f32 0.35355338, %v1441_v53 }
 0x35d   : > { %v1444_v58 = vpop.f32.mrb[15].mxu0  ;;  %v7375_v59 = vadd.f32 %v7336_v14, %v1506_v52  ;;  %v1507_v63 = vmul.f32 0.35355338, %v6070_v55  ;;  %v1134_v52 = vmul.f32 0.35355338, %v6040_v38 }
 0x35e   : > { %v7379_v0 = vadd.f32 %v7336_v14, %v1504_v56  ;;  %v1505_v1 = vmul.f32 0.35355338, %v1444_v58  ;;  %v1131_v56 = vmul.f32 0.35355338, %v1092_v37  ;;  %v1136_v37 = vmul.f32 0.35355338, %v1111_v49 }
 0x35f   : > { %1540 = vmax.xlane.f32.xlu1 %v7375_v59  ;;  %v7383_v2 = vadd.f32 %v7336_v14, %v1507_v63 }
 0x360   : > { %v7387_v10 = vadd.f32 %v7336_v14, %v1505_v1  ;;  %v7419_v1 = vadd.f32 %v7336_v14, %v1134_v52  ;;  %v7437_v49 = vadd.f32 %v7336_v14, %v1136_v37 }
 0x363   : > { %1536 = vmax.xlane.f32.xlu1 %v7379_v0 }
 0x367   : > { %1542 = vmax.xlane.f32.xlu1 %v7383_v2 }
 0x36a   : > { %v6073_v11 = vpop.f32.mrb[16].mxu0 }
 0x36b   : > { %v1457_v12 = vpop.f32.mrb[17].mxu0  ;;  %1538 = vmax.xlane.f32.xlu1 %v7387_v10  ;;  %v1510_v28 = vmul.f32 0.35355338, %v6073_v11  ;;  %v7422_v11 = vadd.f32 %v7336_v14, %v1131_v56 }
 0x36c   : > { %v6074_v13 = vpop.f32.mrb[18].mxu0  ;;  %v1508_v18 = vmul.f32 0.35355338, %v1457_v12 }
 0x36d   : > { %v1460_v16 = vpop.f32.mrb[19].mxu0  ;;  %v1511_v33 = vmul.f32 0.35355338, %v6074_v13  ;;  %v7407_v41 = vadd.f32 %v7336_v14, %v1510_v28 }
 0x36e   : > { %v1509_v20 = vmul.f32 0.35355338, %v1460_v16  ;;  %v7399_v24 = vadd.f32 %v7336_v14, %v1508_v18 }
 0x36f   : > { %1173 = vmax.xlane.f32.xlu1 %v7391_v17  ;;  %v7414_v58 = vadd.f32 %v7336_v14, %v1511_v33 }
 0x370   : > { %v7403_v29 = vadd.f32 %v7336_v14, %v1509_v20 }
 0x373   : > { %1175 = vmax.xlane.f32.xlu1 %v7395_v19 }
 0x377   : > { %1544 = vmax.xlane.f32.xlu1 %v7399_v24 }
 0x37a   : > { %v6077_v30 = vpop.f32.mrb[20].mxu0  ;;  %v1162_v53 = vpop.xlane.xlu1 %1161 }
 0x37b   : > { %v1473_v31 = vpop.f32.mrb[21].mxu0  ;;  %1546 = vmax.xlane.f32.xlu1 %v7403_v29  ;;  %v1514_v33 = vmul.f32 0.35355338, %v6077_v30 }
 0x37c   : > { %v6078_v32 = vpop.f32.mrb[22].mxu0  ;;  %v1512_v8 = vmul.f32 0.35355338, %v1473_v31  ;;  %v1164_v12 = vpop.xlane.xlu0 %1163 }
 0x37d   : > { %v1476_v40 = vpop.f32.mrb[23].mxu0  ;;  %v1515_v63 = vmul.f32 0.35355338, %v6078_v32  ;;  %v1194_v20 = vsub.f32 %v7343_v23, %v1164_v12  ;;  %v1138_v23 = vmul.f32 0.35355338, %v7372_v47  ;;  %v7451_v30 = vadd.f32 %v7336_v14, %v1514_v33 }
 0x37e   : > { %v1513_v50 = vmul.f32 0.35355338, %v1476_v40  ;;  %v1166_v38 = vpop.xlane.xlu1 %1165  ;;  %v7431_v16 = vadd.f32 %v7336_v14, %v1512_v8  ;;  %v1135_v8 = vmul.f32 0.35355338, %v7370_v46 }
 0x37f   : > { %1548 = vmax.xlane.f32.xlu1 %v7407_v41  ;;  %v7427_v13 = vadd.f32 %v7336_v14, %v1515_v63  ;;  %v1211_v52 = vmul.f32 1.442695, %v1194_v20  ;;  %v7457_v15 = vadd.f32 %v7336_v14, %v1138_v23 }
 0x380   : > { %v7411_v55 = vadd.f32 %v7336_v14, %v1513_v50  ;;  %v7460_v20 = vadd.f32 %v7336_v14, %v1135_v8 }
 0x381   : > { %6483 = vpow2.f32 %v1211_v52  ;;  %v9339_v52 = vmov 0.0  }
 0x382   : > { %1554 = vmax.xlane.f32.xlu0 %v7411_v55  ;;  %v1168_v31 = vpop.xlane.xlu1 %1167  ;;  %6045 = vmatprep.subr.bf16.mxu1 %v9339_v52 }
 0x383   : > { %1550 = vmax.xlane.f32.xlu1 %v7414_v58  ;;  %v1196_v56 = vsub.f32 %v7351_v27, %v1168_v31  ;;  %v1193_v27 = vsub.f32 %v7339_v22, %v1162_v53  ;;  %v1195_v31 = vsub.f32 %v7347_v25, %v1166_v38  ;;  %v1137_v22 = vmul.f32 0.35355338, %v7368_v44  ;;  %6083 = vmatprep.subr.bf16.mxu0 %v9339_v52 }
 0x385   : > { %v1215_v37 = vmul.f32 1.442695, %v1196_v56  ;;  %v1209_v46 = vmul.f32 1.442695, %v1193_v27 }
 0x386   : > { %1183 = vmax.xlane.f32.xlu0 %v7419_v1 }
 0x387   : > { %1177 = vmax.xlane.f32.xlu1 %v7422_v11  ;;  %6485 = vpow2.f32 %v1215_v37 }
 0x388   : > { %6487 = vpow2.f32 %v1209_v46 }
 0x38a   : > { %1558 = vmax.xlane.f32.xlu0 %v7427_v13  ;;  %v6081_v18 = vpop.f32.mrb[24].mxu0  ;;  %v1170_v56 = vpop.xlane.xlu1 %1169 }
 0x38b   : > { %1552 = vmax.xlane.f32.xlu1 %v7431_v16  ;;  %v1489_v28 = vpop.f32.mrb[25].mxu0 }
 0x38c   : > { %v6082_v32 = vpop.f32.mrb[26].mxu0  ;;  %v1516_v47 = vmul.f32 0.35355338, %v1489_v28  ;;  %v1213_v28 = vmul.f32 1.442695, %v1195_v31 }
 0x38d   : > { %v1492_v40 = vpop.f32.mrb[27].mxu0  ;;  %v1519_v12 = vmul.f32 0.35355338, %v6082_v32  ;;  %v7474_v32 = vpop.eup %6483 }
 0x38e   : > { %v1517_v50 = vmul.f32 0.35355338, %v1492_v40  ;;  %1187 = vmax.xlane.f32.xlu0 %v7437_v49  ;;  %v7470_v53 = vadd.f32 %v7336_v14, %v1516_v47  ;;  %v1518_v40 = vmul.f32 0.35355338, %v6081_v18  ;;  %6489 = vpow2.f32 %v1213_v28 }
 0x38f   : > { %1181 = vmax.xlane.f32.xlu1 %v7440_v36  ;;  %v7466_v33 = vadd.f32 %v7336_v14, %v1519_v12  ;;  %v1197_v12 = vsub.f32 %v7355_v34, %v1170_v56 }
 0x390   : > { %v7447_v63 = vadd.f32 %v7336_v14, %v1517_v50  ;;  %v7477_v50 = vadd.f32 %v7336_v14, %v1137_v22  ;;  %v7484_v44 = vadd.f32 %v7336_v14, %v1518_v40  ;;  %v1172_v14 = vpop.xlane.xlu1 %1171 }
 0x391   : > { %v7481_v25 = vpop.eup %6485  ;;  %v1217_v22 = vmul.f32 1.442695, %v1197_v12  ;;  %v1198_v34 = vsub.f32 %v7359_v35, %v1172_v14 }
 0x392   : > { %1562 = vmax.xlane.f32.xlu0 %v7447_v63  ;;  %v7488_v38 = vpop.eup %6487 }
 0x393   : > { %1556 = vmax.xlane.f32.xlu1 %v7451_v30 }
 0x396   : > { %1191 = vmax.xlane.f32.xlu0 %v7457_v15 }
 0x397   : > { %1185 = vmax.xlane.f32.xlu1 %v7460_v20 }
 0x398   : > { %v7491_v18 = vpop.eup %6489 }
 0x39a   : > { %1566 = vmax.xlane.f32.xlu0 %v7466_v33 }
 0x39b   : > { %1560 = vmax.xlane.f32.xlu1 %v7470_v53 }
 0x39e   : > { %1243 = vadd.xlane.f32.xlu0 %v7474_v32 }
 0x39f   : > { %1189 = vmax.xlane.f32.xlu1 %v7477_v50 }
 0x3a2   : > { %1247 = vadd.xlane.f32.xlu0 %v7481_v25 }
 0x3a3   : > { %1564 = vmax.xlane.f32.xlu1 %v7484_v44 }
 0x3a7   : > { %1241 = vadd.xlane.f32.xlu1 %v7488_v38 }
 0x3ab   : > { %1245 = vadd.xlane.f32.xlu1 %v7491_v18 }
 0x3ec   : > { %v1541_v23 = vpop.xlane.xlu1 %1540 }
 0x3ed   : > { %v1570_v8 = vsub.f32 %v7375_v59, %v1541_v23 }
 0x3ef   : > { %v1588_v37 = vmul.f32 1.442695, %v1570_v8 }
 0x3f0   : > { %v1537_v27 = vpop.xlane.xlu1 %1536 }
 0x3f1   : > { %6491 = vpow2.f32 %v1588_v37  ;;  %v1568_v47 = vsub.f32 %v7379_v0, %v1537_v27 }
 0x3f3   : > { %v1584_v46 = vmul.f32 1.442695, %v1568_v47 }
 0x3f4   : > { %v1543_v31 = vpop.xlane.xlu1 %1542 }
 0x3f5   : > { %6493 = vpow2.f32 %v1584_v46  ;;  %v1571_v28 = vsub.f32 %v7383_v2, %v1543_v31 }
 0x3f6   : > { %6495 = vpow2.f32 %v1217_v22 }
 0x3f7   : > { %v1590_v23 = vmul.f32 1.442695, %v1571_v28 }
 0x3f8   : > { %v1539_v40 = vpop.xlane.xlu1 %1538 }
 0x3f9   : > { %v1569_v52 = vsub.f32 %v7387_v10, %v1539_v40  ;;  %v1219_v10 = vmul.f32 1.442695, %v1198_v34 }
 0x3fb   : > { %v7501_v5 = vpop.eup %6491  ;;  %v1586_v59 = vmul.f32 1.442695, %v1569_v52 }
 0x3fc   : > { %v1174_v8 = vpop.xlane.xlu1 %1173  ;;  %1620 = vadd.xlane.f32.xlu1 %v7501_v5 }
 0x3fd   : > { %6497 = vpow2.f32 %v1586_v59  ;;  %v1199_v0 = vsub.f32 %v7391_v17, %v1174_v8 }
 0x3fe   : > { %6499 = vpow2.f32 %v1590_v23 }
 0x3ff   : > { %v7506_v56 = vpop.eup %6493  ;;  %v1221_v37 = vmul.f32 1.442695, %v1199_v0 }
 0x400   : > { %v1176_v2 = vpop.xlane.xlu1 %1175  ;;  %1616 = vadd.xlane.f32.xlu1 %v7506_v56  ;;  %v7510_v27 = vpop.eup %6495 }
 0x401   : > { %6501 = vpow2.f32 %v1221_v37  ;;  %v1200_v52 = vsub.f32 %v7395_v19, %v1176_v2  ;;  %v1180_v19 = vpop.xlane.xlu0 %1179 }
 0x402   : > { %6503 = vpow2.f32 %v1219_v10  ;;  %v1202_v34 = vsub.f32 %v7365_v43, %v1180_v19 }
 0x403   : > { %v1223_v35 = vmul.f32 1.442695, %v1200_v52 }
 0x404   : > { %v1545_v12 = vpop.xlane.xlu1 %1544  ;;  %1249 = vadd.xlane.f32.xlu1 %v7510_v27 }
 0x405   : > { %6505 = vpow2.f32 %v1223_v35  ;;  %v1572_v28 = vsub.f32 %v7399_v24, %v1545_v12  ;;  %v1227_v12 = vmul.f32 1.442695, %v1202_v34 }
 0x407   : > { %v7513_v14 = vpop.eup %6497  ;;  %v1592_v0 = vmul.f32 1.442695, %v1572_v28 }
 0x408   : > { %v1547_v17 = vpop.xlane.xlu1 %1546  ;;  %1618 = vadd.xlane.f32.xlu0 %v7513_v14  ;;  %v7517_v46 = vpop.eup %6499 }
 0x409   : > { %v1573_v47 = vsub.f32 %v7403_v29, %v1547_v17 }
 0x40b   : > { %v7519_v31 = vpop.eup %6501  ;;  %v1594_v22 = vmul.f32 1.442695, %v1573_v47 }
 0x40c   : > { %v1549_v40 = vpop.xlane.xlu1 %1548  ;;  %1253 = vadd.xlane.f32.xlu1 %v7519_v31  ;;  %1622 = vadd.xlane.f32.xlu0 %v7517_v46  ;;  %v7525_v23 = vpop.eup %6503 }
 0x40d   : > { %6507 = vpow2.f32 %v1594_v22  ;;  %v1574_v59 = vsub.f32 %v7407_v41, %v1549_v40 }
 0x40f   : > { %v1596_v8 = vmul.f32 1.442695, %v1574_v59  ;;  %v1555_v29 = vpop.xlane.xlu0 %1554  ;;  %v7530_v2 = vpop.eup %6505 }
 0x410   : > { %v1551_v37 = vpop.xlane.xlu1 %1550  ;;  %1251 = vadd.xlane.f32.xlu0 %v7525_v23 }
 0x411   : > { %6509 = vpow2.f32 %v1596_v8  ;;  %v1575_v24 = vsub.f32 %v7414_v58, %v1551_v37  ;;  %v1577_v58 = vsub.f32 %v7411_v55, %v1555_v29 }
 0x412   : > { %6511 = vpow2.f32 %v1592_v0 }
 0x413   : > { %v1598_v10 = vmul.f32 1.442695, %v1575_v24  ;;  %v1184_v52 = vpop.xlane.xlu0 %1183  ;;  %v1602_v8 = vmul.f32 1.442695, %v1577_v58 }
 0x414   : > { %v1178_v41 = vpop.xlane.xlu1 %1177  ;;  %1255 = vadd.xlane.f32.xlu0 %v7530_v2  ;;  %v1204_v35 = vsub.f32 %v7419_v1, %v1184_v52 }
 0x415   : > { %6513 = vpow2.f32 %v1598_v10  ;;  %v1201_v43 = vsub.f32 %v7422_v11, %v1178_v41 }
 0x416   : > { %6515 = vpow2.f32 %v1227_v12  ;;  %v1231_v28 = vmul.f32 1.442695, %v1204_v35 }
 0x417   : > { %v7535_v17 = vpop.eup %6507  ;;  %v1225_v47 = vmul.f32 1.442695, %v1201_v43  ;;  %v1559_v19 = vpop.xlane.xlu0 %1558 }
 0x418   : > { %v1553_v22 = vpop.xlane.xlu1 %1552  ;;  %1626 = vadd.xlane.f32.xlu0 %v7535_v17  ;;  %v1579_v1 = vsub.f32 %v7427_v13, %v1559_v19 }
 0x419   : > { %6517 = vpow2.f32 %v1225_v47  ;;  %v1576_v10 = vsub.f32 %v7431_v16, %v1553_v22 }
 0x41a   : > { %6519 = vpow2.f32 %v1231_v28  ;;  %v1606_v24 = vmul.f32 1.442695, %v1579_v1 }
 0x41b   : > { %v7539_v40 = vpop.eup %6509  ;;  %v1188_v59 = vpop.xlane.xlu0 %1187  ;;  %6521 = vpow2.f32 %v1602_v8  ;;  %v1600_v47 = vmul.f32 1.442695, %v1576_v10 }
 0x41c   : > { %v1182_v34 = vpop.xlane.xlu1 %1181  ;;  %1628 = vadd.xlane.f32.xlu1 %v7539_v40  ;;  %v7544_v0 = vpop.eup %6511  ;;  %v1206_v13 = vsub.f32 %v7437_v49, %v1188_v59 }
 0x41d   : > { %v1203_v11 = vsub.f32 %v7440_v36, %v1182_v34 }
 0x41e   : > { %v1235_v58 = vmul.f32 1.442695, %v1206_v13 }
 0x41f   : > { %v7546_v55 = vpop.eup %6513  ;;  %v1229_v29 = vmul.f32 1.442695, %v1203_v11  ;;  %v1563_v37 = vpop.xlane.xlu0 %1562 }
 0x420   : > { %v1557_v52 = vpop.xlane.xlu1 %1556  ;;  %1624 = vadd.xlane.f32.xlu1 %v7544_v0  ;;  %1630 = vadd.xlane.f32.xlu0 %v7546_v55  ;;  %v7553_v12 = vpop.eup %6515  ;;  %v1581_v22 = vsub.f32 %v7447_v63, %v1563_v37 }
 0x421   : > { %6523 = vpow2.f32 %v1229_v29  ;;  %v1578_v36 = vsub.f32 %v7451_v30, %v1557_v52 }
 0x422   : > { %6525 = vpow2.f32 %v1606_v24  ;;  %v1610_v29 = vmul.f32 1.442695, %v1581_v22 }
 0x423   : > { %v7555_v41 = vpop.eup %6517  ;;  %v1604_v35 = vmul.f32 1.442695, %v1578_v36  ;;  %v1192_v43 = vpop.xlane.xlu0 %1191 }
 0x424   : > { %v1208_v16 = vsub.f32 %v7457_v15, %v1192_v43  ;;  %1257 = vadd.xlane.f32.xlu1 %v7555_v41  ;;  %v1186_v19 = vpop.xlane.xlu1 %1185  ;;  %1259 = vadd.xlane.f32.xlu0 %v7553_v12  ;;  %v7561_v30 = vpop.eup %6519 }
 0x425   : > { %6527 = vpow2.f32 %v1604_v35  ;;  %v1205_v49 = vsub.f32 %v7460_v20, %v1186_v19  ;;  %v7565_v1 = vpop.eup %6521 }
 0x426   : > { %6529 = vpow2.f32 %v1600_v47  ;;  %v1239_v28 = vmul.f32 1.442695, %v1208_v16 }
 0x427   : > { %v1567_v59 = vpop.xlane.xlu0 %1566  ;;  %6531 = vpow2.f32 %v1235_v58  ;;  %v1233_v15 = vmul.f32 1.442695, %v1205_v49 }
 0x428   : > { %v1561_v8 = vpop.xlane.xlu1 %1560  ;;  %1263 = vadd.xlane.f32.xlu0 %v7561_v30  ;;  %v1583_v11 = vsub.f32 %v7466_v33, %v1567_v59  ;;  %6533 = vpow2.f32 %v1239_v28 }
 0x429   : > { %6535 = vpow2.f32 %v1233_v15  ;;  %v1580_v13 = vsub.f32 %v7470_v53, %v1561_v8 }
 0x42a   : > { %v1614_v10 = vmul.f32 1.442695, %v1583_v11  ;;  %6537 = vpow2.f32 %v1610_v29 }
 0x42b   : > { %v7567_v34 = vpop.eup %6523  ;;  %v1244_v36 = vpop.xlane.xlu0 %1243  ;;  %v1608_v19 = vmul.f32 1.442695, %v1580_v13  ;;  %v9358_v13 = vmov 0.0  }
 0x42c   : > { %1261 = vadd.xlane.f32.xlu1 %v7567_v34  ;;  %v1190_v20 = vpop.xlane.xlu1 %1189  ;;  %1634 = vadd.xlane.f32.xlu0 %v7565_v1  ;;  %v7573_v37 = vpop.eup %6525 }
 0x42d   : > { %v1207_v63 = vsub.f32 %v7477_v50, %v1190_v20  ;;  %6061 = vmatprep.mubr.msk.bf16.mxu1 %vm7059_vm3, %v9358_v13  ;;  %6099 = vmatprep.mubr.msk.bf16.mxu0 %vm7059_vm3, %v9358_v13 }
 0x42f   : > { %v7575_v24 = vpop.eup %6527  ;;  %v1237_v52 = vmul.f32 1.442695, %v1207_v63  ;;  %v1248_v49 = vpop.xlane.xlu0 %1247 }
 0x430   : > { %1636 = vadd.xlane.f32.xlu1 %v7575_v24  ;;  %v1565_v33 = vpop.xlane.xlu1 %1564  ;;  %1638 = vadd.xlane.f32.xlu0 %v7573_v37  ;;  %v7581_v43 = vpop.eup %6529 }
 0x431   : > { %6539 = vpow2.f32 %v1237_v52  ;;  %v1582_v35 = vsub.f32 %v7484_v44, %v1565_v33  ;;  %v7583_v50 = vpop.eup %6531 }
 0x432   : > { %6541 = vpow2.f32 %v1614_v10  ;;  %v7587_v58 = vpop.eup %6533 }
 0x433   : > { %v1612_v47 = vmul.f32 1.442695, %v1582_v35  ;;  %6543 = vrcp.f32 %v1244_v36  ;;  %v7589_v53 = vpop.eup %6535 }
 0x434   : > { %1632 = vadd.xlane.f32.xlu1 %v7581_v43  ;;  %v1242_v16 = vpop.xlane.xlu1 %1241  ;;  %1267 = vadd.xlane.f32.xlu0 %v7583_v50  ;;  %v7593_v22 = vpop.eup %6537 }
 0x435   : > { %6545 = vpow2.f32 %v1612_v47 }
 0x436   : > { %6547 = vrcp.f32 %v1242_v16 }
 0x437   : > { %6549 = vpow2.f32 %v1608_v19 }
 0x438   : > { %1265 = vadd.xlane.f32.xlu1 %v7589_v53  ;;  %v1246_v44 = vpop.xlane.xlu1 %1245  ;;  %1271 = vadd.xlane.f32.xlu0 %v7587_v58 }
 0x439   : > { %6551 = vrcp.f32 %v1246_v44 }
 0x43a   : > { %6553 = vrcp.f32 %v1248_v49 }
 0x43b   : > { %v7595_v28 = vpop.eup %6539 }
 0x43c   : > { %1269 = vadd.xlane.f32.xlu1 %v7595_v28  ;;  %1642 = vadd.xlane.f32.xlu0 %v7593_v22  ;;  %v7599_v59 = vpop.eup %6541 }
 0x43d   : > { %v6544_v8 = vpop.eup %6543 }
 0x43e   : > { %v1290_v20 = vmul.f32 %v6544_v8, %v7474_v32  ;;  %v761_v32 = vld [vmem:[%s9318_s5 + $0x40] sm:$0xff] }
 0x43f   : > { %v7601_v15 = vpop.eup %6545 }
 0x440   : > { %v6548_v11 = vpop.eup %6547  ;;  %1644 = vadd.xlane.f32.xlu1 %v7601_v15  ;;  %1646 = vadd.xlane.f32.xlu0 %v7599_v59 }
 0x441   : > { %v1289_v29 = vmul.f32 %v6548_v11, %v7488_v38  ;;  %v7607_v63 = vpop.eup %6549  ;;  %v762_v38 = vld [vmem:[%s9318_s5 + $0x48] sm:$0xff] }
 0x443   : > { %v1305_v10 = vpack.c.bf16 %v1290_v20, %v1289_v29  ;;  %v6552_v52 = vpop.eup %6551 }
 0x444   : > { %1640 = vadd.xlane.f32.xlu1 %v7607_v63  ;;  %v6554_v33 = vpop.eup %6553  ;;  %v1291_v36 = vmul.f32 %v6552_v52, %v7491_v18  ;;  %v759_v18 = vld [vmem:[%s9318_s5 + $0x30] sm:$0xff] }
 0x445   : > { %6046 = vmatpush3.bf16.xpose.msra.mxu1 %v1305_v10  ;;  %v1292_v35 = vmul.f32 %v6554_v33, %v7481_v25  ;;  %v760_v25 = vld [vmem:[%s9318_s5 + $0x38] sm:$0xff] }
 0x446   : > { %6047 = vmatprep.subr.bf16.mxu1 %v9358_v13 }
 0x447   : > { %v1306_v47 = vpack.c.bf16 %v1292_v35, %v1291_v36 }
 0x44d   : > { %6048 = vmatpush3.bf16.xpose.msra.mxu1 %v1306_v47 }
 0x44e   : > { %6049 = vmatprep.subr.bf16.mxu1 %v9358_v13 }
 0x455   : > { %807 = vperm.xlu1 %6450, %v761_v32  }
 0x456   : > { %812 = vperm.xlu0 %6449, %v762_v38  }
 0x459   : > { %797 = vperm.xlu1 %6450, %v759_v18  }
 0x45a   : > { %1731 = vrot.lane.b32.xlu0 %v7265_v39, %s9342_s21 }
 0x45d   : > { %802 = vperm.xlu1 %6450, %v760_v25  }
 0x45e   : > { %1733 = vrot.lane.b32.xlu0 %v7271_v42, %s9342_s21 }
 0x461   : > { %2098 = vrot.lane.b32.xlu1 %v7265_v39, %s9344_s23 }
 0x462   : > { %1735 = vrot.lane.b32.xlu0 %v7277_v45, %s9342_s21 }
 0x465   : > { %2100 = vrot.lane.b32.xlu1 %v7271_v42, %s9344_s23 }
 0x466   : > { %1737 = vrot.lane.b32.xlu0 %v7283_v48, %s9342_s21 }
 0x469   : > { %2102 = vrot.lane.b32.xlu1 %v7277_v45, %s9344_s23 }
 0x46a   : > { %1739 = vrot.lane.b32.xlu0 %v7289_v51, %s9342_s21 }
 0x46d   : > { %2104 = vrot.lane.b32.xlu1 %v7283_v48, %s9344_s23 }
 0x46e   : > { %1741 = vrot.lane.b32.xlu0 %v7295_v54, %s9342_s21 }
 0x471   : > { %2106 = vrot.lane.b32.xlu1 %v7289_v51, %s9344_s23 }
 0x472   : > { %1743 = vrot.lane.b32.xlu0 %v7301_v57, %s9342_s21 }
 0x475   : > { %2108 = vrot.lane.b32.xlu1 %v7295_v54, %s9344_s23 }
 0x476   : > { %1745 = vrot.lane.b32.xlu0 %v7307_v62, %s9342_s21 }
 0x479   : > { %2110 = vrot.lane.b32.xlu1 %v7301_v57, %s9344_s23 }
 0x47d   : > { %2112 = vrot.lane.b32.xlu1 %v7307_v62, %s9344_s23 }
 0x489   : > { %v1621_v39 = vpop.xlane.xlu1 %1620 }
 0x48d   : > { %v1617_v42 = vpop.xlane.xlu1 %1616 }
 0x48e   : > { %6555 = vrcp.f32 %v1617_v42 }
 0x491   : > { %v1250_v48 = vpop.xlane.xlu1 %1249 }
 0x495   : > { %v1619_v45 = vpop.xlane.xlu0 %1618 }
 0x496   : > { %6557 = vrcp.f32 %v1619_v45 }
 0x497   : > { %6559 = vrcp.f32 %v1621_v39 }
 0x498   : > { %v6556_v16 = vpop.eup %6555 }
 0x499   : > { %v1623_v51 = vpop.xlane.xlu0 %1622  ;;  %v1254_v44 = vpop.xlane.xlu1 %1253  ;;  %v1664_v57 = vmul.f32 %v6556_v16, %v7506_v56 }
 0x49a   : > { %6561 = vrcp.f32 %v1623_v51 }
 0x49b   : > { %6563 = vrcp.f32 %v1250_v48 }
 0x49d   : > { %v1252_v54 = vpop.xlane.xlu0 %1251 }
 0x49e   : > { %6565 = vrcp.f32 %v1252_v54 }
 0x4a0   : > { %v6558_v19 = vpop.eup %6557 }
 0x4a1   : > { %v1256_v49 = vpop.xlane.xlu0 %1255  ;;  %v1665_v62 = vmul.f32 %v6558_v19, %v7513_v14  ;;  %v6560_v11 = vpop.eup %6559 }
 0x4a2   : > { %6567 = vrcp.f32 %v1256_v49  ;;  %v1666_v14 = vmul.f32 %v6560_v11, %v7501_v5 }
 0x4a3   : > { %v1680_v8 = vpack.c.bf16 %v1665_v62, %v1664_v57  ;;  %6569 = vrcp.f32 %v1254_v44 }
 0x4a4   : > { %v6562_v29 = vpop.eup %6561 }
 0x4a5   : > { %6084 = vmatpush3.bf16.xpose.msra.mxu0 %v1680_v8  ;;  %v6564_v20 = vpop.eup %6563  ;;  %v1667_v10 = vmul.f32 %v6562_v29, %v7517_v46  ;;  %v1627_v33 = vpop.xlane.xlu0 %1626 }
 0x4a6   : > { %6085 = vmatprep.subr.bf16.mxu0 %v9358_v13  ;;  %v1293_v35 = vmul.f32 %v6564_v20, %v7510_v27  ;;  %6571 = vrcp.f32 %v1627_v33 }
 0x4a7   : > { %v1681_v32 = vpack.c.bf16 %v1667_v10, %v1666_v14 }
 0x4a8   : > { %v6566_v52 = vpop.eup %6565 }
 0x4a9   : > { %v1629_v36 = vpop.xlane.xlu1 %1628  ;;  %v1294_v56 = vmul.f32 %v6566_v52, %v7525_v23 }
 0x4ab   : > { %v1307_v47 = vpack.c.bf16 %v1294_v56, %v1293_v35 }
 0x4ac   : > { %v6568_v38 = vpop.eup %6567 }
 0x4ad   : > { %v1625_v18 = vpop.xlane.xlu1 %1624  ;;  %6050 = vmatpush3.bf16.xpose.msra.mxu1 %v1307_v47  ;;  %6086 = vmatpush3.bf16.xpose.msra.mxu0 %v1681_v32  ;;  %v1631_v25 = vpop.xlane.xlu0 %1630  ;;  %v1296_v27 = vmul.f32 %v6568_v38, %v7530_v2 }
 0x4ae   : > { %v6570_v39 = vpop.eup %6569  ;;  %6573 = vrcp.f32 %v1625_v18  ;;  %6051 = vmatprep.subr.bf16.mxu1 %v9358_v13  ;;  %6087 = vmatprep.subr.bf16.mxu0 %v9358_v13 }
 0x4af   : > { %6575 = vrcp.f32 %v1631_v25  ;;  %v1295_v5 = vmul.f32 %v6570_v39, %v7519_v31 }
 0x4b0   : > { %v6572_v48 = vpop.eup %6571 }
 0x4b1   : > { %v1258_v46 = vpop.xlane.xlu1 %1257  ;;  %v1260_v23 = vpop.xlane.xlu0 %1259  ;;  %v1308_v42 = vpack.c.bf16 %v1296_v27, %v1295_v5  ;;  %v1669_v19 = vmul.f32 %v6572_v48, %v7535_v17 }
 0x4b2   : > { %6577 = vrcp.f32 %v1258_v46 }
 0x4b3   : > { %6579 = vrcp.f32 %v1260_v23 }
 0x4b4   : > { %6581 = vrcp.f32 %v1629_v36 }
 0x4b5   : > { %6052 = vmatpush3.bf16.xpose.msra.mxu1 %v1308_v42  ;;  %v1264_v45 = vpop.xlane.xlu0 %1263 }
 0x4b6   : > { %6053 = vmatprep.subr.bf16.mxu1 %v9358_v13  ;;  %6583 = vrcp.f32 %v1264_v45 }
 0x4b8   : > { %v6574_v51 = vpop.eup %6573 }
 0x4b9   : > { %v1262_v54 = vpop.xlane.xlu1 %1261  ;;  %v1635_v16 = vpop.xlane.xlu0 %1634  ;;  %v1668_v2 = vmul.f32 %v6574_v51, %v7544_v0 }
 0x4ba   : > { %6585 = vrcp.f32 %v1262_v54  ;;  %v6576_v44 = vpop.eup %6575 }
 0x4bb   : > { %v1682_v31 = vpack.c.bf16 %v1669_v19, %v1668_v2  ;;  %v1671_v10 = vmul.f32 %v6576_v44, %v7546_v55  ;;  %6587 = vrcp.f32 %v1635_v16 }
 0x4bc   : > { %v6578_v49 = vpop.eup %6577 }
 0x4bd   : > { %v6580_v57 = vpop.eup %6579  ;;  %v1637_v62 = vpop.xlane.xlu1 %1636  ;;  %6088 = vmatpush3.bf16.xpose.msra.mxu0 %v1682_v31  ;;  %v1297_v11 = vmul.f32 %v6578_v49, %v7555_v41 }
 0x4be   : > { %v1639_v8 = vpop.xlane.xlu0 %1638  ;;  %v6582_v29 = vpop.eup %6581  ;;  %v1298_v20 = vmul.f32 %v6580_v57, %v7553_v12  ;;  %6089 = vmatprep.subr.bf16.mxu0 %v9358_v13 }
 0x4bf   : > { %v1670_v33 = vmul.f32 %v6582_v29, %v7539_v40 }
 0x4c0   : > { %v1309_v0 = vpack.c.bf16 %v1298_v20, %v1297_v11  ;;  %v6584_v36 = vpop.eup %6583 }
 0x4c1   : > { %v1633_v17 = vpop.xlane.xlu1 %1632  ;;  %v1683_v35 = vpack.c.bf16 %v1671_v10, %v1670_v33  ;;  %v1300_v14 = vmul.f32 %v6584_v36, %v7561_v30 }
 0x4c2   : > { %v1268_v52 = vpop.xlane.xlu0 %1267  ;;  %6589 = vrcp.f32 %v1633_v17  ;;  %6054 = vmatpush3.bf16.xpose.msra.mxu1 %v1309_v0 }
 0x4c3   : > { %6591 = vrcp.f32 %v1637_v62  ;;  %6055 = vmatprep.subr.bf16.mxu1 %v9358_v13 }
 0x4c4   : > { %v6586_v41 = vpop.eup %6585  ;;  %6593 = vrcp.f32 %v1268_v52 }
 0x4c5   : > { %6595 = vrcp.f32 %v1639_v8  ;;  %v1266_v12 = vpop.xlane.xlu1 %1265  ;;  %6090 = vmatpush3.bf16.xpose.msra.mxu0 %v1683_v35  ;;  %v1299_v55 = vmul.f32 %v6586_v41, %v7567_v34  ;;  %v6588_v32 = vpop.eup %6587 }
 0x4c6   : > { %v1272_v56 = vpop.xlane.xlu0 %1271  ;;  %6597 = vrcp.f32 %v1266_v12  ;;  %6091 = vmatprep.subr.bf16.mxu0 %v9358_v13  ;;  %v1673_v34 = vmul.f32 %v6588_v32, %v7565_v1 }
 0x4c7   : > { %v1310_v40 = vpack.c.bf16 %v1300_v14, %v1299_v55 }
 0x4c9   : > { %v1270_v47 = vpop.xlane.xlu1 %1269 }
 0x4ca   : > { %6599 = vrcp.f32 %v1270_v47  ;;  %6056 = vmatpush3.bf16.xpose.msra.mxu1 %v1310_v40  ;;  %v1643_v38 = vpop.xlane.xlu0 %1642 }
 0x4cb   : > { %6057 = vmatprep.subr.bf16.mxu1 %v9358_v13  ;;  %6601 = vrcp.f32 %v1272_v56 }
 0x4cc   : > { %v6590_v18 = vpop.eup %6589  ;;  %6603 = vrcp.f32 %v1643_v38 }
 0x4cd   : > { %v6592_v25 = vpop.eup %6591  ;;  %v1645_v39 = vpop.xlane.xlu1 %1644  ;;  %v1672_v27 = vmul.f32 %v6590_v18, %v7581_v43 }
 0x4ce   : > { %v6594_v30 = vpop.eup %6593  ;;  %v1647_v42 = vpop.xlane.xlu0 %1646  ;;  %v1674_v43 = vmul.f32 %v6592_v25, %v7575_v24 }
 0x4cf   : > { %v6596_v46 = vpop.eup %6595  ;;  %v1684_v23 = vpack.c.bf16 %v1673_v34, %v1672_v27  ;;  %v1302_v51 = vmul.f32 %v6594_v30, %v7583_v50 }
 0x4d0   : > { %v6598_v5 = vpop.eup %6597  ;;  %v1675_v1 = vmul.f32 %v6596_v46, %v7573_v37 }
 0x4d1   : > { %v1641_v45 = vpop.xlane.xlu1 %1640  ;;  %6092 = vmatpush3.bf16.xpose.msra.mxu0 %v1684_v23  ;;  %v1301_v48 = vmul.f32 %v6598_v5, %v7589_v53 }
 0x4d2   : > { %6605 = vrcp.f32 %v1641_v45  ;;  %6093 = vmatprep.subr.bf16.mxu0 %v9358_v13  ;;  %v1685_v53 = vpack.c.bf16 %v1675_v1, %v1674_v43 }
 0x4d3   : > { %v1311_v54 = vpack.c.bf16 %v1302_v51, %v1301_v48  ;;  %6607 = vrcp.f32 %v1645_v39 }
 0x4d4   : > { %v6600_v16 = vpop.eup %6599  ;;  %6609 = vrcp.f32 %v1647_v42 }
 0x4d5   : > { %v808_v2 = vpop.permute.xlu1 %807  ;;  %6058 = vmatpush3.bf16.xpose.msra.mxu1 %v1311_v54  ;;  %v813_v19 = vpop.permute.xlu0 %812  ;;  %v1303_v50 = vmul.f32 %v6600_v16, %v7595_v28  ;;  %v7733_v54 = vld [vmem:[%s7333_s25] ss:$0 sm:$0xff] }
 0x4d6   : > { %v6602_v44 = vpop.eup %6601  ;;  %6059 = vmatprep.subr.bf16.mxu1 %v9358_v13  ;;  %v941_v28 = vadd.f32 %v7319_v4, %v808_v2  ;;  %v944_v56 = vadd.f32 %v7323_v9, %v813_v19 }
 0x4d7   : > { %v1304_v57 = vmul.f32 %v6602_v44, %v7587_v58  ;;  %v6604_v24 = vpop.eup %6603 }
 0x4d8   : > { %v1677_v20 = vmul.f32 %v6604_v24, %v7593_v22 }
 0x4d9   : > { %v798_v31 = vpop.permute.xlu1 %797  ;;  %6094 = vmatpush3.bf16.xpose.msra.mxu0 %v1685_v53  ;;  %v1732_v49 = vpop.permute.xlu0 %1731  ;;  %v1312_v62 = vpack.c.bf16 %v1304_v57, %v1303_v50 }
 0x4da   : > { %v933_v37 = vadd.f32 %v7249_v21, %v798_v31  ;;  %6095 = vmatprep.subr.bf16.mxu0 %v9358_v13  ;;  %v996_v21 = vpack.c.bf16 %v941_v28, %v941_v28 }
 0x4dc   : > { %v6606_v8 = vpop.eup %6605  ;;  %v1729_v11 = vpack.c.bf16 %v933_v37, %v933_v37 }
 0x4dd   : > { %6060 = vmatpush3.bf16.xpose.msra.mxu1 %v1312_v62  ;;  %v1676_v29 = vmul.f32 %v6606_v8, %v7607_v63  ;;  %v803_v10 = vpop.permute.xlu1 %802  ;;  %v1734_v0 = vpop.permute.xlu0 %1733 }
 0x4de   : > { %6429 = vmatprep.subr.msk.bf16.mxu1 %vm1022_vm1, %v1729_v11  ;;  %v6608_v58 = vpop.eup %6607  ;;  %v936_v63 = vadd.f32 %v7251_v26, %v803_v10  ;;  %v1772_v4 = vsel %vm1022_vm1, %v1729_v11, 0  ;;  %v1355_v26 = vpack.c.bf16 %v944_v56, %v944_v56 }
 0x4df   : > { %v1686_v17 = vpack.c.bf16 %v1677_v20, %v1676_v29  ;;  %v6610_v52 = vpop.eup %6609  ;;  %v1678_v33 = vmul.f32 %v6608_v58, %v7601_v15 }
 0x4e0   : > { %v1679_v36 = vmul.f32 %v6610_v52, %v7599_v59  ;;  %v2096_v12 = vpack.c.bf16 %v936_v63, %v936_v63 }
 0x4e1   : > { %6096 = vmatpush3.bf16.xpose.msra.mxu0 %v1686_v17  ;;  %v2099_v22 = vpop.permute.xlu1 %2098  ;;  %v1736_v35 = vpop.permute.xlu0 %1735 }
 0x4e2   : > { %6097 = vmatprep.subr.bf16.mxu0 %v9358_v13  ;;  %v1687_v41 = vpack.c.bf16 %v1679_v36, %v1678_v33  ;;  %v2139_v40 = vsel %vm1022_vm1, %v2096_v12, 0 }
 0x4e4   : > { %6062 = vmatmul.mubr.bf16.vlgmr.msra.gmra.mrb[16].mxu1 %v996_v21 }
 0x4e5   : > { %6104 = vmatpush3.bf16.msra.mxu1 %v1772_v4  ;;  %6105 = vmatprep.mubr.msk.bf16.mxu1 %vm997_vm2, %v1732_v49  ;;  %v2101_v15 = vpop.permute.xlu1 %2100  ;;  %v1738_v55 = vpop.permute.xlu0 %1737 }
 0x4e6   : > { %6121 = vmatprep.subr.bf16.mxu1 %v9358_v13 }
 0x4e9   : > { %6098 = vmatpush3.bf16.xpose.msra.mxu0 %v1687_v41  ;;  %v2103_v59 = vpop.permute.xlu1 %2102  ;;  %v1740_v14 = vpop.permute.xlu0 %1739 }
 0x4ea   : > { %6430 = vmatprep.subr.msk.bf16.mxu0 %vm1022_vm1, %v2096_v12 }
 0x4ec   : > { %6106 = vmatmul.mubr.msk.bf16.vlgmr.msra.gmra.mrb[20].mxu1 %vm997_vm2, %v1734_v0 }
 0x4ed   : > { %6109 = vmatprep.mubr.msk.bf16.mxu1 %vm997_vm2, %v1736_v35  ;;  %v2105_v9 = vpop.permute.xlu1 %2104  ;;  %v1742_v47 = vpop.permute.xlu0 %1741 }
 0x4f0   : > { %6100 = vmatmul.mubr.bf16.vlgmr.msra.gmra.mrb[28].mxu0 %v1355_v26 }
 0x4f1   : > { %6142 = vmatpush3.bf16.msra.mxu0 %v2139_v40  ;;  %6143 = vmatprep.mubr.msk.bf16.mxu0 %vm997_vm2, %v2099_v22  ;;  %v2107_v32 = vpop.permute.xlu1 %2106  ;;  %v1744_v38 = vpop.permute.xlu0 %1743 }
 0x4f2   : > { %6159 = vmatprep.subr.bf16.mxu0 %v9358_v13 }
 0x4f4   : > { %6110 = vmatmul.mubr.msk.bf16.gmra.mrb[24].mxu1 %vm997_vm2, %v1738_v55 }
 0x4f5   : > { %6113 = vmatprep.mubr.msk.bf16.mxu1 %vm997_vm2, %v1740_v14  ;;  %v2109_v18 = vpop.permute.xlu1 %2108  ;;  %v1746_v25 = vpop.permute.xlu0 %1745 }
 0x4f8   : > { %6144 = vmatmul.mubr.msk.bf16.vlgmr.msra.gmra.mrb[32].mxu0 %vm997_vm2, %v2101_v15 }
 0x4f9   : > { %6147 = vmatprep.mubr.msk.bf16.mxu0 %vm997_vm2, %v2103_v59  ;;  %v2111_v39 = vpop.permute.xlu1 %2110 }
 0x4fc   : > { %6114 = vmatmul.mubr.msk.bf16.gmra.mrb[28].mxu1 %vm997_vm2, %v1742_v47 }
 0x4fd   : > { %6117 = vmatprep.mubr.msk.bf16.mxu1 %vm997_vm2, %v1744_v38  ;;  %v2113_v27 = vpop.permute.xlu1 %2112 }
 0x500   : > { %6148 = vmatmul.mubr.msk.bf16.gmra.mrb[36].mxu0 %vm997_vm2, %v2105_v9 }
 0x501   : > { %6151 = vmatprep.mubr.msk.bf16.mxu0 %vm997_vm2, %v2107_v32 }
 0x504   : > { %6118 = vmatmul.mubr.msk.bf16.gmra.mrb[32].mxu1 %vm997_vm2, %v1746_v25 }
 0x505   : > { %6137 = vmatprep.mubr.msk.bf16.mxu1 %vm7059_vm3, %v9358_v13 }
 0x508   : > { %6152 = vmatmul.mubr.msk.bf16.gmra.mrb[40].mxu0 %vm997_vm2, %v2109_v18 }
 0x509   : > { %6155 = vmatprep.mubr.msk.bf16.mxu0 %vm997_vm2, %v2111_v39 }
 0x510   : > { %6156 = vmatmul.mubr.msk.bf16.gmra.mrb[44].mxu0 %vm997_vm2, %v2113_v27 }
 0x511   : > { %6175 = vmatprep.mubr.msk.bf16.mxu0 %vm7059_vm3, %v9358_v13 }
 0x5b7   : > { %v1347_v34 = vpop.f32.mrb[16].mxu1 }
 0x5b8   : > { %v6063_v30 = vpop.f32.mrb[17].mxu1 }
 0x5b9   : > { %v1350_v46 = vpop.f32.mrb[18].mxu1 }
 0x5ba   : > { %v6064_v23 = vpop.f32.mrb[19].mxu1 }
 0x5bf   : > { %v6107_v5 = vpop.f32.mrb[20].mxu1 }
 0x5c0   : > { %v1808_v42 = vpop.f32.mrb[21].mxu1  ;;  %v1873_v44 = vmul.f32 0.35355338, %v6107_v5 }
 0x5c1   : > { %v1871_v45 = vmul.f32 0.35355338, %v1808_v42  ;;  %v6108_v48 = vpop.f32.mrb[22].mxu1 }
 0x5c2   : > { %v1811_v51 = vpop.f32.mrb[23].mxu1  ;;  %v7746_v24 = vadd.f32 %v7733_v54, %v1873_v44  ;;  %v1874_v35 = vmul.f32 0.35355338, %v6108_v48 }
 0x5c3   : > { %v7736_v43 = vadd.f32 %v7733_v54, %v1871_v45  ;;  %v1872_v1 = vmul.f32 0.35355338, %v1811_v51  ;;  %v1722_v16 = vpop.f32.mrb[28].mxu0 }
 0x5c4   : > { %v7738_v2 = vpack.c.bf16 %v1722_v16, %v1347_v34  ;;  %v6101_v19 = vpop.f32.mrb[29].mxu0  ;;  %v7768_v26 = vadd.f32 %v7733_v54, %v1874_v35 }
 0x5c5   : > { %v7741_v53 = vadd.f32 %v7733_v54, %v1872_v1  ;;  %v1725_v50 = vpop.f32.mrb[30].mxu0  ;;  %1903 = vmax.xlane.f32.xlu0 %v7736_v43 }
 0x5c6   : > { %v6102_v31 = vpop.f32.mrb[31].mxu0 }
 0x5c7   : > { %1905 = vmax.xlane.f32.xlu1 %v7741_v53  ;;  %v6111_v49 = vpop.f32.mrb[24].mxu1 }
 0x5c8   : > { %v1824_v57 = vpop.f32.mrb[25].mxu1  ;;  %v1877_v59 = vmul.f32 0.35355338, %v6111_v49 }
 0x5c9   : > { %v6112_v37 = vpop.f32.mrb[26].mxu1  ;;  %v1875_v10 = vmul.f32 0.35355338, %v1824_v57 }
 0x5ca   : > { %v1827_v62 = vpop.f32.mrb[27].mxu1  ;;  %v7778_v18 = vadd.f32 %v7733_v54, %v1877_v59  ;;  %v1878_v51 = vmul.f32 0.35355338, %v6112_v37 }
 0x5cb   : > { %v6145_v8 = vpop.f32.mrb[32].mxu0  ;;  %1907 = vmax.xlane.f32.xlu1 %v7746_v24  ;;  %v7760_v63 = vadd.f32 %v7733_v54, %v1875_v10  ;;  %v1876_v25 = vmul.f32 0.35355338, %v1827_v62 }
 0x5cc   : > { %v2240_v11 = vmul.f32 0.35355338, %v6145_v8  ;;  %v2175_v29 = vpop.f32.mrb[33].mxu0  ;;  %v7802_v57 = vadd.f32 %v7733_v54, %v1878_v51 }
 0x5cd   : > { %v2238_v20 = vmul.f32 0.35355338, %v2175_v29  ;;  %v6146_v28 = vpop.f32.mrb[34].mxu0  ;;  %v7786_v5 = vadd.f32 %v7733_v54, %v1876_v25 }
 0x5ce   : > { %v7750_v0 = vadd.f32 %v7733_v54, %v2240_v11  ;;  %v2178_v58 = vpop.f32.mrb[35].mxu0  ;;  %v2241_v14 = vmul.f32 0.35355338, %v6146_v28 }
 0x5cf   : > { %v7753_v17 = vadd.f32 %v7733_v54, %v2238_v20  ;;  %v2239_v52 = vmul.f32 0.35355338, %v2178_v58  ;;  %v6115_v21 = vpop.f32.mrb[28].mxu1 }
 0x5d0   : > { %2274 = vmax.xlane.f32.xlu1 %v7750_v0  ;;  %v1840_v33 = vpop.f32.mrb[29].mxu1  ;;  %v7781_v39 = vadd.f32 %v7733_v54, %v2241_v14  ;;  %v1881_v62 = vmul.f32 0.35355338, %v6115_v21 }
 0x5d1   : > { %2270 = vmax.xlane.f32.xlu0 %v7753_v17  ;;  %v7757_v36 = vpop.f32.mrb[30].mxu1  ;;  %v7763_v4 = vadd.f32 %v7733_v54, %v2239_v52  ;;  %v1879_v42 = vmul.f32 0.35355338, %v1840_v33 }
 0x5d2   : > { %v1843_v22 = vpop.f32.mrb[31].mxu1  ;;  %v7810_v11 = vadd.f32 %v7733_v54, %v1881_v62  ;;  %v1882_v33 = vmul.f32 0.35355338, %v7757_v36 }
 0x5d3   : > { %v6149_v41 = vpop.f32.mrb[36].mxu0  ;;  %v7794_v1 = vadd.f32 %v7733_v54, %v1879_v42  ;;  %v1880_v29 = vmul.f32 0.35355338, %v1843_v22 }
 0x5d4   : > { %v2191_v12 = vpop.f32.mrb[37].mxu0  ;;  %1911 = vmax.xlane.f32.xlu1 %v7760_v63  ;;  %v2244_v27 = vmul.f32 0.35355338, %v6149_v41 }
 0x5d5   : > { %v2242_v56 = vmul.f32 0.35355338, %v2191_v12  ;;  %v6150_v15 = vpop.f32.mrb[38].mxu0  ;;  %2272 = vmax.xlane.f32.xlu0 %v7763_v4  ;;  %v7818_v10 = vadd.f32 %v7733_v54, %v1880_v29  ;;  %v7835_v12 = vadd.f32 %v7733_v54, %v1882_v33 }
 0x5d6   : > { %v2194_v55 = vpop.f32.mrb[39].mxu0  ;;  %v7789_v45 = vadd.f32 %v7733_v54, %v2244_v27  ;;  %v2245_v37 = vmul.f32 0.35355338, %v6150_v15 }
 0x5d7   : > { %v7771_v40 = vadd.f32 %v7733_v54, %v2242_v56  ;;  %v6119_v9 = vpop.f32.mrb[32].mxu1  ;;  %v2243_v48 = vmul.f32 0.35355338, %v2194_v55 }
 0x5d8   : > { %v1856_v47 = vpop.f32.mrb[33].mxu1  ;;  %v7813_v20 = vadd.f32 %v7733_v54, %v2245_v37  ;;  %v1885_v56 = vmul.f32 0.35355338, %v6119_v9 }
 0x5d9   : > { %1909 = vmax.xlane.f32.xlu0 %v7768_v26  ;;  %2278 = vmax.xlane.f32.xlu1 %v7771_v40  ;;  %v7775_v32 = vpop.f32.mrb[34].mxu1  ;;  %v7797_v16 = vadd.f32 %v7733_v54, %v2243_v48  ;;  %v1883_v58 = vmul.f32 0.35355338, %v1856_v47 }
 0x5da   : > { %v1859_v38 = vpop.f32.mrb[35].mxu1  ;;  %v7843_v36 = vadd.f32 %v7733_v54, %v1885_v56 }
 0x5db   : > { %v6153_v34 = vpop.f32.mrb[40].mxu0  ;;  %v7827_v22 = vadd.f32 %v7733_v54, %v1883_v58  ;;  %v1884_v59 = vmul.f32 0.35355338, %v1859_v38  ;;  %v1886_v38 = vmul.f32 0.35355338, %v7775_v32 }
 0x5dc   : > { %v2207_v30 = vpop.f32.mrb[41].mxu0  ;;  %v2248_v28 = vmul.f32 0.35355338, %v6153_v34 }
 0x5dd   : > { %v6154_v46 = vpop.f32.mrb[42].mxu0  ;;  %2276 = vmax.xlane.f32.xlu0 %v7781_v39  ;;  %1915 = vmax.xlane.f32.xlu1 %v7778_v18  ;;  %v2246_v19 = vmul.f32 0.35355338, %v2207_v30  ;;  %v7851_v9 = vadd.f32 %v7733_v54, %v1884_v59  ;;  %v7864_v30 = vadd.f32 %v7733_v54, %v1886_v38 }
 0x5de   : > { %v2210_v23 = vpop.f32.mrb[43].mxu0  ;;  %v7821_v52 = vadd.f32 %v7733_v54, %v2248_v28  ;;  %v2249_v15 = vmul.f32 0.35355338, %v6154_v46 }
 0x5df   : > { %v7805_v8 = vadd.f32 %v7733_v54, %v2246_v19  ;;  %v2247_v21 = vmul.f32 0.35355338, %v2210_v23 }
 0x5e0   : > { %v7846_v14 = vadd.f32 %v7733_v54, %v2249_v15 }
 0x5e1   : > { %2282 = vmax.xlane.f32.xlu1 %v7789_v45  ;;  %1913 = vmax.xlane.f32.xlu0 %v7786_v5  ;;  %v7830_v35 = vadd.f32 %v7733_v54, %v2247_v21 }
 0x5e3   : > { %v6157_v44 = vpop.f32.mrb[44].mxu0 }
 0x5e4   : > { %v2223_v50 = vpop.f32.mrb[45].mxu0  ;;  %v2252_v47 = vmul.f32 0.35355338, %v6157_v44 }
 0x5e5   : > { %v6158_v31 = vpop.f32.mrb[46].mxu0  ;;  %2280 = vmax.xlane.f32.xlu0 %v7797_v16  ;;  %1919 = vmax.xlane.f32.xlu1 %v7794_v1  ;;  %v2250_v41 = vmul.f32 0.35355338, %v2223_v50 }
 0x5e6   : > { %v2226_v49 = vpop.f32.mrb[47].mxu0  ;;  %v7854_v25 = vadd.f32 %v7733_v54, %v2252_v47  ;;  %v2253_v46 = vmul.f32 0.35355338, %v6158_v31 }
 0x5e7   : > { %v7838_v55 = vadd.f32 %v7733_v54, %v2250_v41  ;;  %v2251_v27 = vmul.f32 0.35355338, %v2226_v49 }
 0x5e8   : > { %v7868_v23 = vadd.f32 %v7733_v54, %v2253_v46 }
 0x5e9   : > { %1917 = vmax.xlane.f32.xlu0 %v7802_v57  ;;  %2286 = vmax.xlane.f32.xlu1 %v7805_v8  ;;  %v7860_v34 = vadd.f32 %v7733_v54, %v2251_v27 }
 0x5ed   : > { %2284 = vmax.xlane.f32.xlu0 %v7813_v20  ;;  %1923 = vmax.xlane.f32.xlu1 %v7810_v11 }
 0x5f1   : > { %2290 = vmax.xlane.f32.xlu1 %v7821_v52  ;;  %1921 = vmax.xlane.f32.xlu0 %v7818_v10 }
 0x5f5   : > { %2288 = vmax.xlane.f32.xlu0 %v7830_v35  ;;  %1927 = vmax.xlane.f32.xlu1 %v7827_v22 }
 0x5f9   : > { %1925 = vmax.xlane.f32.xlu0 %v7835_v12  ;;  %2294 = vmax.xlane.f32.xlu1 %v7838_v55 }
 0x5fd   : > { %2292 = vmax.xlane.f32.xlu0 %v7846_v14  ;;  %1931 = vmax.xlane.f32.xlu1 %v7843_v36 }
 0x601   : > { %2298 = vmax.xlane.f32.xlu1 %v7854_v25  ;;  %1929 = vmax.xlane.f32.xlu0 %v7851_v9 }
 0x605   : > { %2296 = vmax.xlane.f32.xlu0 %v7860_v34 }
 0x609   : > { %1933 = vmax.xlane.f32.xlu0 %v7864_v30 }
 0x60d   : > { %2300 = vmax.xlane.f32.xlu0 %v7868_v23 }
 0x652   : > { %v1904_v48 = vpop.xlane.xlu0 %1903 }
 0x653   : > { %v1935_v32 = vsub.f32 %v7736_v43, %v1904_v48 }
 0x654   : > { %v1906_v42 = vpop.xlane.xlu1 %1905 }
 0x655   : > { %v1951_v50 = vmul.f32 1.442695, %v1935_v32  ;;  %v1936_v56 = vsub.f32 %v7741_v53, %v1906_v42 }
 0x658   : > { %v1908_v51 = vpop.xlane.xlu1 %1907 }
 0x659   : > { %v1937_v19 = vsub.f32 %v7746_v24, %v1908_v51 }
 0x65b   : > { %v1955_v44 = vmul.f32 1.442695, %v1937_v19 }
 0x65d   : > { %6611 = vpow2.f32 %v1955_v44  ;;  %v2275_v49 = vpop.xlane.xlu1 %2274 }
 0x65e   : > { %v2304_v31 = vsub.f32 %v7750_v0, %v2275_v49  ;;  %v2271_v62 = vpop.xlane.xlu0 %2270  ;;  %6613 = vpow2.f32 %v1951_v50 }
 0x65f   : > { %v2302_v54 = vsub.f32 %v7753_v17, %v2271_v62 }
 0x660   : > { %v2322_v37 = vmul.f32 1.442695, %v2304_v31 }
 0x661   : > { %v1912_v29 = vpop.xlane.xlu1 %1911  ;;  %v2318_v58 = vmul.f32 1.442695, %v2302_v54 }
 0x662   : > { %v2273_v28 = vpop.xlane.xlu0 %2272  ;;  %6615 = vpow2.f32 %v2322_v37  ;;  %v1939_v21 = vsub.f32 %v7760_v63, %v1912_v29  ;;  %v1953_v63 = vmul.f32 1.442695, %v1936_v56 }
 0x663   : > { %6617 = vpow2.f32 %v2318_v58  ;;  %v2303_v38 = vsub.f32 %v7763_v4, %v2273_v28 }
 0x664   : > { %v1959_v0 = vmul.f32 1.442695, %v1939_v21 }
 0x665   : > { %v2320_v51 = vmul.f32 1.442695, %v2303_v38 }
 0x666   : > { %v2279_v43 = vpop.xlane.xlu1 %2278  ;;  %v1910_v33 = vpop.xlane.xlu0 %1909 }
 0x667   : > { %v7876_v24 = vpop.eup %6611  ;;  %v1938_v41 = vsub.f32 %v7768_v26, %v1910_v33 }
 0x668   : > { %1987 = vadd.xlane.f32.xlu1 %v7876_v24  ;;  %v7881_v47 = vpop.eup %6613 }
 0x669   : > { %v1957_v15 = vmul.f32 1.442695, %v1938_v41 }
 0x66a   : > { %v1916_v17 = vpop.xlane.xlu1 %1915  ;;  %v2277_v59 = vpop.xlane.xlu0 %2276 }
 0x66b   : > { %v1941_v27 = vsub.f32 %v7778_v18, %v1916_v17  ;;  %6619 = vpow2.f32 %v1957_v15  ;;  %v2305_v32 = vsub.f32 %v7781_v39, %v2277_v59  ;;  %v2306_v18 = vsub.f32 %v7771_v40, %v2279_v43 }
 0x66c   : > { %1983 = vadd.xlane.f32.xlu1 %v7881_v47  ;;  %6621 = vpow2.f32 %v1959_v0  ;;  %v7886_v42 = vpop.eup %6615 }
 0x66d   : > { %v1963_v26 = vmul.f32 1.442695, %v1941_v27  ;;  %6623 = vpow2.f32 %v1953_v63  ;;  %v7892_v50 = vpop.eup %6617  ;;  %v2324_v49 = vmul.f32 1.442695, %v2305_v32 }
 0x66e   : > { %v2283_v53 = vpop.xlane.xlu1 %2282  ;;  %v1914_v46 = vpop.xlane.xlu0 %1913 }
 0x66f   : > { %v2308_v48 = vsub.f32 %v7789_v45, %v2283_v53  ;;  %6625 = vpow2.f32 %v1963_v26  ;;  %v1940_v31 = vsub.f32 %v7786_v5, %v1914_v46  ;;  %v2326_v45 = vmul.f32 1.442695, %v2306_v18 }
 0x670   : > { %2354 = vadd.xlane.f32.xlu1 %v7886_v42  ;;  %6627 = vpow2.f32 %v2320_v51 }
 0x671   : > { %v2330_v4 = vmul.f32 1.442695, %v2308_v48  ;;  %v1961_v29 = vmul.f32 1.442695, %v1940_v31 }
 0x672   : > { %v1920_v19 = vpop.xlane.xlu1 %1919  ;;  %v2281_v44 = vpop.xlane.xlu0 %2280 }
 0x673   : > { %6629 = vpow2.f32 %v2330_v4  ;;  %v1943_v39 = vsub.f32 %v7794_v1, %v1920_v19  ;;  %v2307_v41 = vsub.f32 %v7797_v16, %v2281_v44 }
 0x674   : > { %2350 = vadd.xlane.f32.xlu1 %v7892_v50  ;;  %6631 = vpow2.f32 %v2324_v49 }
 0x675   : > { %v7897_v62 = vpop.eup %6619  ;;  %6633 = vpow2.f32 %v2326_v45  ;;  %v1967_v5 = vmul.f32 1.442695, %v1943_v39 }
 0x676   : > { %v2287_v37 = vpop.xlane.xlu1 %2286  ;;  %v1918_v40 = vpop.xlane.xlu0 %1917  ;;  %1989 = vadd.xlane.f32.xlu0 %v7897_v62  ;;  %6635 = vpow2.f32 %v1961_v29 }
 0x677   : > { %v7899_v54 = vpop.eup %6621  ;;  %v1942_v28 = vsub.f32 %v7802_v57, %v1918_v40  ;;  %6637 = vpow2.f32 %v1967_v5  ;;  %v2310_v16 = vsub.f32 %v7805_v8, %v2287_v37 }
 0x678   : > { %1991 = vadd.xlane.f32.xlu1 %v7899_v54  ;;  %v7904_v58 = vpop.eup %6623 }
 0x679   : > { %v7906_v43 = vpop.eup %6625  ;;  %v1965_v56 = vmul.f32 1.442695, %v1942_v28 }
 0x67a   : > { %v1924_v21 = vpop.xlane.xlu1 %1923  ;;  %v2285_v1 = vpop.xlane.xlu0 %2284  ;;  %1985 = vadd.xlane.f32.xlu0 %v7904_v58 }
 0x67b   : > { %v1945_v33 = vsub.f32 %v7810_v11, %v1924_v21  ;;  %v7912_v0 = vpop.eup %6627  ;;  %v2328_v11 = vmul.f32 1.442695, %v2307_v41  ;;  %6639 = vpow2.f32 %v1965_v56  ;;  %v2309_v63 = vsub.f32 %v7813_v20, %v2285_v1 }
 0x67c   : > { %1995 = vadd.xlane.f32.xlu1 %v7906_v43  ;;  %v2334_v20 = vmul.f32 1.442695, %v2310_v16 }
 0x67d   : > { %v1971_v57 = vmul.f32 1.442695, %v1945_v33  ;;  %v7914_v59 = vpop.eup %6629 }
 0x67e   : > { %v2291_v15 = vpop.xlane.xlu1 %2290  ;;  %v1922_v17 = vpop.xlane.xlu0 %1921  ;;  %2352 = vadd.xlane.f32.xlu0 %v7912_v0 }
 0x67f   : > { %v2312_v27 = vsub.f32 %v7821_v52, %v2291_v15  ;;  %6641 = vpow2.f32 %v1971_v57  ;;  %v7921_v26 = vpop.eup %6631  ;;  %v2332_v52 = vmul.f32 1.442695, %v2309_v63  ;;  %v1944_v51 = vsub.f32 %v7818_v10, %v1922_v17 }
 0x680   : > { %2362 = vadd.xlane.f32.xlu1 %v7914_v59  ;;  %v7923_v48 = vpop.eup %6633  ;;  %6643 = vpow2.f32 %v2328_v11 }
 0x681   : > { %v2338_v38 = vmul.f32 1.442695, %v2312_v27  ;;  %v7929_v32 = vpop.eup %6635  ;;  %v1969_v44 = vmul.f32 1.442695, %v1944_v51 }
 0x682   : > { %v1928_v53 = vpop.xlane.xlu1 %1927  ;;  %v2289_v46 = vpop.xlane.xlu0 %2288  ;;  %2356 = vadd.xlane.f32.xlu0 %v7921_v26 }
 0x683   : > { %6645 = vpow2.f32 %v2338_v38  ;;  %v1947_v8 = vsub.f32 %v7827_v22, %v1928_v53  ;;  %v7931_v19 = vpop.eup %6637  ;;  %v2311_v40 = vsub.f32 %v7830_v35, %v2289_v46 }
 0x684   : > { %2358 = vadd.xlane.f32.xlu1 %v7923_v48  ;;  %6647 = vpow2.f32 %v2332_v52 }
 0x685   : > { %6649 = vpow2.f32 %v2334_v20  ;;  %v1975_v10 = vmul.f32 1.442695, %v1947_v8  ;;  %v7936_v31 = vpop.eup %6639 }
 0x686   : > { %v2295_v18 = vpop.xlane.xlu1 %2294  ;;  %v1926_v4 = vpop.xlane.xlu0 %1925  ;;  %1993 = vadd.xlane.f32.xlu0 %v7929_v32  ;;  %6651 = vpow2.f32 %v1969_v44 }
 0x687   : > { %v1946_v49 = vsub.f32 %v7835_v12, %v1926_v4  ;;  %6653 = vpow2.f32 %v1975_v10  ;;  %v2314_v35 = vsub.f32 %v7838_v55, %v2295_v18 }
 0x688   : > { %1999 = vadd.xlane.f32.xlu1 %v7931_v19 }
 0x689   : > { %v7938_v39 = vpop.eup %6641  ;;  %v1973_v29 = vmul.f32 1.442695, %v1946_v49 }
 0x68a   : > { %v1932_v45 = vpop.xlane.xlu1 %1931  ;;  %v2293_v22 = vpop.xlane.xlu0 %2292  ;;  %1997 = vadd.xlane.f32.xlu0 %v7936_v31 }
 0x68b   : > { %v1949_v37 = vsub.f32 %v7843_v36, %v1932_v45  ;;  %v7944_v28 = vpop.eup %6643  ;;  %v2336_v36 = vmul.f32 1.442695, %v2311_v40  ;;  %6655 = vpow2.f32 %v1973_v29  ;;  %v2313_v41 = vsub.f32 %v7846_v14, %v2293_v22  ;;  %v763_v22 = vld [vmem:[%s9318_s5 + $0x50] sm:$0xff]  ;;  %v2474_v40 = vld [vmem:[%s9320_s7 + $0x8] sm:$0xff]  ;;  %v2476_v29 = vld [vmem:[%s9320_s7 + $0x18] sm:$0xff] }
 0x68c   : > { %2003 = vadd.xlane.f32.xlu1 %v7938_v39  ;;  %v2342_v14 = vmul.f32 1.442695, %v2314_v35  ;;  %v2573_v35 = vld [vmem:[%s9322_s9 + $0x18] sm:$0xff] }
 0x68d   : > { %v1979_v12 = vmul.f32 1.442695, %v1949_v37  ;;  %v7946_v1 = vpop.eup %6645  ;;  %v2473_v37 = vld [vmem:[%s9320_s7] sm:$0xff] }
 0x68e   : > { %v2299_v5 = vpop.xlane.xlu1 %2298  ;;  %v1930_v21 = vpop.xlane.xlu0 %1929  ;;  %2360 = vadd.xlane.f32.xlu0 %v7944_v28 }
 0x68f   : > { %v2316_v33 = vsub.f32 %v7854_v25, %v2299_v5  ;;  %6657 = vpow2.f32 %v1979_v12  ;;  %v7953_v57 = vpop.eup %6647  ;;  %v2340_v25 = vmul.f32 1.442695, %v2313_v41  ;;  %v1948_v27 = vsub.f32 %v7851_v9, %v1930_v21  ;;  %v2567_v12 = vld [vmem:[%s9321_s8 + $0x8] sm:$0xff]  ;;  %v764_v5 = vld [vmem:[%s9318_s5 + $0x58] sm:$0xff]  ;;  %v2566_v41 = vld [vmem:[%s9321_s8] sm:$0xff] }
 0x690   : > { %2370 = vadd.xlane.f32.xlu1 %v7946_v1  ;;  %v7955_v17 = vpop.eup %6649  ;;  %6659 = vpow2.f32 %v2336_v36  ;;  %v2571_v21 = vld [vmem:[%s9322_s9 + $0x8] sm:$0xff]  ;;  %v2569_v36 = vld [vmem:[%s9321_s8 + $0x18] sm:$0xff] }
 0x691   : > { %v2346_v56 = vmul.f32 1.442695, %v2316_v33  ;;  %v7960_v11 = vpop.eup %6651  ;;  %v1977_v16 = vmul.f32 1.442695, %v1948_v27  ;;  %v2475_v33 = vld [vmem:[%s9320_s7 + $0x10] sm:$0xff]  ;;  %v2669_v27 = vld [vmem:[%s9324_s11 + $0x18] sm:$0xff] }
 0x692   : > { %v2297_v15 = vpop.xlane.xlu0 %2296  ;;  %2364 = vadd.xlane.f32.xlu0 %v7953_v57  ;;  %v7962_v63 = vpop.eup %6653 }
 0x693   : > { %6661 = vpow2.f32 %v2346_v56  ;;  %v2315_v46 = vsub.f32 %v7860_v34, %v2297_v15  ;;  %v2570_v56 = vld [vmem:[%s9322_s9] sm:$0xff]  ;;  %v2667_v15 = vld [vmem:[%s9324_s11 + $0x8] sm:$0xff] }
 0x694   : > { %2366 = vadd.xlane.f32.xlu1 %v7955_v17  ;;  %6663 = vpow2.f32 %v2340_v25  ;;  %v2568_v25 = vld [vmem:[%s9321_s8 + $0x10] sm:$0xff] }
 0x695   : > { %6665 = vpow2.f32 %v2342_v14  ;;  %v7967_v53 = vpop.eup %6655  ;;  %v2572_v14 = vld [vmem:[%s9322_s9 + $0x10] sm:$0xff] }
 0x696   : > { %v1934_v55 = vpop.xlane.xlu0 %1933  ;;  %2001 = vadd.xlane.f32.xlu0 %v7960_v11  ;;  %6667 = vpow2.f32 %v1977_v16  ;;  %v2666_v16 = vld [vmem:[%s9324_s11] sm:$0xff] }
 0x697   : > { %v1950_v38 = vsub.f32 %v7864_v30, %v1934_v55  ;;  %v2344_v30 = vmul.f32 1.442695, %v2315_v46  ;;  %v2671_v55 = vld [vmem:[%s9324_s11 + $0x28] sm:$0xff]  ;;  %v2668_v46 = vld [vmem:[%s9324_s11 + $0x10] sm:$0xff] }
 0x698   : > { %2007 = vadd.xlane.f32.xlu1 %v7962_v63 }
 0x699   : > { %v7969_v9 = vpop.eup %6657  ;;  %v1981_v52 = vmul.f32 1.442695, %v1950_v38  ;;  %v2673_v38 = vld [vmem:[%s9324_s11 + $0x38] sm:$0xff] }
 0x69a   : > { %2005 = vadd.xlane.f32.xlu0 %v7967_v53  ;;  %v2301_v51 = vpop.xlane.xlu0 %2300  ;;  %v7974_v20 = vpop.eup %6659 }
 0x69b   : > { %6669 = vpow2.f32 %v1981_v52  ;;  %v2317_v18 = vsub.f32 %v7868_v23, %v2301_v51  ;;  %v2892_v52 = vld [vmem:[%s9326_s13 + $0x8] sm:$0xff]  ;;  %v2670_v51 = vld [vmem:[%s9324_s11 + $0x20] sm:$0xff] }
 0x69c   : > { %2011 = vadd.xlane.f32.xlu1 %v7969_v9  ;;  %6671 = vpow2.f32 %v2344_v30  ;;  %v2894_v30 = vld [vmem:[%s9326_s13 + $0x18] sm:$0xff] }
 0x69d   : > { %v7976_v8 = vpop.eup %6661  ;;  %v2348_v34 = vmul.f32 1.442695, %v2317_v18  ;;  %v2672_v18 = vld [vmem:[%s9324_s11 + $0x30] sm:$0xff] }
 0x69e   : > { %2368 = vadd.xlane.f32.xlu0 %v7974_v20  ;;  %v7981_v4 = vpop.eup %6663 }
 0x69f   : > { %v7983_v44 = vpop.eup %6665  ;;  %6673 = vpow2.f32 %v2348_v34  ;;  %v2986_v34 = vld [vmem:[%s9327_s14 + $0x8] sm:$0xff] }
 0x6a0   : > { %2378 = vadd.xlane.f32.xlu1 %v7976_v8  ;;  %v7987_v49 = vpop.eup %6667 }
 0x6a2   : > { %2372 = vadd.xlane.f32.xlu0 %v7981_v4 }
 0x6a4   : > { %2374 = vadd.xlane.f32.xlu1 %v7983_v44 }
 0x6a5   : > { %v7990_v10 = vpop.eup %6669 }
 0x6a6   : > { %2009 = vadd.xlane.f32.xlu0 %v7987_v49  ;;  %v7993_v23 = vpop.eup %6671 }
 0x6a9   : > { %v7996_v45 = vpop.eup %6673 }
 0x6aa   : > { %2013 = vadd.xlane.f32.xlu0 %v7990_v10 }
 0x6ae   : > { %2376 = vadd.xlane.f32.xlu0 %v7993_v23 }
 0x6b2   : > { %2380 = vadd.xlane.f32.xlu0 %v7996_v45 }
 0x6b5   : > { %817 = vperm.xlu1 %6450, %v763_v22   ;;  %v2891_v22 = vld [vmem:[%s9326_s13] sm:$0xff] }
 0x6b9   : > { %2479 = vperm.xlu1 %6450, %v2473_v37   ;;  %v2990_v37 = vld [vmem:[%s9328_s15 + $0x8] sm:$0xff] }
 0x6bd   : > { %2484 = vperm.xlu1 %6450, %v2474_v40   ;;  %v2893_v40 = vld [vmem:[%s9326_s13 + $0x10] sm:$0xff] }
 0x6c1   : > { %2494 = vperm.xlu1 %6450, %v2476_v29   ;;  %v2988_v29 = vld [vmem:[%s9327_s14 + $0x18] sm:$0xff] }
 0x6c5   : > { %2615 = vperm.xlu1 %6450, %v2567_v12  }
 0x6c8   : > { %822 = vperm.xlu0 %6449, %v764_v5   ;;  %v2985_v5 = vld [vmem:[%s9327_s14] sm:$0xff] }
 0x6c9   : > { %2639 = vperm.xlu1 %6450, %v2571_v21   ;;  %v2992_v21 = vld [vmem:[%s9328_s15 + $0x18] sm:$0xff] }
 0x6cc   : > { %2489 = vperm.xlu0 %6449, %v2475_v33  }
 0x6cd   : > { %2625 = vperm.xlu1 %6450, %v2569_v36   ;;  %v2989_v36 = vld [vmem:[%s9328_s15] sm:$0xff] }
 0x6d0   : > { %2610 = vperm.xlu0 %6449, %v2566_v41   ;;  %v5685_v41 = vld [vmem:[%s9318_s5 + $0x68] sm:$0xff] }
 0x6d1   : > { %2649 = vperm.xlu1 %6450, %v2573_v35  }
 0x6d4   : > { %2634 = vperm.xlu0 %6449, %v2570_v56   ;;  %v2987_v56 = vld [vmem:[%s9327_s14 + $0x10] sm:$0xff] }
 0x6d5   : > { %2681 = vperm.xlu1 %6450, %v2667_v15   ;;  %v5687_v15 = vld [vmem:[%s9318_s5 + $0x78] sm:$0xff] }
 0x6d8   : > { %2620 = vperm.xlu0 %6449, %v2568_v25  }
 0x6d9   : > { %2691 = vperm.xlu1 %6450, %v2669_v27   ;;  %v2991_v27 = vld [vmem:[%s9328_s15 + $0x10] sm:$0xff] }
 0x6dc   : > { %2644 = vperm.xlu0 %6449, %v2572_v14  }
 0x6dd   : > { %2701 = vperm.xlu1 %6450, %v2671_v55  }
 0x6e0   : > { %2676 = vperm.xlu0 %6449, %v2666_v16   ;;  %v5684_v16 = vld [vmem:[%s9318_s5 + $0x60] sm:$0xff] }
 0x6e1   : > { %2711 = vperm.xlu1 %6450, %v2673_v38  }
 0x6e4   : > { %2686 = vperm.xlu0 %6449, %v2668_v46  }
 0x6e5   : > { %2902 = vperm.xlu1 %6450, %v2892_v52   ;;  %v5686_v52 = vld [vmem:[%s9318_s5 + $0x70] sm:$0xff] }
 0x6e8   : > { %2696 = vperm.xlu0 %6449, %v2670_v51  }
 0x6e9   : > { %2912 = vperm.xlu1 %6450, %v2894_v30  }
 0x6ec   : > { %2706 = vperm.xlu0 %6449, %v2672_v18   ;;  %v5688_v18 = vld [vmem:[%s9318_s5 + $0x80] sm:$0xff] }
 0x6ed   : > { %3034 = vperm.xlu1 %6450, %v2986_v34  }
 0x6f0   : > { %2897 = vperm.xlu0 %6449, %v2891_v22  }
 0x6f1   : > { %3058 = vperm.xlu1 %6450, %v2990_v37  }
 0x6f4   : > { %2907 = vperm.xlu0 %6449, %v2893_v40   ;;  %v5689_v40 = vld [vmem:[%s9318_s5 + $0x88] sm:$0xff] }
 0x6f5   : > { %v1988_v12 = vpop.xlane.xlu1 %1987  ;;  %3044 = vperm.xlu1 %6450, %v2988_v29  }
 0x6f8   : > { %3029 = vperm.xlu0 %6449, %v2985_v5  }
 0x6f9   : > { %v1984_v33 = vpop.xlane.xlu1 %1983  ;;  %3068 = vperm.xlu1 %6450, %v2992_v21  }
 0x6fa   : > { %6675 = vrcp.f32 %v1984_v33 }
 0x6fc   : > { %3053 = vperm.xlu0 %6449, %v2989_v36  }
 0x6fd   : > { %v2355_v35 = vpop.xlane.xlu1 %2354  ;;  %3110 = vperm.xlu1 %6450, %v5685_v41  }
 0x700   : > { %3039 = vperm.xlu0 %6449, %v2987_v56  }
 0x701   : > { %3120 = vperm.xlu1 %6450, %v5687_v15   ;;  %v2351_v25 = vpop.xlane.xlu1 %2350 }
 0x703   : > { %v1990_v14 = vpop.xlane.xlu0 %1989 }
 0x704   : > { %3063 = vperm.xlu0 %6449, %v2991_v27   ;;  %v6676_v22 = vpop.eup %6675 }
 0x705   : > { %v1992_v55 = vpop.xlane.xlu1 %1991  ;;  %v2031_v21 = vmul.f32 %v6676_v22, %v7881_v47 }
 0x707   : > { %v1986_v38 = vpop.xlane.xlu0 %1985 }
 0x708   : > { %6677 = vrcp.f32 %v1986_v38  ;;  %3105 = vperm.xlu0 %6449, %v5684_v16  }
 0x709   : > { %v1996_v46 = vpop.xlane.xlu1 %1995  ;;  %6679 = vrcp.f32 %v2351_v25 }
 0x70a   : > { %6681 = vrcp.f32 %v1990_v14 }
 0x70b   : > { %v2353_v51 = vpop.xlane.xlu0 %2352 }
 0x70c   : > { %6683 = vrcp.f32 %v2353_v51  ;;  %3115 = vperm.xlu0 %6449, %v5686_v52  }
 0x70d   : > { %v2363_v30 = vpop.xlane.xlu1 %2362  ;;  %6685 = vrcp.f32 %v1988_v12 }
 0x70f   : > { %v2357_v34 = vpop.xlane.xlu0 %2356 }
 0x710   : > { %6687 = vrcp.f32 %v2357_v34  ;;  %3125 = vperm.xlu0 %6449, %v5688_v18  }
 0x711   : > { %v2359_v37 = vpop.xlane.xlu1 %2358  ;;  %6689 = vrcp.f32 %v2355_v35 }
 0x712   : > { %v6678_v29 = vpop.eup %6677 }
 0x713   : > { %v1994_v5 = vpop.xlane.xlu0 %1993  ;;  %v2032_v33 = vmul.f32 %v6678_v29, %v7904_v58  ;;  %v6680_v36 = vpop.eup %6679 }
 0x714   : > { %6691 = vrcp.f32 %v1994_v5  ;;  %3130 = vperm.xlu0 %6449, %v5689_v40   ;;  %v6682_v41 = vpop.eup %6681  ;;  %v2398_v27 = vmul.f32 %v6680_v36, %v7892_v50 }
 0x715   : > { %v2000_v12 = vpop.xlane.xlu1 %1999  ;;  %v2047_v56 = vpack.c.bf16 %v2032_v33, %v2031_v21  ;;  %6693 = vrcp.f32 %v1992_v55  ;;  %v2034_v58 = vmul.f32 %v6682_v41, %v7897_v62 }
 0x716   : > { %v6684_v15 = vpop.eup %6683  ;;  %6695 = vrcp.f32 %v2359_v37 }
 0x717   : > { %6122 = vmatpush3.bf16.xpose.msra.mxu1 %v2047_v56  ;;  %v1998_v25 = vpop.xlane.xlu0 %1997  ;;  %v2399_v14 = vmul.f32 %v6684_v15, %v7912_v0  ;;  %v6686_v35 = vpop.eup %6685 }
 0x718   : > { %6123 = vmatprep.subr.bf16.mxu1 %v9358_v13  ;;  %6697 = vrcp.f32 %v1998_v25  ;;  %v2033_v55 = vmul.f32 %v6686_v35, %v7876_v24 }
 0x719   : > { %v2004_v16 = vpop.xlane.xlu1 %2003  ;;  %v2414_v47 = vpack.c.bf16 %v2399_v14, %v2398_v27 }
 0x71a   : > { %v6688_v38 = vpop.eup %6687  ;;  %v2048_v50 = vpack.c.bf16 %v2034_v58, %v2033_v55 }
 0x71b   : > { %6160 = vmatpush3.bf16.xpose.msra.mxu0 %v2414_v47  ;;  %v2361_v52 = vpop.xlane.xlu0 %2360  ;;  %v6690_v51 = vpop.eup %6689  ;;  %v2401_v0 = vmul.f32 %v6688_v38, %v7921_v26 }
 0x71c   : > { %6699 = vrcp.f32 %v2361_v52  ;;  %6161 = vmatprep.subr.bf16.mxu0 %v9358_v13  ;;  %v2400_v62 = vmul.f32 %v6690_v51, %v7886_v42 }
 0x71d   : > { %v2371_v18 = vpop.xlane.xlu1 %2370  ;;  %6701 = vrcp.f32 %v1996_v46 }
 0x71e   : > { %v6692_v34 = vpop.eup %6691  ;;  %v2415_v24 = vpack.c.bf16 %v2401_v0, %v2400_v62 }
 0x71f   : > { %6124 = vmatpush3.bf16.xpose.msra.mxu1 %v2048_v50  ;;  %v2365_v22 = vpop.xlane.xlu0 %2364  ;;  %v6694_v37 = vpop.eup %6693  ;;  %v2036_v29 = vmul.f32 %v6692_v34, %v7929_v32 }
 0x720   : > { %6703 = vrcp.f32 %v2365_v22  ;;  %6125 = vmatprep.subr.bf16.mxu1 %v9358_v13  ;;  %v2035_v21 = vmul.f32 %v6694_v37, %v7899_v54  ;;  %v6696_v26 = vpop.eup %6695 }
 0x721   : > { %v2367_v40 = vpop.xlane.xlu1 %2366  ;;  %6705 = vrcp.f32 %v2363_v30  ;;  %v2402_v56 = vmul.f32 %v6696_v26, %v7923_v48 }
 0x722   : > { %v6698_v46 = vpop.eup %6697  ;;  %v2049_v42 = vpack.c.bf16 %v2036_v29, %v2035_v21 }
 0x723   : > { %6162 = vmatpush3.bf16.xpose.msra.mxu0 %v2415_v24  ;;  %v2002_v5 = vpop.xlane.xlu0 %2001  ;;  %v2038_v54 = vmul.f32 %v6698_v46, %v7936_v31 }
 0x724   : > { %6707 = vrcp.f32 %v2002_v5  ;;  %6163 = vmatprep.subr.bf16.mxu0 %v9358_v13 }
 0x725   : > { %v2008_v33 = vpop.xlane.xlu1 %2007  ;;  %6709 = vrcp.f32 %v2000_v12 }
 0x726   : > { %v6700_v36 = vpop.eup %6699  ;;  %6711 = vrcp.f32 %v2367_v40 }
 0x727   : > { %6126 = vmatpush3.bf16.xpose.msra.mxu1 %v2049_v42  ;;  %v2006_v41 = vpop.xlane.xlu0 %2005  ;;  %v2403_v32 = vmul.f32 %v6700_v36, %v7944_v28  ;;  %v6702_v30 = vpop.eup %6701 }
 0x728   : > { %6127 = vmatprep.subr.bf16.mxu1 %v9358_v13  ;;  %6713 = vrcp.f32 %v2006_v41  ;;  %v2037_v12 = vmul.f32 %v6702_v30, %v7906_v43 }
 0x729   : > { %v2416_v15 = vpack.c.bf16 %v2403_v32, %v2402_v56  ;;  %v2012_v27 = vpop.xlane.xlu1 %2011 }
 0x72a   : > { %v6704_v25 = vpop.eup %6703  ;;  %v2050_v48 = vpack.c.bf16 %v2038_v54, %v2037_v12 }
 0x72b   : > { %6164 = vmatpush3.bf16.xpose.msra.mxu0 %v2416_v15  ;;  %v2369_v14 = vpop.xlane.xlu0 %2368  ;;  %v6706_v35 = vpop.eup %6705  ;;  %v2405_v28 = vmul.f32 %v6704_v25, %v7953_v57 }
 0x72c   : > { %6715 = vrcp.f32 %v2369_v14  ;;  %6165 = vmatprep.subr.bf16.mxu0 %v9358_v13  ;;  %v2404_v31 = vmul.f32 %v6706_v35, %v7914_v59 }
 0x72d   : > { %6717 = vrcp.f32 %v2004_v16  ;;  %v2379_v52 = vpop.xlane.xlu1 %2378 }
 0x72e   : > { %v6708_v47 = vpop.eup %6707  ;;  %v2417_v55 = vpack.c.bf16 %v2405_v28, %v2404_v31 }
 0x72f   : > { %6128 = vmatpush3.bf16.xpose.msra.mxu1 %v2050_v48  ;;  %v2373_v58 = vpop.xlane.xlu0 %2372  ;;  %v6710_v38 = vpop.eup %6709  ;;  %v2040_v43 = vmul.f32 %v6708_v47, %v7960_v11 }
 0x730   : > { %6719 = vrcp.f32 %v2373_v58  ;;  %6129 = vmatprep.subr.bf16.mxu1 %v9358_v13  ;;  %v2039_v50 = vmul.f32 %v6710_v38, %v7931_v19  ;;  %v6712_v57 = vpop.eup %6711 }
 0x731   : > { %6721 = vrcp.f32 %v2371_v18  ;;  %v2375_v34 = vpop.xlane.xlu1 %2374  ;;  %v2406_v62 = vmul.f32 %v6712_v57, %v7955_v17 }
 0x732   : > { %v6714_v16 = vpop.eup %6713  ;;  %v2051_v0 = vpack.c.bf16 %v2040_v43, %v2039_v50  ;;  %v6459_v43 = vld [vmem:[%s9323_s10] sm:$0xff]  }
 0x733   : > { %6166 = vmatpush3.bf16.xpose.msra.mxu0 %v2417_v55  ;;  %v2010_v51 = vpop.xlane.xlu0 %2009  ;;  %v2042_v19 = vmul.f32 %v6714_v16, %v7967_v53 }
 0x734   : > { %6723 = vrcp.f32 %v2010_v51  ;;  %6167 = vmatprep.subr.bf16.mxu0 %v9358_v13 }
 0x735   : > { %6725 = vrcp.f32 %v2008_v33 }
 0x736   : > { %v6716_v59 = vpop.eup %6715  ;;  %6727 = vrcp.f32 %v2375_v34 }
 0x737   : > { %6130 = vmatpush3.bf16.xpose.msra.mxu1 %v2051_v0  ;;  %v2014_v22 = vpop.xlane.xlu0 %2013  ;;  %v2407_v11 = vmul.f32 %v6716_v59, %v7974_v20  ;;  %v6718_v18 = vpop.eup %6717 }
 0x738   : > { %6131 = vmatprep.subr.bf16.mxu1 %v9358_v13  ;;  %6729 = vrcp.f32 %v2014_v22  ;;  %v2041_v29 = vmul.f32 %v6718_v18, %v7938_v39 }
 0x739   : > { %v2418_v37 = vpack.c.bf16 %v2407_v11, %v2406_v62 }
 0x73a   : > { %v6720_v40 = vpop.eup %6719  ;;  %v2052_v17 = vpack.c.bf16 %v2042_v19, %v2041_v29 }
 0x73b   : > { %6168 = vmatpush3.bf16.xpose.msra.mxu0 %v2418_v37  ;;  %v2377_v24 = vpop.xlane.xlu0 %2376  ;;  %v6722_v5 = vpop.eup %6721  ;;  %v2409_v20 = vmul.f32 %v6720_v40, %v7981_v4 }
 0x73c   : > { %6731 = vrcp.f32 %v2377_v24  ;;  %6169 = vmatprep.subr.bf16.mxu0 %v9358_v13  ;;  %v2408_v53 = vmul.f32 %v6722_v5, %v7946_v1  ;;  %v9359_v5 = vld [vmem:[#allocation4_spill] sm:$0xff] }
 0x73d   : > { %6733 = vrcp.f32 %v2012_v27  ;;  %v818_v27 = vpop.permute.xlu1 %817 }
 0x73e   : > { %v6724_v21 = vpop.eup %6723  ;;  %v2419_v33 = vpack.c.bf16 %v2409_v20, %v2408_v53 }
 0x73f   : > { %6132 = vmatpush3.bf16.xpose.msra.mxu1 %v2052_v17  ;;  %v2381_v26 = vpop.xlane.xlu0 %2380  ;;  %v6726_v46 = vpop.eup %6725  ;;  %v2044_v39 = vmul.f32 %v6724_v21, %v7987_v49 }
 0x740   : > { %6735 = vrcp.f32 %v2381_v26  ;;  %6133 = vmatprep.subr.bf16.mxu1 %v9358_v13  ;;  %v2043_v42 = vmul.f32 %v6726_v46, %v7962_v63  ;;  %v6728_v36 = vpop.eup %6727 }
 0x741   : > { %6737 = vrcp.f32 %v2379_v52  ;;  %v2410_v1 = vmul.f32 %v6728_v36, %v7983_v44  ;;  %v2480_v51 = vpop.permute.xlu1 %2479 }
 0x742   : > { %v6730_v4 = vpop.eup %6729  ;;  %v2053_v41 = vpack.c.bf16 %v2044_v39, %v2043_v42 }
 0x743   : > { %6170 = vmatpush3.bf16.xpose.msra.mxu0 %v2419_v33  ;;  %v2046_v49 = vmul.f32 %v6730_v4, %v7990_v10 }
 0x744   : > { %6171 = vmatprep.subr.bf16.mxu0 %v9358_v13 }
 0x745   : > { %v2485_v50 = vpop.permute.xlu1 %2484 }
 0x746   : > { %v6732_v56 = vpop.eup %6731 }
 0x747   : > { %6134 = vmatpush3.bf16.xpose.msra.mxu1 %v2053_v41  ;;  %v2411_v32 = vmul.f32 %v6732_v56, %v7993_v23  ;;  %v6734_v30 = vpop.eup %6733  ;;  %v949_v23 = vadd.f32 %v7317_v3, %v818_v27  ;;  %v823_v35 = vpop.permute.xlu0 %822 }
 0x748   : > { %6135 = vmatprep.subr.bf16.mxu1 %v9358_v13  ;;  %v2045_v63 = vmul.f32 %v6734_v30, %v7969_v9  ;;  %v952_v9 = vadd.f32 %v7321_v7, %v823_v35 }
 0x749   : > { %v2420_v15 = vpack.c.bf16 %v2411_v32, %v2410_v1  ;;  %v1730_v48 = vpack.c.bf16 %v949_v23, %v949_v23  ;;  %v2495_v18 = vpop.permute.xlu1 %2494 }
 0x74a   : > { %v6736_v54 = vpop.eup %6735  ;;  %v2054_v14 = vpack.c.bf16 %v2046_v49, %v2045_v63  ;;  %v2097_v28 = vpack.c.bf16 %v952_v9, %v952_v9 }
 0x74b   : > { %6172 = vmatpush3.bf16.xpose.msra.mxu0 %v2420_v15  ;;  %v6738_v25 = vpop.eup %6737  ;;  %v2413_v12 = vmul.f32 %v6736_v54, %v7996_v45  ;;  %v6457_v45 = vld [vmem:[%s9319_s6] sm:$0xff]   ;;  %v2490_v34 = vpop.permute.xlu0 %2489 }
 0x74c   : > { %6173 = vmatprep.subr.bf16.mxu0 %v9358_v13  ;;  %v2412_v44 = vmul.f32 %v6738_v25, %v7976_v8 }
 0x74e   : > { %v2421_v10 = vpack.c.bf16 %v2413_v12, %v2412_v44  ;;  %v2616_v44 = vpop.permute.xlu1 %2615 }
 0x74f   : > { %6136 = vmatpush3.bf16.xpose.msra.mxu1 %v2054_v14  ;;  %v2611_v23 = vpop.permute.xlu0 %2610 }
 0x750   : > { %6179 = vmatprep.subr.bf16.mxu1 %v7738_v2 }
 0x753   : > { %6174 = vmatpush3.bf16.xpose.msra.mxu0 %v2421_v10  ;;  %v2635_v9 = vpop.permute.xlu0 %2634 }
 0x756   : > { %6138 = vmatmul.mubr.bf16.vlgmr.msra.gmra.mrb[36].mxu1 %v1730_v48  ;;  %v2640_v48 = vpop.permute.xlu1 %2639 }
 0x757   : > { %6180 = vmatpush3.bf16.msra.mxu1 %v7738_v2  ;;  %6183 = vmatprep.mubr.msk.bf16.mxu1 %vm855_vm0, %v6457_v45  ;;  %v6458_v2 = vld [vmem:[%s9319_s6 + $0x8] sm:$0xff]   ;;  %v2621_v45 = vpop.permute.xlu0 %2620 }
 0x75a   : > { %6176 = vmatmul.mubr.bf16.vlgmr.msra.gmra.mrb[48].mxu0 %v2097_v28  ;;  %v2626_v28 = vpop.permute.xlu1 %2625 }
 0x829   : > { %v2089_v3 = vpop.f32.mrb[36].mxu1 }
 0x82a   : > { %v6139_v8 = vpop.f32.mrb[37].mxu1 }
 0x82b   : > { %v2092_v47 = vpop.f32.mrb[38].mxu1 }
 0x82c   : > { %v6140_v58 = vpop.f32.mrb[39].mxu1 }
 0x82d   : > { %v2456_v31 = vpop.f32.mrb[48].mxu0 }
 0x82e   : > { %v2472_v38 = vpack.c.bf16 %v2456_v31, %v2089_v3  ;;  %v6177_v52 = vpop.f32.mrb[49].mxu0 }
 0x82f   : > { %v2459_v55 = vpop.f32.mrb[50].mxu0 }
 0x830   : > { %v6178_v7 = vpop.f32.mrb[51].mxu0  ;;  %6181 = vmatprep.subr.bf16.mxu1 %v2472_v38 }
 0x831   : > { %6182 = vmatpush3.bf16.msra.mxu1 %v2472_v38 }
 0x834   : > { %6184 = vmatmul.mubr.msk.bf16.vlgmr.msra.gmra.mrb[40].mxu1 %vm855_vm0, %v6458_v2  ;;  %v2650_v2 = vpop.permute.xlu1 %2649 }
 0x835   : > { %6191 = vmatprep.mubr.msk.bf16.mxu1 %vm855_vm0, %v6459_v43  ;;  %v2645_v43 = vpop.permute.xlu0 %2644 }
 0x907   : > { %v6185_v57 = vpop.f32.mrb[40].mxu1 }
 0x908   : > { %v2547_v16 = vpop.f32.mrb[41].mxu1  ;;  %v2556_v62 = vadd.f32 %v6185_v57, %v2490_v34  ;;  %v6460_v34 = vld [vmem:[%s9323_s10 + $0x8] sm:$0xff]  }
 0x909   : > { %v2548_v0 = vadd.f32 %v2547_v16, %v2480_v51  ;;  %v6186_v59 = vpop.f32.mrb[42].mxu1 }
 0x90a   : > { %v2550_v22 = vpop.f32.mrb[43].mxu1  ;;  %v2559_v19 = vadd.f32 %v6186_v59, %v2495_v18  ;;  %v2564_v24 = vadd.f32 %v2556_v62, %v7233_v6  ;;  %v6462_v62 = vld [vmem:[%s9323_s10 + $0x18] sm:$0xff]   ;;  %v2677_v18 = vpop.permute.xlu0 %2676 }
 0x90b   : > { %v2551_v11 = vadd.f32 %v2550_v22, %v2485_v50  ;;  %v2562_v37 = vadd.f32 %v2548_v0, %v7225_v60  ;;  %v6461_v22 = vld [vmem:[%s9323_s10 + $0x10] sm:$0xff]  }
 0x90c   : > { %v2565_v17 = vadd.f32 %v2559_v19, %v9359_v5 }
 0x90d   : > { %v2563_v40 = vadd.f32 %v2551_v11, %v7227_v61  ;;  %v6463_v11 = vld [vmem:[%s9325_s12] sm:$0xff]  }
 0x90e   : > { %v2687_v19 = vpop.permute.xlu0 %2686 }
 0x90f   : > { %v2574_v29 = vadd.f32 %v2563_v40, %v2562_v37 }
 0x911   : > { %v2575_v20 = vadd.f32 %v2574_v29, %v2564_v24 }
 0x913   : > { %v2576_v21 = vadd.f32 %v2575_v20, %v2565_v17 }
 0x915   : > { %v2577_v26 = vrot.slane %v2576_v21, 4 }
 0x917   : > { %v2578_v53 = vadd.f32 %v2577_v26, %v2576_v21 }
 0x919   : > { %v2579_v46 = vrot.slane %v2578_v53, 2 }
 0x91b   : > { %v2580_v33 = vadd.f32 %v2579_v46, %v2578_v53 }
 0x91d   : > { %v2581_v39 = vrot.slane %v2580_v33, 1 }
 0x91f   : > { %v2582_v42 = vadd.f32 %v2581_v39, %v2580_v33 }
 0x921   : > { %v2583_v36 = vmul.f32 0.03125, %v2582_v42 }
 0x923   : > { %v2584_v4 = vsub.f32 %v2562_v37, %v2583_v36  ;;  %v2585_v41 = vsub.f32 %v2563_v40, %v2583_v36  ;;  %v2586_v60 = vsub.f32 %v2564_v24, %v2583_v36  ;;  %v2587_v56 = vsub.f32 %v2565_v17, %v2583_v36  ;;  %v2682_v37 = vpop.permute.xlu1 %2681  ;;  %v2697_v17 = vpop.permute.xlu0 %2696 }
 0x925   : > { %v2588_v1 = vmul.f32 %v2584_v4, %v2584_v4  ;;  %v2589_v61 = vmul.f32 %v2585_v41, %v2585_v41  ;;  %v2590_v32 = vmul.f32 %v2586_v60, %v2586_v60  ;;  %v2591_v30 = vmul.f32 %v2587_v56, %v2587_v56 }
 0x927   : > { %v2592_v6 = vadd.f32 %v2589_v61, %v2588_v1  ;;  %v2692_v40 = vpop.permute.xlu1 %2691  ;;  %v2707_v61 = vpop.permute.xlu0 %2706 }
 0x929   : > { %v2593_v15 = vadd.f32 %v2592_v6, %v2590_v32 }
 0x92b   : > { %v2594_v49 = vadd.f32 %v2593_v15, %v2591_v30  ;;  %v2702_v33 = vpop.permute.xlu1 %2701 }
 0x92d   : > { %v2595_v54 = vrot.slane %v2594_v49, 4 }
 0x92f   : > { %v2596_v63 = vadd.f32 %v2595_v54, %v2594_v49 }
 0x931   : > { %v2597_v25 = vrot.slane %v2596_v63, 2 }
 0x933   : > { %v2598_v27 = vadd.f32 %v2597_v25, %v2596_v63  ;;  %v2712_v25 = vpop.permute.xlu1 %2711 }
 0x935   : > { %v2599_v14 = vrot.slane %v2598_v27, 1 }
 0x937   : > { %v2600_v12 = vadd.f32 %v2599_v14, %v2598_v27 }
 0x939   : > { %v2601_v35 = vmul.f32 0.03125, %v2600_v12 }
 0x93b   : > { %v2602_v10 = vadd.f32 1e-12, %v2601_v35 }
 0x93d   : > { %6739 = vrsqrt.f32 %v2602_v10 }
 0x947   : > { %v6740_v3 = vpop.eup %6739 }
 0x948   : > { %v2605_v8 = vmul.f32 %v6740_v3, %v2585_v41  ;;  %v2604_v47 = vmul.f32 %v6740_v3, %v2584_v4  ;;  %v2606_v58 = vmul.f32 %v6740_v3, %v2586_v60  ;;  %v2607_v31 = vmul.f32 %v6740_v3, %v2587_v56 }
 0x94a   : > { %v2628_v38 = vmul.f32 %v2611_v23, %v2604_v47  ;;  %v2629_v52 = vmul.f32 %v2616_v44, %v2605_v8  ;;  %v2630_v55 = vmul.f32 %v2621_v45, %v2606_v58  ;;  %v2631_v7 = vmul.f32 %v2626_v28, %v2607_v31 }
 0x94c   : > { %v8185_v51 = vadd.f32 %v2635_v9, %v2628_v38  ;;  %v8187_v50 = vadd.f32 %v2640_v48, %v2629_v52  ;;  %v8189_v57 = vadd.f32 %v2645_v43, %v2630_v55  ;;  %v8191_v16 = vadd.f32 %v2650_v2, %v2631_v7 }
 0x94e   : > { %v2664_v0 = vpack.c.bf16 %v8187_v50, %v8185_v51  ;;  %v2665_v59 = vpack.c.bf16 %v8191_v16, %v8189_v57 }
 0x950   : > { %6187 = vmatprep.subr.bf16.mxu1 %v2664_v0 }
 0x951   : > { %6188 = vmatpush3.bf16.msra.mxu1 %v2664_v0 }
 0x952   : > { %6189 = vmatprep.subr.bf16.mxu1 %v2665_v59 }
 0x955   : > { %6190 = vmatpush3.bf16.msra.mxu1 %v2665_v59 }
 0x958   : > { %6192 = vmatmul.mubr.msk.bf16.vlgmr.msra.gmra.mrb[44].mxu1 %vm855_vm0, %v6460_v34 }
 0x959   : > { %6195 = vmatprep.mubr.msk.bf16.mxu1 %vm855_vm0, %v6461_v22 }
 0x960   : > { %6196 = vmatmul.mubr.msk.bf16.gmra.mrb[48].mxu1 %vm855_vm0, %v6462_v62 }
 0x961   : > { %6207 = vmatprep.mubr.msk.bf16.mxu1 %vm2925_vm4, %v6463_v11 }
 0xa2b   : > { %v6193_v24 = vpop.f32.mrb[44].mxu1 }
 0xa2c   : > { %v8213_v29 = vadd.f32 %v6193_v24, %v2687_v19  ;;  %v2780_v5 = vpop.f32.mrb[45].mxu1 }
 0xa2d   : > { %v8215_v20 = vadd.f32 %v2780_v5, %v2677_v18  ;;  %v6194_v21 = vpop.f32.mrb[46].mxu1 }
 0xa2e   : > { %v2821_v26 = vmul.f32 0.044715, %v8213_v29  ;;  %v8218_v53 = vadd.f32 %v6194_v21, %v2692_v40  ;;  %v2783_v46 = vpop.f32.mrb[47].mxu1 }
 0xa2f   : > { %v2819_v39 = vmul.f32 0.044715, %v8215_v20  ;;  %v8221_v42 = vadd.f32 %v2783_v46, %v2682_v37 }
 0xa30   : > { %v2829_v36 = vmul.f32 %v2821_v26, %v8213_v29  ;;  %v2822_v4 = vmul.f32 0.044715, %v8218_v53 }
 0xa31   : > { %v2827_v41 = vmul.f32 %v2819_v39, %v8215_v20  ;;  %v2820_v60 = vmul.f32 0.044715, %v8221_v42  ;;  %v2813_v39 = vmul.f32 0.5, %v8213_v29 }
 0xa32   : > { %v2837_v56 = vmul.f32 %v2829_v36, %v8213_v29  ;;  %v2830_v1 = vmul.f32 %v2822_v4, %v8218_v53  ;;  %v2814_v36 = vmul.f32 0.5, %v8218_v53 }
 0xa33   : > { %v2835_v32 = vmul.f32 %v2827_v41, %v8215_v20  ;;  %v2828_v6 = vmul.f32 %v2820_v60, %v8221_v42  ;;  %v6197_v30 = vpop.f32.mrb[48].mxu1  ;;  %v2811_v41 = vmul.f32 0.5, %v8215_v20  ;;  %v2812_v60 = vmul.f32 0.5, %v8221_v42 }
 0xa34   : > { %v2838_v15 = vmul.f32 %v2830_v1, %v8218_v53  ;;  %v8232_v49 = vadd.f32 %v6197_v30, %v2707_v61  ;;  %v2796_v54 = vpop.f32.mrb[49].mxu1  ;;  %v2845_v63 = vadd.f32 %v2837_v56, %v8213_v29 }
 0xa35   : > { %v2836_v27 = vmul.f32 %v2828_v6, %v8221_v42  ;;  %v8236_v14 = vadd.f32 %v2796_v54, %v2697_v17  ;;  %v6198_v12 = vpop.f32.mrb[50].mxu1  ;;  %v2843_v44 = vadd.f32 %v2835_v32, %v8215_v20 }
 0xa36   : > { %v2825_v23 = vmul.f32 0.044715, %v8232_v49  ;;  %v2808_v35 = vadd.f32 %v6198_v12, %v2712_v25  ;;  %v2799_v10 = vpop.f32.mrb[51].mxu1  ;;  %v2846_v48 = vadd.f32 %v2838_v15, %v8218_v53  ;;  %v2853_v9 = vmul.f32 0.7978846, %v2845_v63 }
 0xa37   : > { %v2823_v28 = vmul.f32 0.044715, %v8236_v14  ;;  %v2800_v45 = vadd.f32 %v2799_v10, %v2702_v33  ;;  %v2844_v3 = vadd.f32 %v2836_v27, %v8221_v42  ;;  %v2851_v8 = vmul.f32 0.7978846, %v2843_v44 }
 0xa38   : > { %v2833_v47 = vmul.f32 %v2825_v23, %v8232_v49  ;;  %v2826_v58 = vmul.f32 0.044715, %v2808_v35  ;;  %v2854_v31 = vmul.f32 0.7978846, %v2846_v48  ;;  %6741 = vtanh.f32 %v2853_v9 }
 0xa39   : > { %v2831_v38 = vmul.f32 %v2823_v28, %v8236_v14  ;;  %v2824_v52 = vmul.f32 0.044715, %v2800_v45  ;;  %v2852_v55 = vmul.f32 0.7978846, %v2844_v3  ;;  %6743 = vtanh.f32 %v2851_v8 }
 0xa3a   : > { %v2841_v7 = vmul.f32 %v2833_v47, %v8232_v49  ;;  %v2834_v2 = vmul.f32 %v2826_v58, %v2808_v35  ;;  %6745 = vtanh.f32 %v2854_v31  ;;  %v2817_v53 = vmul.f32 0.5, %v8232_v49 }
 0xa3b   : > { %v2839_v43 = vmul.f32 %v2831_v38, %v8236_v14  ;;  %v2832_v0 = vmul.f32 %v2824_v52, %v2800_v45  ;;  %6747 = vtanh.f32 %v2852_v55  ;;  %v2818_v20 = vmul.f32 0.5, %v2808_v35 }
 0xa3c   : > { %v2842_v59 = vmul.f32 %v2834_v2, %v2808_v35  ;;  %v2849_v34 = vadd.f32 %v2841_v7, %v8232_v49  ;;  %v2815_v42 = vmul.f32 0.5, %v8236_v14  ;;  %v2816_v23 = vmul.f32 0.5, %v2800_v45  ;;  %v6464_v49 = vld [vmem:[%s9325_s12 + $0x8] sm:$0xff]  }
 0xa3d   : > { %v2840_v22 = vmul.f32 %v2832_v0, %v2800_v45  ;;  %v2847_v62 = vadd.f32 %v2839_v43, %v8236_v14  ;;  %v6465_v14 = vld [vmem:[%s9355_s30 + $0x30] sm:$0xff]  }
 0xa3e   : > { %v2850_v11 = vadd.f32 %v2842_v59, %v2808_v35  ;;  %v2857_v18 = vmul.f32 0.7978846, %v2849_v34  ;;  %6215 = vmatprep.mubr.msk.bf16.mxu0 %vm855_vm0, %v6465_v14  ;;  %v2898_v35 = vpop.permute.xlu0 %2897 }
 0xa3f   : > { %v2848_v37 = vadd.f32 %v2840_v22, %v2800_v45  ;;  %v2855_v19 = vmul.f32 0.7978846, %v2847_v62  ;;  %v2903_v45 = vpop.permute.xlu1 %2902 }
 0xa40   : > { %v2858_v40 = vmul.f32 0.7978846, %v2850_v11  ;;  %6749 = vtanh.f32 %v2857_v18 }
 0xa41   : > { %v2856_v24 = vmul.f32 0.7978846, %v2848_v37  ;;  %6751 = vtanh.f32 %v2855_v19 }
 0xa42   : > { %v6742_v5 = vpop.eup %6741  ;;  %6753 = vtanh.f32 %v2858_v40  ;;  %v2908_v55 = vpop.permute.xlu0 %2907 }
 0xa43   : > { %v6744_v17 = vpop.eup %6743  ;;  %v2869_v21 = vadd.f32 1.0, %v6742_v5  ;;  %6755 = vtanh.f32 %v2856_v24  ;;  %v2913_v0 = vpop.permute.xlu1 %2912 }
 0xa44   : > { %v6746_v26 = vpop.eup %6745  ;;  %v2867_v46 = vadd.f32 1.0, %v6744_v17 }
 0xa45   : > { %v6748_v33 = vpop.eup %6747  ;;  %v2870_v4 = vadd.f32 1.0, %v6746_v26  ;;  %v2877_v1 = vmul.f32 %v2869_v21, %v2813_v39 }
 0xa46   : > { %v2868_v56 = vadd.f32 1.0, %v6748_v33  ;;  %v2875_v32 = vmul.f32 %v2867_v46, %v2811_v41 }
 0xa47   : > { %v2878_v61 = vmul.f32 %v2870_v4, %v2814_v36 }
 0xa48   : > { %v2876_v6 = vmul.f32 %v2868_v56, %v2812_v60 }
 0xa49   : > { %v2888_v30 = vpack.c.bf16 %v2878_v61, %v2877_v1 }
 0xa4a   : > { %v6750_v15 = vpop.eup %6749  ;;  %v2887_v54 = vpack.c.bf16 %v2876_v6, %v2875_v32 }
 0xa4b   : > { %v6752_v63 = vpop.eup %6751  ;;  %v2873_v25 = vadd.f32 1.0, %v6750_v15 }
 0xa4c   : > { %v6754_v27 = vpop.eup %6753  ;;  %6199 = vmatprep.subr.bf16.mxu1 %v2887_v54  ;;  %v2871_v29 = vadd.f32 1.0, %v6752_v63  ;;  %v3030_v63 = vpop.permute.xlu0 %3029 }
 0xa4d   : > { %v6756_v12 = vpop.eup %6755  ;;  %6200 = vmatpush3.bf16.msra.mxu1 %v2887_v54  ;;  %v2874_v44 = vadd.f32 1.0, %v6754_v27  ;;  %v2881_v48 = vmul.f32 %v2873_v25, %v2817_v53  ;;  %v3035_v54 = vpop.permute.xlu1 %3034 }
 0xa4e   : > { %6201 = vmatprep.subr.bf16.mxu1 %v2888_v30  ;;  %v2872_v10 = vadd.f32 1.0, %v6756_v12  ;;  %v2879_v28 = vmul.f32 %v2871_v29, %v2815_v42 }
 0xa4f   : > { %v2882_v9 = vmul.f32 %v2874_v44, %v2818_v20 }
 0xa50   : > { %v2880_v3 = vmul.f32 %v2872_v10, %v2816_v23  ;;  %v3054_v12 = vpop.permute.xlu0 %3053 }
 0xa51   : > { %6202 = vmatpush3.bf16.msra.mxu1 %v2888_v30  ;;  %v2890_v8 = vpack.c.bf16 %v2882_v9, %v2881_v48  ;;  %v3059_v29 = vpop.permute.xlu1 %3058 }
 0xa52   : > { %v2889_v47 = vpack.c.bf16 %v2880_v3, %v2879_v28 }
 0xa54   : > { %6203 = vmatprep.subr.bf16.mxu1 %v2889_v47  ;;  %v3040_v20 = vpop.permute.xlu0 %3039 }
 0xa55   : > { %6204 = vmatpush3.bf16.msra.mxu1 %v2889_v47  ;;  %v3045_v53 = vpop.permute.xlu1 %3044 }
 0xa56   : > { %6205 = vmatprep.subr.bf16.mxu1 %v2890_v8 }
 0xa59   : > { %6206 = vmatpush3.bf16.msra.mxu1 %v2890_v8  ;;  %v3069_v47 = vpop.permute.xlu1 %3068 }
 0xa5c   : > { %6208 = vmatmul.mubr.msk.bf16.vlgmr.msra.gmra.mrb[52].mxu1 %vm2925_vm4, %v6464_v49  ;;  %v3064_v49 = vpop.permute.xlu0 %3063 }
 0xb2f   : > { %v6209_v58 = vpop.f32.mrb[52].mxu1 }
 0xb30   : > { %v2966_v31 = vpop.f32.mrb[53].mxu1  ;;  %v2975_v2 = vadd.f32 %v6209_v58, %v2908_v55  ;;  %v6467_v55 = vld [vmem:[%s9355_s30 + $0x40] sm:$0xff]  }
 0xb31   : > { %v2967_v38 = vadd.f32 %v2966_v31, %v2898_v35  ;;  %v6210_v52 = vpop.f32.mrb[54].mxu1 }
 0xb32   : > { %v2969_v7 = vpop.f32.mrb[55].mxu1  ;;  %v2978_v34 = vadd.f32 %v6210_v52, %v2913_v0  ;;  %v2983_v62 = vadd.f32 %v2975_v2, %v8189_v57  ;;  %v6466_v52 = vld [vmem:[%s9355_s30 + $0x38] sm:$0xff]   ;;  %v3106_v2 = vpop.permute.xlu0 %3105 }
 0xb33   : > { %v2970_v43 = vadd.f32 %v2969_v7, %v2903_v45  ;;  %v2981_v59 = vadd.f32 %v2967_v38, %v8185_v51  ;;  %v6468_v7 = vld [vmem:[%s9355_s30 + $0x48] sm:$0xff]  }
 0xb34   : > { %v2984_v18 = vadd.f32 %v2978_v34, %v8191_v16 }
 0xb35   : > { %v2982_v22 = vadd.f32 %v2970_v43, %v8187_v50 }
 0xb36   : > { %v3116_v43 = vpop.permute.xlu0 %3115 }
 0xb37   : > { %v2993_v11 = vadd.f32 %v2982_v22, %v2981_v59 }
 0xb39   : > { %v2994_v37 = vadd.f32 %v2993_v11, %v2983_v62  ;;  %v3111_v11 = vpop.permute.xlu1 %3110 }
 0xb3b   : > { %v2995_v19 = vadd.f32 %v2994_v37, %v2984_v18 }
 0xb3d   : > { %v2996_v40 = vrot.slane %v2995_v19, 4 }
 0xb3f   : > { %v2997_v24 = vadd.f32 %v2996_v40, %v2995_v19 }
 0xb41   : > { %v2998_v5 = vrot.slane %v2997_v24, 2 }
 0xb43   : > { %v2999_v17 = vadd.f32 %v2998_v5, %v2997_v24 }
 0xb45   : > { %v3000_v21 = vrot.slane %v2999_v17, 1 }
 0xb47   : > { %v3001_v26 = vadd.f32 %v3000_v21, %v2999_v17 }
 0xb49   : > { %v3002_v46 = vmul.f32 0.03125, %v3001_v26 }
 0xb4b   : > { %v3003_v33 = vsub.f32 %v2981_v59, %v3002_v46  ;;  %v3004_v39 = vsub.f32 %v2982_v22, %v3002_v46  ;;  %v3005_v51 = vsub.f32 %v2983_v62, %v3002_v46  ;;  %v3006_v36 = vsub.f32 %v2984_v18, %v3002_v46  ;;  %v3126_v18 = vpop.permute.xlu0 %3125 }
 0xb4d   : > { %v3007_v4 = vmul.f32 %v3003_v33, %v3003_v33  ;;  %v3008_v50 = vmul.f32 %v3004_v39, %v3004_v39  ;;  %v3009_v41 = vmul.f32 %v3005_v51, %v3005_v51  ;;  %v3010_v60 = vmul.f32 %v3006_v36, %v3006_v36 }
 0xb4f   : > { %v3011_v57 = vadd.f32 %v3008_v50, %v3007_v4  ;;  %v3131_v21 = vpop.permute.xlu0 %3130 }
 0xb51   : > { %v3012_v56 = vadd.f32 %v3011_v57, %v3009_v41 }
 0xb53   : > { %v3013_v16 = vadd.f32 %v3012_v56, %v3010_v60 }
 0xb55   : > { %v3014_v1 = vrot.slane %v3013_v16, 4 }
 0xb57   : > { %v3015_v61 = vadd.f32 %v3014_v1, %v3013_v16 }
 0xb59   : > { %v3016_v32 = vrot.slane %v3015_v61, 2 }
 0xb5b   : > { %v3017_v6 = vadd.f32 %v3016_v32, %v3015_v61 }
 0xb5d   : > { %v3018_v30 = vrot.slane %v3017_v6, 1 }
 0xb5f   : > { %v3019_v15 = vadd.f32 %v3018_v30, %v3017_v6 }
 0xb61   : > { %v3020_v25 = vmul.f32 0.03125, %v3019_v15 }
 0xb63   : > { %v3021_v27 = vadd.f32 1e-12, %v3020_v25 }
 0xb65   : > { %6757 = vrsqrt.f32 %v3021_v27 }
 0xb6f   : > { %v6758_v44 = vpop.eup %6757 }
 0xb70   : > { %v3024_v42 = vmul.f32 %v6758_v44, %v3004_v39  ;;  %v3023_v23 = vmul.f32 %v6758_v44, %v3003_v33  ;;  %v3025_v10 = vmul.f32 %v6758_v44, %v3005_v51  ;;  %v3026_v48 = vmul.f32 %v6758_v44, %v3006_v36  ;;  %v3121_v39 = vpop.permute.xlu1 %3120 }
 0xb72   : > { %v3047_v9 = vmul.f32 %v3030_v63, %v3023_v23  ;;  %v3048_v28 = vmul.f32 %v3035_v54, %v3024_v42  ;;  %v3049_v3 = vmul.f32 %v3040_v20, %v3025_v10  ;;  %v3050_v8 = vmul.f32 %v3045_v53, %v3026_v48 }
 0xb74   : > { %v8267_v14 = vadd.f32 %v3054_v12, %v3047_v9  ;;  %v8269_v35 = vadd.f32 %v3059_v29, %v3048_v28  ;;  %v8271_v45 = vadd.f32 %v3064_v49, %v3049_v3  ;;  %v8273_v58 = vadd.f32 %v3069_v47, %v3050_v8 }
 0xb76   : > { %v3088_v31 = vpack.c.bf16 %v8269_v35, %v8267_v14  ;;  %v3089_v38 = vpack.c.bf16 %v8273_v58, %v8271_v45 }
 0xb78   : > { %6211 = vmatprep.subr.bf16.mxu0 %v3088_v31 }
 0xb79   : > { %6212 = vmatpush3.bf16.msra.mxu0 %v3088_v31 }
 0xb7a   : > { %6213 = vmatprep.subr.bf16.mxu0 %v3089_v38 }
 0xb7d   : > { %6214 = vmatpush3.bf16.msra.mxu0 %v3089_v38 }
 0xb7e   : > { %6245 = vmatprep.subr.bf16.mxu0 %v9358_v13 }
 0xb80   : > { %6216 = vmatmul.mubr.msk.bf16.vlgmr.msra.gmra.mrb[52].mxu0 %vm855_vm0, %v6466_v52 }
 0xb81   : > { %6219 = vmatprep.mubr.msk.bf16.mxu0 %vm855_vm0, %v6467_v55 }
 0xb88   : > { %6220 = vmatmul.mubr.msk.bf16.gmra.mrb[56].mxu0 %vm855_vm0, %v6468_v7 }
 0xc53   : > { %v6217_v0 = vpop.f32.mrb[52].mxu0 }
 0xc54   : > { %v3245_v59 = vpop.f32.mrb[53].mxu0  ;;  %v3254_v24 = vadd.f32 %v6217_v0, %v3116_v43 }
 0xc55   : > { %v3246_v34 = vadd.f32 %v3245_v59, %v3106_v2  ;;  %v6218_v22 = vpop.f32.mrb[54].mxu0  ;;  %v8360_v59 = vld [vmem:[%s7333_s25] ss:$0 sm:$0xff] }
 0xc56   : > { %v3248_v62 = vpop.f32.mrb[55].mxu0  ;;  %v3257_v51 = vadd.f32 %v6218_v22, %v3121_v39 }
 0xc57   : > { %3292 = vxpose.xlu1.b32.start [1/4] (short) %v3246_v34, 128  ;;  %v3249_v37 = vadd.f32 %v3248_v62, %v3111_v11 }
 0xc5b   : > { %v8292_v19 = vpop.f32.mrb[56].mxu0  ;;  %3293 = vxpose.xlu1.b32.cont [2/4] (short) %v3249_v37, 128 }
 0xc5c   : > { %v3261_v40 = vpop.f32.mrb[57].mxu0 }
 0xc5d   : > { %v3262_v5 = vadd.f32 %v3261_v40, %v3126_v18  ;;  %v8294_v17 = vpop.f32.mrb[58].mxu0 }
 0xc5e   : > { %v3264_v26 = vpop.f32.mrb[59].mxu0 }
 0xc5f   : > { %v3332_v46 = vpack.c.bf16 %v3262_v5, %v3262_v5  ;;  %v3265_v33 = vadd.f32 %v3264_v26, %v3131_v21  ;;  %3294 = vxpose.xlu1.b32.cont [3/4] (short) %v3254_v24, 128 }
 0xc61   : > { %v3359_v36 = vsel %vm1022_vm1, %v3332_v46, 0  ;;  %v3683_v4 = vpack.c.bf16 %v3265_v33, %v3265_v33  ;;  %6431 = vmatprep.subr.msk.bf16.mxu1 %vm1022_vm1, %v3332_v46 }
 0xc62   : > { %6228 = vmatpush3.bf16.msra.mxu1 %v3359_v36 }
 0xc63   : > { %3295 = vxpose.xlu1.b32.end [4/4] (short) %v3257_v51, 128  ;;  %6432 = vmatprep.subr.msk.bf16.mxu1 %vm1022_vm1, %v3683_v4  ;;  %v3734_v1 = vsel %vm1022_vm1, %v3683_v4, 0 }
 0xcd7   : > { %v3308_v50 = vpop.trf.xlu1 }
 0xcdb   : > { %v3309_v41 = vpop.trf.xlu1 }
 0xcdc   : > { %v8299_v57 = vpack.c.bf16 %v3309_v41, %v3308_v50 }
 0xcde   : > { %3693 = vrot.lane.b32.xlu0 %v8299_v57, %s7055_s1  ;;  %6229 = vmatprep.mubr.msk.bf16.mxu1 %vm997_vm2, %v8299_v57 }
 0xcdf   : > { %v3310_v60 = vpop.trf.xlu1 }
 0xce3   : > { %v3311_v56 = vpop.trf.xlu1 }
 0xce4   : > { %v8305_v16 = vpack.c.bf16 %v3311_v56, %v3310_v60 }
 0xce6   : > { %3695 = vrot.lane.b32.xlu0 %v8305_v16, %s7055_s1  ;;  %6230 = vmatmul.mubr.msk.bf16.vlgmr.msra.gmra.mrb[56].mxu1 %vm997_vm2, %v8305_v16 }
 0xce7   : > { %6266 = vmatpush3.bf16.msra.mxu1 %v3734_v1  ;;  %v3312_v61 = vpop.trf.xlu1 }
 0xce8   : > { %6283 = vmatprep.subr.bf16.mxu1 %v9358_v13 }
 0xceb   : > { %v3313_v32 = vpop.trf.xlu1 }
 0xcec   : > { %v8313_v6 = vpack.c.bf16 %v3313_v32, %v3312_v61 }
 0xcee   : > { %3697 = vrot.lane.b32.xlu0 %v8313_v6, %s7055_s1  ;;  %6233 = vmatprep.mubr.msk.bf16.mxu1 %vm997_vm2, %v8313_v6 }
 0xcef   : > { %v3314_v30 = vpop.trf.xlu1 }
 0xcf3   : > { %v3315_v15 = vpop.trf.xlu1 }
 0xcf4   : > { %v8319_v54 = vpack.c.bf16 %v3315_v15, %v3314_v30 }
 0xcf6   : > { %3699 = vrot.lane.b32.xlu0 %v8319_v54, %s7055_s1  ;;  %6234 = vmatmul.mubr.msk.bf16.gmra.mrb[60].mxu1 %vm997_vm2, %v8319_v54 }
 0xcf7   : > { %v3316_v63 = vpop.trf.xlu1 }
 0xcfb   : > { %v3317_v25 = vpop.trf.xlu1 }
 0xcfc   : > { %v8325_v27 = vpack.c.bf16 %v3317_v25, %v3316_v63 }
 0xcfe   : > { %3701 = vrot.lane.b32.xlu0 %v8325_v27, %s7055_s1  ;;  %6237 = vmatprep.mubr.msk.bf16.mxu1 %vm997_vm2, %v8325_v27 }
 0xcff   : > { %v3318_v29 = vpop.trf.xlu1 }
 0xd03   : > { %v3319_v12 = vpop.trf.xlu1 }
 0xd04   : > { %v8331_v53 = vpack.c.bf16 %v3319_v12, %v3318_v29 }
 0xd06   : > { %3703 = vrot.lane.b32.xlu0 %v8331_v53, %s7055_s1  ;;  %6238 = vmatmul.mubr.msk.bf16.gmra.mrb[64].mxu1 %vm997_vm2, %v8331_v53 }
 0xd07   : > { %v3320_v20 = vpop.trf.xlu1 }
 0xd0b   : > { %v3321_v44 = vpop.trf.xlu1 }
 0xd0c   : > { %v8337_v42 = vpack.c.bf16 %v3321_v44, %v3320_v20 }
 0xd0e   : > { %3705 = vrot.lane.b32.xlu0 %v8337_v42, %s7055_s1  ;;  %6241 = vmatprep.mubr.msk.bf16.mxu1 %vm997_vm2, %v8337_v42 }
 0xd0f   : > { %v3322_v23 = vpop.trf.xlu1 }
 0xd13   : > { %v3323_v10 = vpop.trf.xlu1 }
 0xd14   : > { %v8343_v48 = vpack.c.bf16 %v3323_v10, %v3322_v23 }
 0xd16   : > { %3707 = vrot.lane.b32.xlu0 %v8343_v48, %s7055_s1  ;;  %6242 = vmatmul.mubr.msk.bf16.gmra.mrb[68].mxu1 %vm997_vm2, %v8343_v48 }
 0xd50   : > { %v3694_v9 = vpop.permute.xlu0 %3693 }
 0xd51   : > { %6267 = vmatprep.mubr.msk.bf16.mxu1 %vm997_vm2, %v3694_v9 }
 0xd58   : > { %v3696_v28 = vpop.permute.xlu0 %3695 }
 0xd59   : > { %6268 = vmatmul.mubr.msk.bf16.vlgmr.msra.gmra.mrb[72].mxu1 %vm997_vm2, %v3696_v28 }
 0xd60   : > { %v3698_v3 = vpop.permute.xlu0 %3697 }
 0xd61   : > { %6271 = vmatprep.mubr.msk.bf16.mxu1 %vm997_vm2, %v3698_v3 }
 0xd68   : > { %v3700_v8 = vpop.permute.xlu0 %3699 }
 0xd69   : > { %6272 = vmatmul.mubr.msk.bf16.gmra.mrb[76].mxu1 %vm997_vm2, %v3700_v8 }
 0xd70   : > { %v3702_v47 = vpop.permute.xlu0 %3701 }
 0xd71   : > { %6275 = vmatprep.mubr.msk.bf16.mxu1 %vm997_vm2, %v3702_v47 }
 0xd78   : > { %v3704_v49 = vpop.permute.xlu0 %3703 }
 0xd79   : > { %6276 = vmatmul.mubr.msk.bf16.gmra.mrb[80].mxu1 %vm997_vm2, %v3704_v49 }
 0xd80   : > { %v3706_v31 = vpop.permute.xlu0 %3705 }
 0xd81   : > { %6279 = vmatprep.mubr.msk.bf16.mxu1 %vm997_vm2, %v3706_v31 }
 0xd88   : > { %v3708_v38 = vpop.permute.xlu0 %3707 }
 0xd89   : > { %6280 = vmatmul.mubr.msk.bf16.gmra.mrb[84].mxu1 %vm997_vm2, %v3708_v38 }
 0xd8a   : > { %6299 = vmatprep.mubr.msk.bf16.mxu1 %vm7059_vm3, %v9358_v13 }
 0xdb9   : > { %v6231_v52 = vpop.f32.mrb[56].mxu1 }
 0xdba   : > { %v3395_v55 = vpop.f32.mrb[57].mxu1  ;;  %v3460_v0 = vmul.f32 0.35355338, %v6231_v52 }
 0xdbb   : > { %v3458_v7 = vmul.f32 0.35355338, %v3395_v55  ;;  %v6232_v2 = vpop.f32.mrb[58].mxu1 }
 0xdbc   : > { %v3398_v43 = vpop.f32.mrb[59].mxu1  ;;  %v8370_v11 = vadd.f32 %v8360_v59, %v3460_v0  ;;  %v3461_v18 = vmul.f32 0.35355338, %v6232_v2 }
 0xdbd   : > { %v8363_v34 = vadd.f32 %v8360_v59, %v3458_v7  ;;  %v3459_v22 = vmul.f32 0.35355338, %v3398_v43 }
 0xdbe   : > { %v8375_v37 = vadd.f32 %v8360_v59, %v3461_v18 }
 0xdbf   : > { %v8366_v62 = vadd.f32 %v8360_v59, %v3459_v22  ;;  %3490 = vmax.xlane.f32.xlu0 %v8363_v34 }
 0xdc1   : > { %3492 = vmax.xlane.f32.xlu1 %v8366_v62 }
 0xdc3   : > { %3494 = vmax.xlane.f32.xlu0 %v8370_v11 }
 0xdc7   : > { %3496 = vmax.xlane.f32.xlu0 %v8375_v37 }
 0xdc9   : > { %v6235_v40 = vpop.f32.mrb[60].mxu1 }
 0xdca   : > { %v3464_v24 = vmul.f32 0.35355338, %v6235_v40  ;;  %v3411_v5 = vpop.f32.mrb[61].mxu1 }
 0xdcb   : > { %v6236_v21 = vpop.f32.mrb[62].mxu1  ;;  %v3462_v46 = vmul.f32 0.35355338, %v3411_v5 }
 0xdcc   : > { %v8379_v26 = vadd.f32 %v8360_v59, %v3464_v24  ;;  %v3414_v33 = vpop.f32.mrb[63].mxu1  ;;  %v3465_v51 = vmul.f32 0.35355338, %v6236_v21  ;;  %v6469_v21 = vld [vmem:[%s9355_s30 + $0x50] sm:$0xff]  }
 0xdcd   : > { %v8383_v39 = vadd.f32 %v8360_v59, %v3462_v46  ;;  %v3463_v4 = vmul.f32 0.35355338, %v3414_v33  ;;  %v6470_v46 = vld [vmem:[%s9355_s30 + $0x58] sm:$0xff]   ;;  %6223 = vmatprep.mubr.msk.bf16.mxu0 %vm855_vm0, %v6469_v21 }
 0xdce   : > { %3502 = vmax.xlane.f32.xlu0 %v8379_v26  ;;  %v8387_v36 = vadd.f32 %v8360_v59, %v3465_v51  ;;  %6224 = vmatmul.mubr.msk.bf16.gmra.mrb[60].mxu0 %vm855_vm0, %v6470_v46 }
 0xdcf   : > { %v8391_v50 = vadd.f32 %v8360_v59, %v3463_v4  ;;  %6261 = vmatprep.mubr.msk.bf16.mxu0 %vm7059_vm3, %v9358_v13 }
 0xdd2   : > { %3498 = vmax.xlane.f32.xlu0 %v8383_v39 }
 0xdd6   : > { %3504 = vmax.xlane.f32.xlu0 %v8387_v36 }
 0xdd9   : > { %v6239_v41 = vpop.f32.mrb[64].mxu1 }
 0xdda   : > { %v3468_v60 = vmul.f32 0.35355338, %v6239_v41  ;;  %3500 = vmax.xlane.f32.xlu0 %v8391_v50  ;;  %v3427_v56 = vpop.f32.mrb[65].mxu1 }
 0xddb   : > { %v8394_v1 = vpop.f32.mrb[66].mxu1  ;;  %v3466_v24 = vmul.f32 0.35355338, %v3427_v56 }
 0xddc   : > { %v8397_v61 = vadd.f32 %v8360_v59, %v3468_v60  ;;  %v3430_v32 = vpop.f32.mrb[67].mxu1 }
 0xddd   : > { %v8447_v60 = vadd.f32 %v8360_v59, %v3466_v24  ;;  %v3467_v56 = vmul.f32 0.35355338, %v3430_v32 }
 0xdde   : > { %3510 = vmax.xlane.f32.xlu1 %v8397_v61 }
 0xde9   : > { %v8400_v30 = vpop.f32.mrb[68].mxu1 }
 0xdea   : > { %v3443_v15 = vpop.f32.mrb[69].mxu1 }
 0xdeb   : > { %v8402_v63 = vpop.f32.mrb[70].mxu1 }
 0xdec   : > { %v8404_v25 = vpop.f32.mrb[71].mxu1 }
 0xe2c   : > { %v6269_v29 = vpop.f32.mrb[72].mxu1 }
 0xe2d   : > { %v3835_v12 = vmul.f32 0.35355338, %v6269_v29  ;;  %v3770_v20 = vpop.f32.mrb[73].mxu1  ;;  %v3470_v29 = vmul.f32 0.35355338, %v3443_v15 }
 0xe2e   : > { %v6270_v44 = vpop.f32.mrb[74].mxu1  ;;  %v3833_v10 = vmul.f32 0.35355338, %v3770_v20 }
 0xe2f   : > { %v8407_v23 = vadd.f32 %v8360_v59, %v3835_v12  ;;  %v3773_v9 = vpop.f32.mrb[75].mxu1  ;;  %v3836_v3 = vmul.f32 0.35355338, %v6270_v44  ;;  %v8457_v44 = vadd.f32 %v8360_v59, %v3467_v56 }
 0xe30   : > { %v8411_v28 = vadd.f32 %v8360_v59, %v3833_v10  ;;  %v3834_v47 = vmul.f32 0.35355338, %v3773_v9  ;;  %v8460_v10 = vadd.f32 %v8360_v59, %v3470_v29 }
 0xe31   : > { %3869 = vmax.xlane.f32.xlu0 %v8407_v23  ;;  %v8415_v8 = vadd.f32 %v8360_v59, %v3836_v3 }
 0xe32   : > { %v8419_v49 = vadd.f32 %v8360_v59, %v3834_v47  ;;  %v3469_v47 = vmul.f32 0.35355338, %v8394_v1 }
 0xe35   : > { %3865 = vmax.xlane.f32.xlu0 %v8411_v28 }
 0xe39   : > { %3871 = vmax.xlane.f32.xlu0 %v8415_v8 }
 0xe3c   : > { %v6273_v31 = vpop.f32.mrb[76].mxu1 }
 0xe3d   : > { %v3839_v38 = vmul.f32 0.35355338, %v6273_v31  ;;  %3867 = vmax.xlane.f32.xlu0 %v8419_v49  ;;  %v3786_v52 = vpop.f32.mrb[77].mxu1 }
 0xe3e   : > { %v6274_v55 = vpop.f32.mrb[78].mxu1  ;;  %v3837_v2 = vmul.f32 0.35355338, %v3786_v52 }
 0xe3f   : > { %v8423_v7 = vadd.f32 %v8360_v59, %v3839_v38  ;;  %v3789_v43 = vpop.f32.mrb[79].mxu1  ;;  %v3840_v22 = vmul.f32 0.35355338, %v6274_v55 }
 0xe40   : > { %v8427_v0 = vadd.f32 %v8360_v59, %v3837_v2  ;;  %v3838_v40 = vmul.f32 0.35355338, %v3789_v43 }
 0xe41   : > { %3877 = vmax.xlane.f32.xlu0 %v8423_v7  ;;  %v8431_v18 = vadd.f32 %v8360_v59, %v3840_v22 }
 0xe42   : > { %v8435_v5 = vadd.f32 %v8360_v59, %v3838_v40  ;;  %v8475_v40 = vadd.f32 %v8360_v59, %v3469_v47 }
 0xe45   : > { %3873 = vmax.xlane.f32.xlu0 %v8427_v0 }
 0xe49   : > { %3879 = vmax.xlane.f32.xlu0 %v8431_v18 }
 0xe4c   : > { %v6277_v33 = vpop.f32.mrb[80].mxu1  ;;  %v3491_v32 = vpop.xlane.xlu0 %3490 }
 0xe4d   : > { %v3843_v51 = vmul.f32 0.35355338, %v6277_v33  ;;  %3875 = vmax.xlane.f32.xlu0 %v8435_v5  ;;  %v3802_v4 = vpop.f32.mrb[81].mxu1  ;;  %v3522_v31 = vsub.f32 %v8363_v34, %v3491_v32  ;;  %v3472_v34 = vmul.f32 0.35355338, %v8400_v30 }
 0xe4e   : > { %v6278_v41 = vpop.f32.mrb[82].mxu1  ;;  %v3841_v9 = vmul.f32 0.35355338, %v3802_v4  ;;  %v3493_v4 = vpop.xlane.xlu1 %3492 }
 0xe4f   : > { %v8450_v12 = vadd.f32 %v8360_v59, %v3843_v51  ;;  %v3805_v20 = vpop.f32.mrb[83].mxu1  ;;  %v3538_v24 = vmul.f32 1.442695, %v3522_v31  ;;  %v3844_v21 = vmul.f32 0.35355338, %v6278_v41  ;;  %v3523_v30 = vsub.f32 %v8366_v62, %v3493_v4 }
 0xe50   : > { %v8465_v15 = vadd.f32 %v8360_v59, %v3841_v9  ;;  %v3842_v3 = vmul.f32 0.35355338, %v3805_v20  ;;  %v3495_v52 = vpop.xlane.xlu0 %3494  ;;  %v3471_v51 = vmul.f32 0.35355338, %v8404_v25  ;;  %v3473_v62 = vmul.f32 0.35355338, %v8402_v63 }
 0xe51   : > { %3506 = vmax.xlane.f32.xlu0 %v8447_v60  ;;  %3885 = vmax.xlane.f32.xlu1 %v8450_v12  ;;  %v3524_v46 = vsub.f32 %v8370_v11, %v3495_v52  ;;  %6759 = vpow2.f32 %v3538_v24  ;;  %v8486_v56 = vadd.f32 %v8360_v59, %v3844_v21  ;;  %v8489_v11 = vadd.f32 %v8360_v59, %v3472_v34 }
 0xe52   : > { %v8471_v38 = vadd.f32 %v8360_v59, %v3842_v3  ;;  %v8495_v20 = vadd.f32 %v8360_v59, %v3471_v51  ;;  %v3540_v3 = vmul.f32 1.442695, %v3523_v30 }
 0xe53   : > { %v3542_v41 = vmul.f32 1.442695, %v3524_v46 }
 0xe54   : > { %v3497_v25 = vpop.xlane.xlu0 %3496 }
 0xe55   : > { %3508 = vmax.xlane.f32.xlu0 %v8457_v44  ;;  %3514 = vmax.xlane.f32.xlu1 %v8460_v10  ;;  %6761 = vpow2.f32 %v3542_v41  ;;  %v3525_v47 = vsub.f32 %v8375_v37, %v3497_v25 }
 0xe56   : > { %6763 = vpow2.f32 %v3540_v3 }
 0xe59   : > { %3881 = vmax.xlane.f32.xlu0 %v8465_v15 }
 0xe5b   : > { %v8507_v52 = vpop.eup %6759 }
 0xe5c   : > { %v6281_v55 = vpop.f32.mrb[84].mxu1 }
 0xe5d   : > { %3883 = vmax.xlane.f32.xlu0 %v8471_v38  ;;  %v3818_v2 = vpop.f32.mrb[85].mxu1  ;;  %v3847_v29 = vmul.f32 0.35355338, %v6281_v55  ;;  %v3544_v55 = vmul.f32 1.442695, %v3525_v47 }
 0xe5e   : > { %v3845_v43 = vmul.f32 0.35355338, %v3818_v2  ;;  %v6282_v22 = vpop.f32.mrb[86].mxu1  ;;  %v8512_v2 = vadd.f32 %v8360_v59, %v3473_v62 }
 0xe5f   : > { %v3821_v1 = vpop.f32.mrb[87].mxu1  ;;  %v8498_v32 = vadd.f32 %v8360_v59, %v3847_v29  ;;  %v8514_v37 = vpop.eup %6761  ;;  %6765 = vpow2.f32 %v3544_v55 }
 0xe60   : > { %v8480_v33 = vadd.f32 %v8360_v59, %v3845_v43  ;;  %v3846_v9 = vmul.f32 0.35355338, %v3821_v1  ;;  %v3848_v43 = vmul.f32 0.35355338, %v6282_v22  ;;  %v8522_v24 = vpop.eup %6763  ;;  %v3503_v22 = vpop.xlane.xlu0 %3502 }
 0xe61   : > { %3512 = vmax.xlane.f32.xlu0 %v8475_v40 }
 0xe62   : > { %3889 = vmax.xlane.f32.xlu1 %v8480_v33  ;;  %v8505_v31 = vadd.f32 %v8360_v59, %v3846_v9  ;;  %v8519_v63 = vadd.f32 %v8360_v59, %v3848_v43  ;;  %v3528_v9 = vsub.f32 %v8379_v26, %v3503_v22 }
 0xe64   : > { %v3499_v46 = vpop.xlane.xlu0 %3498  ;;  %v3550_v62 = vmul.f32 1.442695, %v3528_v9 }
 0xe65   : > { %3887 = vmax.xlane.f32.xlu0 %v8486_v56  ;;  %v3526_v29 = vsub.f32 %v8383_v39, %v3499_v46 }
 0xe66   : > { %3518 = vmax.xlane.f32.xlu1 %v8489_v11 }
 0xe67   : > { %v3546_v47 = vmul.f32 1.442695, %v3526_v29 }
 0xe68   : > { %v3505_v1 = vpop.xlane.xlu0 %3504 }
 0xe69   : > { %3516 = vmax.xlane.f32.xlu0 %v8495_v20  ;;  %v8525_v21 = vpop.eup %6765 }
 0xe6a   : > { %3893 = vmax.xlane.f32.xlu1 %v8498_v32 }
 0xe6c   : > { %v3501_v34 = vpop.xlane.xlu0 %3500 }
 0xe6d   : > { %3891 = vmax.xlane.f32.xlu0 %v8505_v31  ;;  %v3527_v39 = vsub.f32 %v8391_v50, %v3501_v34 }
 0xe6e   : > { %3570 = vadd.xlane.f32.xlu1 %v8507_v52 }
 0xe71   : > { %3520 = vmax.xlane.f32.xlu0 %v8512_v2 }
 0xe72   : > { %3574 = vadd.xlane.f32.xlu1 %v8514_v37 }
 0xe75   : > { %3895 = vmax.xlane.f32.xlu0 %v8519_v63 }
 0xe79   : > { %3572 = vadd.xlane.f32.xlu0 %v8522_v24 }
 0xe7d   : > { %3576 = vadd.xlane.f32.xlu0 %v8525_v21 }
 0xebe   : > { %v3870_v51 = vpop.xlane.xlu0 %3869 }
 0xebf   : > { %v3899_v4 = vsub.f32 %v8407_v23, %v3870_v51 }
 0xec1   : > { %v3917_v41 = vmul.f32 1.442695, %v3899_v4 }
 0xec2   : > { %v3866_v59 = vpop.xlane.xlu0 %3865 }
 0xec3   : > { %6767 = vpow2.f32 %v3917_v41  ;;  %v3897_v30 = vsub.f32 %v8411_v28, %v3866_v59  ;;  %v3548_v41 = vmul.f32 1.442695, %v3527_v39  ;;  %v3529_v59 = vsub.f32 %v8387_v36, %v3505_v1 }
 0xec5   : > { %v3913_v25 = vmul.f32 1.442695, %v3897_v30  ;;  %v3552_v30 = vmul.f32 1.442695, %v3529_v59 }
 0xec6   : > { %v3872_v3 = vpop.xlane.xlu0 %3871 }
 0xec7   : > { %6769 = vpow2.f32 %v3913_v25  ;;  %v3900_v55 = vsub.f32 %v8415_v8, %v3872_v3 }
 0xec8   : > { %6771 = vpow2.f32 %v3546_v47  ;;  %v3511_v47 = vpop.xlane.xlu1 %3510 }
 0xec9   : > { %6773 = vpow2.f32 %v3550_v62  ;;  %v3919_v28 = vmul.f32 1.442695, %v3900_v55 }
 0xeca   : > { %v3868_v43 = vpop.xlane.xlu0 %3867 }
 0xecb   : > { %v3898_v23 = vsub.f32 %v8419_v49, %v3868_v43 }
 0xecd   : > { %v8534_v51 = vpop.eup %6767  ;;  %v3915_v4 = vmul.f32 1.442695, %v3898_v23  ;;  %v3532_v23 = vsub.f32 %v8397_v61, %v3511_v47 }
 0xece   : > { %3949 = vadd.xlane.f32.xlu1 %v8534_v51  ;;  %v3878_v26 = vpop.xlane.xlu0 %3877 }
 0xecf   : > { %6775 = vpow2.f32 %v3915_v4  ;;  %v3903_v22 = vsub.f32 %v8423_v7, %v3878_v26 }
 0xed0   : > { %6777 = vpow2.f32 %v3919_v28 }
 0xed1   : > { %v8539_v46 = vpop.eup %6769  ;;  %v3925_v8 = vmul.f32 1.442695, %v3903_v22 }
 0xed2   : > { %3945 = vadd.xlane.f32.xlu1 %v8539_v46  ;;  %v3874_v49 = vpop.xlane.xlu0 %3873  ;;  %v8544_v34 = vpop.eup %6771 }
 0xed3   : > { %6779 = vpow2.f32 %v3925_v8  ;;  %v3901_v50 = vsub.f32 %v8427_v0, %v3874_v49  ;;  %v8547_v25 = vpop.eup %6773  ;;  %v3558_v8 = vmul.f32 1.442695, %v3532_v23 }
 0xed4   : > { %6781 = vpow2.f32 %v3548_v41 }
 0xed5   : > { %v3921_v29 = vmul.f32 1.442695, %v3901_v50 }
 0xed6   : > { %3578 = vadd.xlane.f32.xlu1 %v8544_v34  ;;  %v3880_v7 = vpop.xlane.xlu0 %3879 }
 0xed7   : > { %6783 = vpow2.f32 %v3921_v29  ;;  %v3904_v0 = vsub.f32 %v8431_v18, %v3880_v7 }
 0xed8   : > { %6785 = vpow2.f32 %v3552_v30 }
 0xed9   : > { %v8549_v9 = vpop.eup %6775  ;;  %v3927_v4 = vmul.f32 1.442695, %v3904_v0 }
 0xeda   : > { %3582 = vadd.xlane.f32.xlu1 %v8547_v25  ;;  %3947 = vadd.xlane.f32.xlu0 %v8549_v9  ;;  %v3876_v36 = vpop.xlane.xlu0 %3875  ;;  %v8555_v3 = vpop.eup %6777 }
 0xedb   : > { %v3902_v1 = vsub.f32 %v8435_v5, %v3876_v36 }
 0xedd   : > { %v8557_v62 = vpop.eup %6779  ;;  %v3923_v55 = vmul.f32 1.442695, %v3902_v1 }
 0xede   : > { %3951 = vadd.xlane.f32.xlu0 %v8555_v3  ;;  %3957 = vadd.xlane.f32.xlu1 %v8557_v62  ;;  %v3507_v43 = vpop.xlane.xlu0 %3506  ;;  %v8563_v18 = vpop.eup %6781 }
 0xedf   : > { %6787 = vpow2.f32 %v3923_v55  ;;  %v3530_v39 = vsub.f32 %v8447_v60, %v3507_v43  ;;  %v3886_v28 = vpop.xlane.xlu1 %3885 }
 0xee0   : > { %6789 = vpow2.f32 %v3927_v4  ;;  %v3907_v61 = vsub.f32 %v8450_v12, %v3886_v28 }
 0xee1   : > { %v8565_v5 = vpop.eup %6783  ;;  %v3554_v26 = vmul.f32 1.442695, %v3530_v39 }
 0xee2   : > { %3580 = vadd.xlane.f32.xlu0 %v8563_v18  ;;  %3953 = vadd.xlane.f32.xlu1 %v8565_v5  ;;  %v3509_v22 = vpop.xlane.xlu0 %3508  ;;  %v8571_v49 = vpop.eup %6785  ;;  %v3933_v50 = vmul.f32 1.442695, %v3907_v61 }
 0xee3   : > { %v3531_v41 = vsub.f32 %v8457_v44, %v3509_v22  ;;  %6791 = vpow2.f32 %v3554_v26  ;;  %v3515_v30 = vpop.xlane.xlu1 %3514 }
 0xee4   : > { %6793 = vpow2.f32 %v3558_v8  ;;  %v3534_v12 = vsub.f32 %v8460_v10, %v3515_v30 }
 0xee5   : > { %v3556_v60 = vmul.f32 1.442695, %v3531_v41 }
 0xee6   : > { %3584 = vadd.xlane.f32.xlu0 %v8571_v49  ;;  %v3882_v59 = vpop.xlane.xlu0 %3881  ;;  %v3562_v23 = vmul.f32 1.442695, %v3534_v12 }
 0xee7   : > { %6795 = vpow2.f32 %v3556_v60  ;;  %v3905_v29 = vsub.f32 %v8465_v15, %v3882_v59 }
 0xee8   : > { %6797 = vpow2.f32 %v3933_v50 }
 0xee9   : > { %v8575_v7 = vpop.eup %6787  ;;  %v3929_v36 = vmul.f32 1.442695, %v3905_v29 }
 0xeea   : > { %3955 = vadd.xlane.f32.xlu0 %v8575_v7  ;;  %v3884_v44 = vpop.xlane.xlu0 %3883  ;;  %v8579_v0 = vpop.eup %6789 }
 0xeeb   : > { %v3906_v55 = vsub.f32 %v8471_v38, %v3884_v44  ;;  %6799 = vpow2.f32 %v3929_v36 }
 0xeed   : > { %v8581_v1 = vpop.eup %6791  ;;  %v3931_v26 = vmul.f32 1.442695, %v3906_v55 }
 0xeee   : > { %3959 = vadd.xlane.f32.xlu0 %v8579_v0  ;;  %v3513_v47 = vpop.xlane.xlu0 %3512  ;;  %3586 = vadd.xlane.f32.xlu1 %v8581_v1  ;;  %v8587_v4 = vpop.eup %6793 }
 0xeef   : > { %v3533_v15 = vsub.f32 %v8475_v40, %v3513_v47  ;;  %v3890_v43 = vpop.xlane.xlu1 %3889 }
 0xef0   : > { %v3909_v29 = vsub.f32 %v8480_v33, %v3890_v43 }
 0xef1   : > { %v3560_v10 = vmul.f32 1.442695, %v3533_v15  ;;  %v8589_v39 = vpop.eup %6795 }
 0xef2   : > { %v3888_v28 = vpop.xlane.xlu0 %3887  ;;  %3590 = vadd.xlane.f32.xlu1 %v8587_v4  ;;  %3588 = vadd.xlane.f32.xlu0 %v8589_v39  ;;  %v8595_v8 = vpop.eup %6797  ;;  %v3937_v36 = vmul.f32 1.442695, %v3909_v29 }
 0xef3   : > { %6801 = vpow2.f32 %v3560_v10  ;;  %v3908_v38 = vsub.f32 %v8486_v56, %v3888_v28  ;;  %v3519_v22 = vpop.xlane.xlu1 %3518 }
 0xef4   : > { %6803 = vpow2.f32 %v3562_v23  ;;  %v3536_v40 = vsub.f32 %v8489_v11, %v3519_v22 }
 0xef5   : > { %6805 = vpow2.f32 %v3931_v26  ;;  %v3935_v60 = vmul.f32 1.442695, %v3908_v38  ;;  %v8601_v30 = vpop.eup %6799 }
 0xef6   : > { %v3566_v41 = vmul.f32 1.442695, %v3536_v40  ;;  %v3517_v61 = vpop.xlane.xlu0 %3516  ;;  %3965 = vadd.xlane.f32.xlu1 %v8595_v8 }
 0xef7   : > { %v3535_v59 = vsub.f32 %v8495_v20, %v3517_v61  ;;  %v3894_v50 = vpop.xlane.xlu1 %3893 }
 0xef8   : > { %6807 = vpow2.f32 %v3566_v41  ;;  %v3911_v56 = vsub.f32 %v8498_v32, %v3894_v50 }
 0xef9   : > { %6809 = vpow2.f32 %v3935_v60  ;;  %v3564_v12 = vmul.f32 1.442695, %v3535_v59 }
 0xefa   : > { %v3941_v44 = vmul.f32 1.442695, %v3911_v56  ;;  %v3892_v11 = vpop.xlane.xlu0 %3891  ;;  %3961 = vadd.xlane.f32.xlu1 %v8601_v30 }
 0xefb   : > { %v3910_v20 = vsub.f32 %v8505_v31, %v3892_v11  ;;  %v3571_v26 = vpop.xlane.xlu1 %3570 }
 0xefc   : > { %6811 = vpow2.f32 %v3941_v44 }
 0xefd   : > { %v8604_v47 = vpop.eup %6801  ;;  %6813 = vpow2.f32 %v3564_v12  ;;  %v3939_v28 = vmul.f32 1.442695, %v3910_v20 }
 0xefe   : > { %v8606_v55 = vpop.eup %6803  ;;  %3592 = vadd.xlane.f32.xlu0 %v8604_v47  ;;  %v3521_v33 = vpop.xlane.xlu0 %3520  ;;  %6815 = vpow2.f32 %v3937_v36 }
 0xeff   : > { %3594 = vadd.xlane.f32.xlu1 %v8606_v55  ;;  %v3537_v32 = vsub.f32 %v8512_v2, %v3521_v33  ;;  %v8612_v15 = vpop.eup %6805  ;;  %v3575_v60 = vpop.xlane.xlu1 %3574 }
 0xf01   : > { %v3568_v43 = vmul.f32 1.442695, %v3537_v32  ;;  %v5692_v32 = vld [vmem:[%s9318_s5 + $0xa0] sm:$0xff] }
 0xf02   : > { %v8614_v23 = vpop.eup %6807  ;;  %3963 = vadd.xlane.f32.xlu0 %v8612_v15  ;;  %v3896_v10 = vpop.xlane.xlu0 %3895 }
 0xf03   : > { %6817 = vpow2.f32 %v3568_v43  ;;  %v3912_v38 = vsub.f32 %v8519_v63, %v3896_v10  ;;  %3598 = vadd.xlane.f32.xlu1 %v8614_v23  ;;  %v8619_v31 = vpop.eup %6809  ;;  %v5690_v10 = vld [vmem:[%s9318_s5 + $0x90] sm:$0xff] }
 0xf04   : > { %6819 = vrcp.f32 %v3571_v26  ;;  %v8655_v26 = vpop.f32.mrb[60].mxu0 }
 0xf05   : > { %6821 = vpow2.f32 %v3939_v28  ;;  %v3943_v40 = vmul.f32 1.442695, %v3912_v38  ;;  %v5691_v28 = vld [vmem:[%s9318_s5 + $0x98] sm:$0xff]  ;;  %v8657_v38 = vpop.f32.mrb[61].mxu0 }
 0xf06   : > { %v8621_v22 = vpop.eup %6811  ;;  %3967 = vadd.xlane.f32.xlu0 %v8619_v31  ;;  %v3573_v2 = vpop.xlane.xlu0 %3572 }
 0xf07   : > { %3973 = vadd.xlane.f32.xlu1 %v8621_v22  ;;  %6823 = vrcp.f32 %v3573_v2  ;;  %v8625_v41 = vpop.eup %6813 }
 0xf08   : > { %v8627_v61 = vpop.eup %6815  ;;  %6825 = vpow2.f32 %v3943_v40 }
 0xf0a   : > { %3596 = vadd.xlane.f32.xlu0 %v8625_v41  ;;  %v3577_v63 = vpop.xlane.xlu0 %3576 }
 0xf0b   : > { %3969 = vadd.xlane.f32.xlu1 %v8627_v61  ;;  %6827 = vrcp.f32 %v3577_v63 }
 0xf0c   : > { %6829 = vrcp.f32 %v3575_v60 }
 0xf0d   : > { %v8631_v59 = vpop.eup %6817 }
 0xf0e   : > { %3600 = vadd.xlane.f32.xlu0 %v8631_v59  ;;  %v6820_v50 = vpop.eup %6819 }
 0xf0f   : > { %v8634_v29 = vpop.eup %6821  ;;  %v3618_v44 = vmul.f32 %v6820_v50, %v8507_v52 }
 0xf11   : > { %v6824_v56 = vpop.eup %6823 }
 0xf12   : > { %3971 = vadd.xlane.f32.xlu0 %v8634_v29  ;;  %v3619_v11 = vmul.f32 %v6824_v56, %v8522_v24  ;;  %v8639_v12 = vpop.eup %6825 }
 0xf14   : > { %v3634_v36 = vpack.c.bf16 %v3619_v11, %v3618_v44 }
 0xf15   : > { %v6828_v33 = vpop.eup %6827 }
 0xf16   : > { %3975 = vadd.xlane.f32.xlu0 %v8639_v12  ;;  %6246 = vmatpush3.bf16.xpose.msra.mxu0 %v3634_v36  ;;  %v6830_v20 = vpop.eup %6829  ;;  %v3621_v43 = vmul.f32 %v6828_v33, %v8525_v21  ;;  %v5693_v21 = vld [vmem:[%s9318_s5 + $0xa8] sm:$0xff] }
 0xf17   : > { %6247 = vmatprep.subr.bf16.mxu0 %v9358_v13  ;;  %v3620_v52 = vmul.f32 %v6830_v20, %v8514_v37  ;;  %v8661_v37 = vpop.f32.mrb[62].mxu0 }
 0xf18   : > { %v8666_v2 = vpop.f32.mrb[63].mxu0 }
 0xf19   : > { %v3635_v24 = vpack.c.bf16 %v3621_v43, %v3620_v52 }
 0xf1c   : > { %3145 = vperm.xlu1 %6450, %v5692_v32  }
 0xf1e   : > { %6248 = vmatpush3.bf16.xpose.msra.mxu0 %v3635_v24 }
 0xf1f   : > { %6249 = vmatprep.subr.bf16.mxu0 %v9358_v13 }
 0xf20   : > { %3135 = vperm.xlu1 %6450, %v5690_v10  }
 0xf24   : > { %3140 = vperm.xlu1 %6450, %v5691_v28  }
 0xf28   : > { %4427 = vrot.lane.b32.xlu1 %v8299_v57, %s9360_s4 }
 0xf2c   : > { %4429 = vrot.lane.b32.xlu1 %v8305_v16, %s9360_s4  ;;  %3150 = vperm.xlu0 %6449, %v5693_v21  }
 0xf30   : > { %4431 = vrot.lane.b32.xlu1 %v8313_v6, %s9360_s4  ;;  %4060 = vrot.lane.b32.xlu0 %v8299_v57, %s9361_s0 }
 0xf34   : > { %4433 = vrot.lane.b32.xlu1 %v8319_v54, %s9360_s4  ;;  %4062 = vrot.lane.b32.xlu0 %v8305_v16, %s9361_s0 }
 0xf38   : > { %4435 = vrot.lane.b32.xlu1 %v8325_v27, %s9360_s4  ;;  %4064 = vrot.lane.b32.xlu0 %v8313_v6, %s9361_s0 }
 0xf3c   : > { %4437 = vrot.lane.b32.xlu1 %v8331_v53, %s9360_s4  ;;  %4066 = vrot.lane.b32.xlu0 %v8319_v54, %s9361_s0 }
 0xf40   : > { %4439 = vrot.lane.b32.xlu1 %v8337_v42, %s9360_s4  ;;  %4068 = vrot.lane.b32.xlu0 %v8325_v27, %s9361_s0 }
 0xf44   : > { %4441 = vrot.lane.b32.xlu1 %v8343_v48, %s9360_s4  ;;  %4070 = vrot.lane.b32.xlu0 %v8331_v53, %s9361_s0 }
 0xf48   : > { %4072 = vrot.lane.b32.xlu0 %v8337_v42, %s9361_s0 }
 0xf4c   : > { %4074 = vrot.lane.b32.xlu0 %v8343_v48, %s9361_s0 }
 0xf5b   : > { %v3950_v57 = vpop.xlane.xlu1 %3949 }
 0xf5f   : > { %v3946_v16 = vpop.xlane.xlu1 %3945 }
 0xf60   : > { %6831 = vrcp.f32 %v3946_v16 }
 0xf63   : > { %v3579_v6 = vpop.xlane.xlu1 %3578 }
 0xf67   : > { %v3583_v54 = vpop.xlane.xlu1 %3582  ;;  %v3948_v40 = vpop.xlane.xlu0 %3947 }
 0xf68   : > { %6833 = vrcp.f32 %v3948_v40 }
 0xf6a   : > { %v6832_v53 = vpop.eup %6831 }
 0xf6b   : > { %v3952_v27 = vpop.xlane.xlu0 %3951  ;;  %v3958_v63 = vpop.xlane.xlu1 %3957  ;;  %v3993_v48 = vmul.f32 %v6832_v53, %v8539_v46 }
 0xf6c   : > { %6835 = vrcp.f32 %v3952_v27 }
 0xf6d   : > { %6837 = vrcp.f32 %v3950_v57 }
 0xf6e   : > { %6839 = vrcp.f32 %v3579_v6 }
 0xf6f   : > { %v3581_v60 = vpop.xlane.xlu0 %3580  ;;  %v3954_v42 = vpop.xlane.xlu1 %3953 }
 0xf70   : > { %6841 = vrcp.f32 %v3581_v60 }
 0xf72   : > { %v6834_v50 = vpop.eup %6833 }
 0xf73   : > { %v3585_v56 = vpop.xlane.xlu0 %3584  ;;  %v3994_v44 = vmul.f32 %v6834_v50, %v8549_v9 }
 0xf74   : > { %6843 = vrcp.f32 %v3585_v56 }
 0xf75   : > { %6845 = vrcp.f32 %v3954_v42  ;;  %v4009_v11 = vpack.c.bf16 %v3994_v44, %v3993_v48 }
 0xf76   : > { %v6836_v36 = vpop.eup %6835  ;;  %6847 = vrcp.f32 %v3583_v54 }
 0xf77   : > { %v3956_v33 = vpop.xlane.xlu0 %3955  ;;  %v6838_v20 = vpop.eup %6837  ;;  %6284 = vmatpush3.bf16.xpose.msra.mxu1 %v4009_v11  ;;  %v3996_v43 = vmul.f32 %v6836_v36, %v8555_v3 }
 0xf78   : > { %6849 = vrcp.f32 %v3956_v33  ;;  %v6840_v32 = vpop.eup %6839  ;;  %6285 = vmatprep.subr.bf16.mxu1 %v9358_v13  ;;  %v3995_v28 = vmul.f32 %v6838_v20, %v8534_v51 }
 0xf79   : > { %v3622_v46 = vmul.f32 %v6840_v32, %v8544_v34 }
 0xf7a   : > { %v6842_v52 = vpop.eup %6841  ;;  %v4010_v57 = vpack.c.bf16 %v3996_v43, %v3995_v28 }
 0xf7b   : > { %v3960_v24 = vpop.xlane.xlu0 %3959  ;;  %v3587_v10 = vpop.xlane.xlu1 %3586  ;;  %v3623_v9 = vmul.f32 %v6842_v52, %v8563_v18 }
 0xf7c   : > { %6851 = vrcp.f32 %v3960_v24 }
 0xf7d   : > { %v3636_v21 = vpack.c.bf16 %v3623_v9, %v3622_v46  ;;  %6853 = vrcp.f32 %v3958_v63 }
 0xf7e   : > { %v6844_v16 = vpop.eup %6843  ;;  %6855 = vrcp.f32 %v3587_v10 }
 0xf7f   : > { %v6846_v6 = vpop.eup %6845  ;;  %v3591_v54 = vpop.xlane.xlu1 %3590  ;;  %6250 = vmatpush3.bf16.xpose.msra.mxu0 %v3636_v21  ;;  %6286 = vmatpush3.bf16.xpose.msra.mxu1 %v4010_v57  ;;  %v3625_v51 = vmul.f32 %v6844_v16, %v8571_v49 }
 0xf80   : > { %v3589_v3 = vpop.xlane.xlu0 %3588  ;;  %v6848_v40 = vpop.eup %6847  ;;  %6251 = vmatprep.subr.bf16.mxu0 %v9358_v13  ;;  %6287 = vmatprep.subr.bf16.mxu1 %v9358_v13  ;;  %v3997_v18 = vmul.f32 %v6846_v6, %v8565_v5 }
 0xf81   : > { %6857 = vrcp.f32 %v3589_v3  ;;  %v3624_v60 = vmul.f32 %v6848_v40, %v8547_v25 }
 0xf82   : > { %v6850_v34 = vpop.eup %6849  ;;  %6859 = vrcp.f32 %v3591_v54 }
 0xf83   : > { %v3998_v27 = vmul.f32 %v6850_v34, %v8575_v7  ;;  %v3966_v63 = vpop.xlane.xlu1 %3965  ;;  %v3637_v50 = vpack.c.bf16 %v3625_v51, %v3624_v60 }
 0xf85   : > { %v4011_v53 = vpack.c.bf16 %v3998_v27, %v3997_v18 }
 0xf86   : > { %v6852_v42 = vpop.eup %6851 }
 0xf87   : > { %v3962_v56 = vpop.xlane.xlu1 %3961  ;;  %6252 = vmatpush3.bf16.xpose.msra.mxu0 %v3637_v50  ;;  %6288 = vmatpush3.bf16.xpose.msra.mxu1 %v4011_v53  ;;  %v6854_v48 = vpop.eup %6853  ;;  %v4000_v5 = vmul.f32 %v6852_v42, %v8579_v0 }
 0xf88   : > { %6253 = vmatprep.subr.bf16.mxu0 %v9358_v13  ;;  %6289 = vmatprep.subr.bf16.mxu1 %v9358_v13  ;;  %v6856_v44 = vpop.eup %6855  ;;  %v3999_v25 = vmul.f32 %v6854_v48, %v8557_v62 }
 0xf89   : > { %v3626_v36 = vmul.f32 %v6856_v44, %v8581_v1 }
 0xf8a   : > { %v4012_v20 = vpack.c.bf16 %v4000_v5, %v3999_v25 }
 0xf8b   : > { %v3593_v49 = vpop.xlane.xlu0 %3592  ;;  %v6858_v7 = vpop.eup %6857 }
 0xf8c   : > { %v3595_v11 = vpop.xlane.xlu1 %3594  ;;  %6861 = vrcp.f32 %v3593_v49  ;;  %v3627_v33 = vmul.f32 %v6858_v7, %v8589_v39  ;;  %v6860_v24 = vpop.eup %6859 }
 0xf8d   : > { %6863 = vrcp.f32 %v3962_v56  ;;  %v3628_v10 = vmul.f32 %v6860_v24, %v8587_v4 }
 0xf8e   : > { %v3638_v32 = vpack.c.bf16 %v3627_v33, %v3626_v36 }
 0xf8f   : > { %v3964_v43 = vpop.xlane.xlu0 %3963  ;;  %6290 = vmatpush3.bf16.xpose.msra.mxu1 %v4012_v20 }
 0xf90   : > { %6865 = vrcp.f32 %v3964_v43  ;;  %v3599_v52 = vpop.xlane.xlu1 %3598  ;;  %6254 = vmatpush3.bf16.xpose.msra.mxu0 %v3638_v32  ;;  %6291 = vmatprep.subr.bf16.mxu1 %v9358_v13 }
 0xf91   : > { %6255 = vmatprep.subr.bf16.mxu0 %v9358_v13 }
 0xf93   : > { %v3968_v0 = vpop.xlane.xlu0 %3967 }
 0xf94   : > { %6867 = vrcp.f32 %v3968_v0  ;;  %v3974_v62 = vpop.xlane.xlu1 %3973 }
 0xf95   : > { %6869 = vrcp.f32 %v3966_v63 }
 0xf96   : > { %v6862_v1 = vpop.eup %6861  ;;  %6871 = vrcp.f32 %v3595_v11 }
 0xf97   : > { %v3597_v39 = vpop.xlane.xlu0 %3596  ;;  %v3629_v46 = vmul.f32 %v6862_v1, %v8604_v47  ;;  %v6864_v9 = vpop.eup %6863 }
 0xf98   : > { %6873 = vrcp.f32 %v3597_v39  ;;  %v3970_v57 = vpop.xlane.xlu1 %3969  ;;  %v4001_v6 = vmul.f32 %v6864_v9, %v8601_v30 }
 0xf99   : > { %v3639_v28 = vpack.c.bf16 %v3629_v46, %v3628_v10 }
 0xf9a   : > { %v6866_v21 = vpop.eup %6865 }
 0xf9b   : > { %6256 = vmatpush3.bf16.xpose.msra.mxu0 %v3639_v28  ;;  %v3601_v16 = vpop.xlane.xlu0 %3600  ;;  %v4002_v54 = vmul.f32 %v6866_v21, %v8612_v15 }
 0xf9c   : > { %6875 = vrcp.f32 %v3601_v16  ;;  %6257 = vmatprep.subr.bf16.mxu0 %v9358_v13  ;;  %v3146_v51 = vpop.permute.xlu1 %3145 }
 0xf9d   : > { %6877 = vrcp.f32 %v3599_v52  ;;  %v4013_v3 = vpack.c.bf16 %v4002_v54, %v4001_v6 }
 0xf9e   : > { %v6868_v40 = vpop.eup %6867  ;;  %6879 = vrcp.f32 %v3970_v57 }
 0xf9f   : > { %v6870_v4 = vpop.eup %6869  ;;  %6292 = vmatpush3.bf16.xpose.msra.mxu1 %v4013_v3  ;;  %v3972_v47 = vpop.xlane.xlu0 %3971  ;;  %v4004_v18 = vmul.f32 %v6868_v40, %v8619_v31 }
 0xfa0   : > { %v6872_v34 = vpop.eup %6871  ;;  %6881 = vrcp.f32 %v3972_v47  ;;  %6293 = vmatprep.subr.bf16.mxu1 %v9358_v13  ;;  %v4003_v60 = vmul.f32 %v6870_v4, %v8595_v8  ;;  %v3136_v56 = vpop.permute.xlu1 %3135 }
 0xfa1   : > { %v3630_v15 = vmul.f32 %v6872_v34, %v8606_v55 }
 0xfa2   : > { %v6874_v30 = vpop.eup %6873  ;;  %v4014_v50 = vpack.c.bf16 %v4004_v18, %v4003_v60 }
 0xfa3   : > { %v3976_v27 = vpop.xlane.xlu0 %3975  ;;  %v3631_v63 = vmul.f32 %v6874_v30, %v8625_v41  ;;  %v3270_v41 = vadd.f32 %v8292_v19, %v3136_v56  ;;  %v8771_v56 = vld [vmem:[%s7333_s25] ss:$0 sm:$0xff] }
 0xfa4   : > { %6883 = vrcp.f32 %v3976_v27  ;;  %v3141_v11 = vpop.permute.xlu1 %3140 }
 0xfa5   : > { %v3640_v53 = vpack.c.bf16 %v3631_v63, %v3630_v15  ;;  %6885 = vrcp.f32 %v3974_v62  ;;  %v4058_v20 = vpack.c.bf16 %v3270_v41, %v3270_v41 }
 0xfa6   : > { %v6876_v42 = vpop.eup %6875 }
 0xfa7   : > { %v6878_v48 = vpop.eup %6877  ;;  %6258 = vmatpush3.bf16.xpose.msra.mxu0 %v3640_v53  ;;  %6294 = vmatpush3.bf16.xpose.msra.mxu1 %v4014_v50  ;;  %v3633_v55 = vmul.f32 %v6876_v42, %v8631_v59  ;;  %v3278_v59 = vadd.f32 %v8657_v38, %v3146_v51  ;;  %v4101_v1 = vsel %vm1022_vm1, %v4058_v20, 0 }
 0xfa8   : > { %v6880_v44 = vpop.eup %6879  ;;  %6259 = vmatprep.subr.bf16.mxu0 %v9358_v13  ;;  %6295 = vmatprep.subr.bf16.mxu1 %v9358_v13  ;;  %v3632_v5 = vmul.f32 %v6878_v48, %v8614_v23  ;;  %v3273_v23 = vadd.f32 %v8294_v17, %v3141_v11 }
 0xfa9   : > { %v4005_v49 = vmul.f32 %v6880_v44, %v8627_v61  ;;  %v4428_v61 = vpop.permute.xlu1 %4427  ;;  %v3333_v0 = vpack.c.bf16 %v3278_v59, %v3278_v59 }
 0xfaa   : > { %v6882_v31 = vpop.eup %6881  ;;  %v3641_v25 = vpack.c.bf16 %v3633_v55, %v3632_v5  ;;  %v4425_v62 = vpack.c.bf16 %v3273_v23, %v3273_v23 }
 0xfab   : > { %v3151_v8 = vpop.permute.xlu0 %3150  ;;  %v4006_v7 = vmul.f32 %v6882_v31, %v8634_v29 }
 0xfac   : > { %v3281_v39 = vadd.f32 %v8666_v2, %v3151_v8  ;;  %v4468_v46 = vsel %vm1022_vm1, %v4425_v62, 0 }
 0xfad   : > { %v4015_v36 = vpack.c.bf16 %v4006_v7, %v4005_v49  ;;  %v4430_v10 = vpop.permute.xlu1 %4429 }
 0xfae   : > { %v6884_v33 = vpop.eup %6883  ;;  %v3684_v17 = vpack.c.bf16 %v3281_v39, %v3281_v39 }
 0xfaf   : > { %6260 = vmatpush3.bf16.xpose.msra.mxu0 %v3641_v25  ;;  %6296 = vmatpush3.bf16.xpose.msra.mxu1 %v4015_v36  ;;  %v4061_v32 = vpop.permute.xlu0 %4060  ;;  %v6886_v43 = vpop.eup %6885  ;;  %v4008_v19 = vmul.f32 %v6884_v33, %v8639_v12 }
 0xfb0   : > { %6433 = vmatprep.subr.msk.bf16.mxu0 %vm1022_vm1, %v4058_v20  ;;  %6297 = vmatprep.subr.bf16.mxu1 %v9358_v13  ;;  %v4007_v52 = vmul.f32 %v6886_v43, %v8621_v22 }
 0xfb1   : > { %v4432_v12 = vpop.permute.xlu1 %4431 }
 0xfb2   : > { %v4016_v24 = vpack.c.bf16 %v4008_v19, %v4007_v52 }
 0xfb3   : > { %v4063_v29 = vpop.permute.xlu0 %4062 }
 0xfb5   : > { %v4434_v9 = vpop.permute.xlu1 %4433 }
 0xfb6   : > { %6262 = vmatmul.mubr.bf16.vlgmr.msra.gmra.mrb[64].mxu0 %v3333_v0 }
 0xfb7   : > { %6298 = vmatpush3.bf16.xpose.msra.mxu1 %v4016_v24  ;;  %6304 = vmatpush3.bf16.msra.mxu0 %v4101_v1  ;;  %v4065_v38 = vpop.permute.xlu0 %4064 }
 0xfb8   : > { %6305 = vmatprep.mubr.msk.bf16.mxu0 %vm997_vm2, %v4061_v32  ;;  %6434 = vmatprep.subr.msk.bf16.mxu1 %vm1022_vm1, %v4425_v62 }
 0xfb9   : > { %6321 = vmatprep.subr.bf16.mxu0 %v9358_v13  ;;  %v4436_v21 = vpop.permute.xlu1 %4435 }
 0xfbb   : > { %v4067_v22 = vpop.permute.xlu0 %4066 }
 0xfbd   : > { %v4438_v16 = vpop.permute.xlu1 %4437 }
 0xfbe   : > { %6300 = vmatmul.mubr.bf16.vlgmr.msra.gmra.mrb[88].mxu1 %v3684_v17  ;;  %6306 = vmatmul.mubr.msk.bf16.vlgmr.msra.gmra.mrb[68].mxu0 %vm997_vm2, %v4063_v29 }
 0xfbf   : > { %6309 = vmatprep.mubr.msk.bf16.mxu0 %vm997_vm2, %v4065_v38  ;;  %6342 = vmatpush3.bf16.msra.mxu1 %v4468_v46  ;;  %v4069_v2 = vpop.permute.xlu0 %4068 }
 0xfc0   : > { %6343 = vmatprep.mubr.msk.bf16.mxu1 %vm997_vm2, %v4428_v61  ;;  %6359 = vmatprep.subr.bf16.mxu1 %v9358_v13 }
 0xfc1   : > { %v4440_v54 = vpop.permute.xlu1 %4439 }
 0xfc3   : > { %v4071_v28 = vpop.permute.xlu0 %4070 }
 0xfc5   : > { %v4442_v3 = vpop.permute.xlu1 %4441 }
 0xfc6   : > { %6310 = vmatmul.mubr.msk.bf16.gmra.mrb[72].mxu0 %vm997_vm2, %v4067_v22  ;;  %6344 = vmatmul.mubr.msk.bf16.vlgmr.msra.gmra.mrb[92].mxu1 %vm997_vm2, %v4430_v10 }
 0xfc7   : > { %6313 = vmatprep.mubr.msk.bf16.mxu0 %vm997_vm2, %v4069_v2  ;;  %6347 = vmatprep.mubr.msk.bf16.mxu1 %vm997_vm2, %v4432_v12  ;;  %v4073_v57 = vpop.permute.xlu0 %4072 }
 0xfcb   : > { %v4075_v6 = vpop.permute.xlu0 %4074 }
 0xfce   : > { %6314 = vmatmul.mubr.msk.bf16.gmra.mrb[76].mxu0 %vm997_vm2, %v4071_v28  ;;  %6348 = vmatmul.mubr.msk.bf16.gmra.mrb[96].mxu1 %vm997_vm2, %v4434_v9 }
 0xfcf   : > { %6317 = vmatprep.mubr.msk.bf16.mxu0 %vm997_vm2, %v4073_v57  ;;  %6351 = vmatprep.mubr.msk.bf16.mxu1 %vm997_vm2, %v4436_v21 }
 0xfd6   : > { %6318 = vmatmul.mubr.msk.bf16.gmra.mrb[80].mxu0 %vm997_vm2, %v4075_v6  ;;  %6352 = vmatmul.mubr.msk.bf16.gmra.mrb[100].mxu1 %vm997_vm2, %v4438_v16 }
 0xfd7   : > { %6355 = vmatprep.mubr.msk.bf16.mxu1 %vm997_vm2, %v4440_v54  ;;  %6337 = vmatprep.mubr.msk.bf16.mxu0 %vm7059_vm3, %v9358_v13 }
 0xfde   : > { %6356 = vmatmul.mubr.msk.bf16.gmra.mrb[104].mxu1 %vm997_vm2, %v4442_v3 }
 0xfdf   : > { %6375 = vmatprep.mubr.msk.bf16.mxu1 %vm7059_vm3, %v9358_v13 }
0x1089   : > { %v3676_v40 = vpop.f32.mrb[64].mxu0 }
0x108a   : > { %v6263_v4 = vpop.f32.mrb[65].mxu0 }
0x108b   : > { %v3679_v47 = vpop.f32.mrb[66].mxu0 }
0x108c   : > { %v6264_v34 = vpop.f32.mrb[67].mxu0 }
0x1091   : > { %v4051_v51 = vpop.f32.mrb[88].mxu1  ;;  %v6307_v18 = vpop.f32.mrb[68].mxu0 }
0x1092   : > { %v8768_v30 = vpack.c.bf16 %v4051_v51, %v3676_v40  ;;  %v6301_v27 = vpop.f32.mrb[89].mxu1  ;;  %v4137_v15 = vpop.f32.mrb[69].mxu0  ;;  %v4202_v55 = vmul.f32 0.35355338, %v6307_v18 }
0x1093   : > { %v4200_v63 = vmul.f32 0.35355338, %v4137_v15  ;;  %v4054_v60 = vpop.f32.mrb[90].mxu1  ;;  %v6308_v53 = vpop.f32.mrb[70].mxu0 }
0x1094   : > { %v6302_v50 = vpop.f32.mrb[91].mxu1  ;;  %v4140_v42 = vpop.f32.mrb[71].mxu0  ;;  %v8782_v7 = vadd.f32 %v8771_v56, %v4202_v55  ;;  %v4203_v61 = vmul.f32 0.35355338, %v6308_v53 }
0x1095   : > { %v8774_v48 = vadd.f32 %v8771_v56, %v4200_v63  ;;  %v4201_v44 = vmul.f32 0.35355338, %v4140_v42 }
0x1096   : > { %v8801_v12 = vadd.f32 %v8771_v56, %v4203_v61 }
0x1097   : > { %v8777_v31 = vadd.f32 %v8771_v56, %v4201_v44  ;;  %4232 = vmax.xlane.f32.xlu0 %v8774_v48 }
0x1099   : > { %v6345_v41 = vpop.f32.mrb[92].mxu1  ;;  %4234 = vmax.xlane.f32.xlu1 %v8777_v31  ;;  %v6311_v8 = vpop.f32.mrb[72].mxu0 }
0x109a   : > { %v4153_v5 = vpop.f32.mrb[73].mxu0  ;;  %v4504_v49 = vpop.f32.mrb[93].mxu1  ;;  %v4569_v11 = vmul.f32 0.35355338, %v6345_v41  ;;  %v4206_v2 = vmul.f32 0.35355338, %v6311_v8 }
0x109b   : > { %v4567_v25 = vmul.f32 0.35355338, %v4504_v49  ;;  %v6312_v36 = vpop.f32.mrb[74].mxu0  ;;  %v6346_v33 = vpop.f32.mrb[94].mxu1  ;;  %v4204_v23 = vmul.f32 0.35355338, %v4153_v5 }
0x109c   : > { %v4156_v20 = vpop.f32.mrb[75].mxu0  ;;  %v4507_v32 = vpop.f32.mrb[95].mxu1  ;;  %v8789_v19 = vadd.f32 %v8771_v56, %v4569_v11  ;;  %v4570_v46 = vmul.f32 0.35355338, %v6346_v33  ;;  %v8813_v3 = vadd.f32 %v8771_v56, %v4206_v2  ;;  %v4207_v60 = vmul.f32 0.35355338, %v6312_v36 }
0x109d   : > { %v8785_v43 = vadd.f32 %v8771_v56, %v4567_v25  ;;  %v4568_v59 = vmul.f32 0.35355338, %v4507_v32  ;;  %4236 = vmax.xlane.f32.xlu1 %v8782_v7  ;;  %v8797_v1 = vadd.f32 %v8771_v56, %v4204_v23  ;;  %v4205_v21 = vmul.f32 0.35355338, %v4156_v20 }
0x109e   : > { %v8809_v28 = vadd.f32 %v8771_v56, %v4570_v46  ;;  %v8833_v5 = vadd.f32 %v8771_v56, %v4207_v60 }
0x109f   : > { %4599 = vmax.xlane.f32.xlu0 %v8785_v43  ;;  %v8793_v29 = vadd.f32 %v8771_v56, %v4568_v59  ;;  %v8817_v18 = vadd.f32 %v8771_v56, %v4205_v21 }
0x10a1   : > { %v6349_v52 = vpop.f32.mrb[96].mxu1  ;;  %4603 = vmax.xlane.f32.xlu1 %v8789_v19  ;;  %v6315_v0 = vpop.f32.mrb[76].mxu0 }
0x10a2   : > { %v4169_v24 = vpop.f32.mrb[77].mxu0  ;;  %v4520_v62 = vpop.f32.mrb[97].mxu1  ;;  %v4573_v40 = vmul.f32 0.35355338, %v6349_v52  ;;  %v4210_v11 = vmul.f32 0.35355338, %v6315_v0 }
0x10a3   : > { %v4571_v38 = vmul.f32 0.35355338, %v4520_v62  ;;  %v6350_v39 = vpop.f32.mrb[98].mxu1  ;;  %4601 = vmax.xlane.f32.xlu0 %v8793_v29  ;;  %v6316_v10 = vpop.f32.mrb[78].mxu0  ;;  %v4208_v63 = vmul.f32 0.35355338, %v4169_v24 }
0x10a4   : > { %v4172_v17 = vpop.f32.mrb[79].mxu0  ;;  %v4523_v22 = vpop.f32.mrb[99].mxu1  ;;  %v8821_v15 = vadd.f32 %v8771_v56, %v4573_v40  ;;  %v4574_v49 = vmul.f32 0.35355338, %v6350_v39  ;;  %v8845_v20 = vadd.f32 %v8771_v56, %v4210_v11  ;;  %v4211_v0 = vmul.f32 0.35355338, %v6316_v10 }
0x10a5   : > { %4240 = vmax.xlane.f32.xlu1 %v8797_v1  ;;  %v8805_v9 = vadd.f32 %v8771_v56, %v4571_v38  ;;  %v4572_v27 = vmul.f32 0.35355338, %v4523_v22  ;;  %v8829_v44 = vadd.f32 %v8771_v56, %v4208_v63  ;;  %v4209_v33 = vmul.f32 0.35355338, %v4172_v17 }
0x10a6   : > { %v8841_v36 = vadd.f32 %v8771_v56, %v4574_v49  ;;  %v8865_v39 = vadd.f32 %v8771_v56, %v4211_v0 }
0x10a7   : > { %4238 = vmax.xlane.f32.xlu0 %v8801_v12  ;;  %v8825_v53 = vadd.f32 %v8771_v56, %v4572_v27  ;;  %v8849_v59 = vadd.f32 %v8771_v56, %v4209_v33 }
0x10a9   : > { %v6353_v57 = vpop.f32.mrb[100].mxu1  ;;  %4607 = vmax.xlane.f32.xlu1 %v8805_v9  ;;  %v6319_v16 = vpop.f32.mrb[80].mxu0 }
0x10aa   : > { %v4185_v6 = vpop.f32.mrb[81].mxu0  ;;  %v4536_v54 = vpop.f32.mrb[101].mxu1  ;;  %v4577_v32 = vmul.f32 0.35355338, %v6353_v57  ;;  %v4214_v22 = vmul.f32 0.35355338, %v6319_v16 }
0x10ab   : > { %v6354_v4 = vpop.f32.mrb[102].mxu1  ;;  %4605 = vmax.xlane.f32.xlu0 %v8809_v28  ;;  %v6320_v47 = vpop.f32.mrb[82].mxu0  ;;  %v4575_v55 = vmul.f32 0.35355338, %v4536_v54  ;;  %v4212_v52 = vmul.f32 0.35355338, %v4185_v6 }
0x10ac   : > { %v4188_v34 = vpop.f32.mrb[83].mxu0  ;;  %v4539_v51 = vpop.f32.mrb[103].mxu1  ;;  %v8853_v61 = vadd.f32 %v8771_v56, %v4577_v32  ;;  %v4578_v17 = vmul.f32 0.35355338, %v6354_v4  ;;  %v8877_v21 = vadd.f32 %v8771_v56, %v4214_v22  ;;  %v4215_v40 = vmul.f32 0.35355338, %v6320_v47 }
0x10ad   : > { %4244 = vmax.xlane.f32.xlu1 %v8813_v3  ;;  %v8837_v25 = vadd.f32 %v8771_v56, %v4575_v55  ;;  %v4576_v23 = vmul.f32 0.35355338, %v4539_v51  ;;  %v8861_v62 = vadd.f32 %v8771_v56, %v4212_v52  ;;  %v4213_v2 = vmul.f32 0.35355338, %v4188_v34 }
0x10ae   : > { %v8873_v46 = vadd.f32 %v8771_v56, %v4578_v17  ;;  %v8894_v34 = vadd.f32 %v8771_v56, %v4215_v40 }
0x10af   : > { %4242 = vmax.xlane.f32.xlu0 %v8817_v18  ;;  %v8857_v24 = vadd.f32 %v8771_v56, %v4576_v23  ;;  %v8881_v6 = vadd.f32 %v8771_v56, %v4213_v2 }
0x10b1   : > { %v6357_v50 = vpop.f32.mrb[104].mxu1  ;;  %4611 = vmax.xlane.f32.xlu1 %v8821_v15 }
0x10b2   : > { %v4552_v42 = vpop.f32.mrb[105].mxu1  ;;  %v4581_v57 = vmul.f32 0.35355338, %v6357_v50 }
0x10b3   : > { %v6358_v41 = vpop.f32.mrb[106].mxu1  ;;  %4609 = vmax.xlane.f32.xlu0 %v8825_v53  ;;  %v4579_v38 = vmul.f32 0.35355338, %v4552_v42 }
0x10b4   : > { %v4555_v8 = vpop.f32.mrb[107].mxu1  ;;  %v8885_v54 = vadd.f32 %v8771_v56, %v4581_v57  ;;  %v4582_v51 = vmul.f32 0.35355338, %v6358_v41 }
0x10b5   : > { %4248 = vmax.xlane.f32.xlu1 %v8829_v44  ;;  %v8869_v10 = vadd.f32 %v8771_v56, %v4579_v38  ;;  %v4580_v16 = vmul.f32 0.35355338, %v4555_v8 }
0x10b6   : > { %v8898_v27 = vadd.f32 %v8771_v56, %v4582_v51 }
0x10b7   : > { %4246 = vmax.xlane.f32.xlu0 %v8833_v5  ;;  %v8889_v4 = vadd.f32 %v8771_v56, %v4580_v16 }
0x10b9   : > { %4615 = vmax.xlane.f32.xlu1 %v8837_v25 }
0x10bb   : > { %4613 = vmax.xlane.f32.xlu0 %v8841_v36 }
0x10bd   : > { %4252 = vmax.xlane.f32.xlu1 %v8845_v20 }
0x10bf   : > { %4250 = vmax.xlane.f32.xlu0 %v8849_v59 }
0x10c1   : > { %4619 = vmax.xlane.f32.xlu1 %v8853_v61 }
0x10c3   : > { %4617 = vmax.xlane.f32.xlu0 %v8857_v24 }
0x10c5   : > { %4256 = vmax.xlane.f32.xlu1 %v8861_v62 }
0x10c7   : > { %4254 = vmax.xlane.f32.xlu0 %v8865_v39 }
0x10c9   : > { %4623 = vmax.xlane.f32.xlu1 %v8869_v10 }
0x10cb   : > { %4621 = vmax.xlane.f32.xlu0 %v8873_v46 }
0x10cd   : > { %4260 = vmax.xlane.f32.xlu1 %v8877_v21 }
0x10cf   : > { %4258 = vmax.xlane.f32.xlu0 %v8881_v6 }
0x10d1   : > { %4627 = vmax.xlane.f32.xlu1 %v8885_v54 }
0x10d3   : > { %4625 = vmax.xlane.f32.xlu0 %v8889_v4 }
0x10d7   : > { %4262 = vmax.xlane.f32.xlu0 %v8894_v34 }
0x10db   : > { %4629 = vmax.xlane.f32.xlu0 %v8898_v27 }
0x1124   : > { %v4233_v47 = vpop.xlane.xlu0 %4232 }
0x1125   : > { %v4264_v50 = vsub.f32 %v8774_v48, %v4233_v47 }
0x1126   : > { %v4235_v63 = vpop.xlane.xlu1 %4234 }
0x1127   : > { %v4280_v11 = vmul.f32 1.442695, %v4264_v50  ;;  %v4265_v0 = vsub.f32 %v8777_v31, %v4235_v63 }
0x112a   : > { %v4237_v60 = vpop.xlane.xlu1 %4236 }
0x112b   : > { %v4266_v42 = vsub.f32 %v8782_v7, %v4237_v60 }
0x112c   : > { %v4600_v55 = vpop.xlane.xlu0 %4599 }
0x112d   : > { %v4284_v8 = vmul.f32 1.442695, %v4266_v42  ;;  %v4631_v56 = vsub.f32 %v8785_v43, %v4600_v55 }
0x112e   : > { %v4604_v49 = vpop.xlane.xlu1 %4603 }
0x112f   : > { %6887 = vpow2.f32 %v4284_v8  ;;  %v4633_v41 = vsub.f32 %v8789_v19, %v4604_v49  ;;  %v4647_v7 = vmul.f32 1.442695, %v4631_v56  ;;  %v4282_v19 = vmul.f32 1.442695, %v4265_v0 }
0x1130   : > { %v4602_v33 = vpop.xlane.xlu0 %4601  ;;  %6889 = vpow2.f32 %v4280_v11 }
0x1131   : > { %v4651_v23 = vmul.f32 1.442695, %v4633_v41  ;;  %v4632_v16 = vsub.f32 %v8793_v29, %v4602_v33 }
0x1132   : > { %v4241_v32 = vpop.xlane.xlu1 %4240 }
0x1133   : > { %6891 = vpow2.f32 %v4651_v23  ;;  %v4268_v17 = vsub.f32 %v8797_v1, %v4241_v32  ;;  %v4649_v1 = vmul.f32 1.442695, %v4632_v16 }
0x1134   : > { %v4239_v52 = vpop.xlane.xlu0 %4238 }
0x1135   : > { %v4267_v48 = vsub.f32 %v8801_v12, %v4239_v52  ;;  %v4288_v31 = vmul.f32 1.442695, %v4268_v17 }
0x1136   : > { %v4608_v38 = vpop.xlane.xlu1 %4607 }
0x1137   : > { %v4286_v22 = vmul.f32 1.442695, %v4267_v48 }
0x1138   : > { %v4606_v2 = vpop.xlane.xlu0 %4605 }
0x1139   : > { %v8908_v57 = vpop.eup %6887  ;;  %6893 = vpow2.f32 %v4286_v22  ;;  %v4634_v63 = vsub.f32 %v8809_v28, %v4606_v2  ;;  %v4635_v28 = vsub.f32 %v8805_v9, %v4608_v38 }
0x113a   : > { %v4245_v43 = vpop.xlane.xlu1 %4244  ;;  %4316 = vadd.xlane.f32.xlu1 %v8908_v57  ;;  %6895 = vpow2.f32 %v4647_v7  ;;  %v8913_v51 = vpop.eup %6889 }
0x113b   : > { %v4270_v12 = vsub.f32 %v8813_v3, %v4245_v43  ;;  %6897 = vpow2.f32 %v4282_v19  ;;  %v4653_v55 = vmul.f32 1.442695, %v4634_v63  ;;  %v4655_v23 = vmul.f32 1.442695, %v4635_v28 }
0x113c   : > { %v4243_v40 = vpop.xlane.xlu0 %4242  ;;  %6899 = vpow2.f32 %v4288_v31 }
0x113d   : > { %v4292_v29 = vmul.f32 1.442695, %v4270_v12  ;;  %v8918_v42 = vpop.eup %6891  ;;  %6901 = vpow2.f32 %v4649_v1  ;;  %v4269_v3 = vsub.f32 %v8817_v18, %v4243_v40 }
0x113e   : > { %v4612_v47 = vpop.xlane.xlu1 %4611  ;;  %4312 = vadd.xlane.f32.xlu1 %v8913_v51 }
0x113f   : > { %v4637_v60 = vsub.f32 %v8821_v15, %v4612_v47  ;;  %6903 = vpow2.f32 %v4292_v29  ;;  %v4290_v33 = vmul.f32 1.442695, %v4269_v3 }
0x1140   : > { %v4610_v50 = vpop.xlane.xlu0 %4609  ;;  %6905 = vpow2.f32 %v4653_v55 }
0x1141   : > { %v4659_v11 = vmul.f32 1.442695, %v4637_v60  ;;  %v4636_v48 = vsub.f32 %v8825_v53, %v4610_v50 }
0x1142   : > { %v4249_v8 = vpop.xlane.xlu1 %4248  ;;  %4683 = vadd.xlane.f32.xlu1 %v8918_v42 }
0x1143   : > { %v8922_v49 = vpop.eup %6893  ;;  %6907 = vpow2.f32 %v4659_v11  ;;  %v4272_v9 = vsub.f32 %v8829_v44, %v4249_v8  ;;  %v4657_v19 = vmul.f32 1.442695, %v4636_v48 }
0x1144   : > { %4318 = vadd.xlane.f32.xlu0 %v8922_v49  ;;  %v4247_v41 = vpop.xlane.xlu0 %4246  ;;  %v8926_v15 = vpop.eup %6895  ;;  %6909 = vpow2.f32 %v4290_v33 }
0x1145   : > { %v4271_v32 = vsub.f32 %v8833_v5, %v4247_v41  ;;  %v8930_v18 = vpop.eup %6897  ;;  %6911 = vpow2.f32 %v4655_v23  ;;  %v4296_v17 = vmul.f32 1.442695, %v4272_v9 }
0x1146   : > { %v4616_v56 = vpop.xlane.xlu1 %4615  ;;  %4679 = vadd.xlane.f32.xlu1 %v8926_v15  ;;  %v8934_v0 = vpop.eup %6899 }
0x1147   : > { %v4294_v38 = vmul.f32 1.442695, %v4271_v32  ;;  %v8938_v5 = vpop.eup %6901  ;;  %v4639_v29 = vsub.f32 %v8837_v25, %v4616_v56 }
0x1148   : > { %4314 = vadd.xlane.f32.xlu0 %v8930_v18  ;;  %v4614_v52 = vpop.xlane.xlu0 %4613 }
0x1149   : > { %v8942_v2 = vpop.eup %6903  ;;  %6913 = vpow2.f32 %v4294_v38  ;;  %v4638_v16 = vsub.f32 %v8841_v36, %v4614_v52  ;;  %v4663_v28 = vmul.f32 1.442695, %v4639_v29 }
0x114a   : > { %v4253_v7 = vpop.xlane.xlu1 %4252  ;;  %4320 = vadd.xlane.f32.xlu1 %v8934_v0  ;;  %v8946_v43 = vpop.eup %6905  ;;  %6915 = vpow2.f32 %v4296_v17 }
0x114b   : > { %v4274_v22 = vsub.f32 %v8845_v20, %v4253_v7  ;;  %6917 = vpow2.f32 %v4657_v19  ;;  %v4661_v1 = vmul.f32 1.442695, %v4638_v16 }
0x114c   : > { %4681 = vadd.xlane.f32.xlu0 %v8938_v5  ;;  %v4251_v44 = vpop.xlane.xlu0 %4250 }
0x114d   : > { %v4300_v31 = vmul.f32 1.442695, %v4274_v22  ;;  %v8950_v40 = vpop.eup %6907  ;;  %v4273_v63 = vsub.f32 %v8849_v59, %v4251_v44 }
0x114e   : > { %v4620_v53 = vpop.xlane.xlu1 %4619  ;;  %4324 = vadd.xlane.f32.xlu1 %v8942_v2  ;;  %v8954_v36 = vpop.eup %6909 }
0x114f   : > { %v4641_v12 = vsub.f32 %v8853_v61, %v4620_v53  ;;  %6919 = vpow2.f32 %v4300_v31  ;;  %v8958_v50 = vpop.eup %6911  ;;  %v4298_v55 = vmul.f32 1.442695, %v4273_v63 }
0x1150   : > { %4685 = vadd.xlane.f32.xlu0 %v8946_v43  ;;  %v4618_v20 = vpop.xlane.xlu0 %4617  ;;  %6921 = vpow2.f32 %v4661_v1 }
0x1151   : > { %v4667_v60 = vmul.f32 1.442695, %v4641_v12  ;;  %v4640_v33 = vsub.f32 %v8857_v24, %v4618_v20 }
0x1152   : > { %v4257_v47 = vpop.xlane.xlu1 %4256  ;;  %4691 = vadd.xlane.f32.xlu1 %v8950_v40 }
0x1153   : > { %v8962_v59 = vpop.eup %6913  ;;  %6923 = vpow2.f32 %v4667_v60  ;;  %v4276_v25 = vsub.f32 %v8861_v62, %v4257_v47  ;;  %v4665_v48 = vmul.f32 1.442695, %v4640_v33 }
0x1154   : > { %4322 = vadd.xlane.f32.xlu0 %v8954_v36  ;;  %v4255_v61 = vpop.xlane.xlu0 %4254  ;;  %v8966_v41 = vpop.eup %6915  ;;  %6925 = vpow2.f32 %v4298_v55 }
0x1155   : > { %v4275_v3 = vsub.f32 %v8865_v39, %v4255_v61  ;;  %v8970_v39 = vpop.eup %6917  ;;  %6927 = vpow2.f32 %v4663_v28  ;;  %v4304_v23 = vmul.f32 1.442695, %v4276_v25 }
0x1156   : > { %v4624_v8 = vpop.xlane.xlu1 %4623  ;;  %4687 = vadd.xlane.f32.xlu1 %v8958_v50 }
0x1157   : > { %v4302_v32 = vmul.f32 1.442695, %v4275_v3  ;;  %v4643_v53 = vsub.f32 %v8869_v10, %v4624_v8 }
0x1158   : > { %4326 = vadd.xlane.f32.xlu0 %v8962_v59  ;;  %v4622_v11 = vpop.xlane.xlu0 %4621 }
0x1159   : > { %v8974_v52 = vpop.eup %6919  ;;  %6929 = vpow2.f32 %v4302_v32  ;;  %v4642_v38 = vsub.f32 %v8873_v46, %v4622_v11  ;;  %v4671_v63 = vmul.f32 1.442695, %v4643_v53  ;;  %v5754_v53 = vld [vmem:[%s9321_s8 + $0x30] sm:$0xff] }
0x115a   : > { %v4261_v56 = vpop.xlane.xlu1 %4260  ;;  %4328 = vadd.xlane.f32.xlu1 %v8966_v41  ;;  %v8978_v7 = vpop.eup %6921  ;;  %6931 = vpow2.f32 %v4304_v23  ;;  %v5744_v23 = vld [vmem:[%s9320_s7 + $0x20] sm:$0xff] }
0x115b   : > { %v4278_v9 = vsub.f32 %v8877_v21, %v4261_v56  ;;  %6933 = vpow2.f32 %v4665_v48  ;;  %v4669_v19 = vmul.f32 1.442695, %v4642_v38  ;;  %v5694_v56 = vld [vmem:[%s9318_s5 + $0xb0] sm:$0xff]  ;;  %v5695_v48 = vld [vmem:[%s9318_s5 + $0xb8] sm:$0xff]  ;;  %v5753_v38 = vld [vmem:[%s9321_s8 + $0x28] sm:$0xff] }
0x115c   : > { %4689 = vadd.xlane.f32.xlu0 %v8970_v39  ;;  %v4259_v62 = vpop.xlane.xlu0 %4258 }
0x115d   : > { %v4308_v17 = vmul.f32 1.442695, %v4278_v9  ;;  %v8982_v44 = vpop.eup %6923  ;;  %v4277_v16 = vsub.f32 %v8881_v6, %v4259_v62  ;;  %v5745_v9 = vld [vmem:[%s9320_s7 + $0x28] sm:$0xff]  ;;  %v5747_v62 = vld [vmem:[%s9320_s7 + $0x38] sm:$0xff] }
0x115e   : > { %v4628_v24 = vpop.xlane.xlu1 %4627  ;;  %4332 = vadd.xlane.f32.xlu1 %v8974_v52  ;;  %v8986_v46 = vpop.eup %6925 }
0x115f   : > { %v4645_v22 = vsub.f32 %v8885_v54, %v4628_v24  ;;  %6935 = vpow2.f32 %v4308_v17  ;;  %v8990_v12 = vpop.eup %6927  ;;  %v4306_v20 = vmul.f32 1.442695, %v4277_v16  ;;  %v5746_v24 = vld [vmem:[%s9320_s7 + $0x30] sm:$0xff]  ;;  %v5757_v17 = vld [vmem:[%s9322_s9 + $0x28] sm:$0xff]  ;;  %v5759_v16 = vld [vmem:[%s9322_s9 + $0x38] sm:$0xff] }
0x1160   : > { %4693 = vadd.xlane.f32.xlu0 %v8978_v7  ;;  %v4626_v21 = vpop.xlane.xlu0 %4625  ;;  %6937 = vpow2.f32 %v4669_v19  ;;  %v5756_v19 = vld [vmem:[%s9322_s9 + $0x20] sm:$0xff] }
0x1161   : > { %v4675_v31 = vmul.f32 1.442695, %v4645_v22  ;;  %v4644_v47 = vsub.f32 %v8889_v4, %v4626_v21  ;;  %v5752_v22 = vld [vmem:[%s9321_s8 + $0x20] sm:$0xff]  ;;  %v5755_v21 = vld [vmem:[%s9321_s8 + $0x38] sm:$0xff] }
0x1162   : > { %4699 = vadd.xlane.f32.xlu1 %v8982_v44 }
0x1163   : > { %v8994_v6 = vpop.eup %6929  ;;  %6939 = vpow2.f32 %v4675_v31  ;;  %v4673_v55 = vmul.f32 1.442695, %v4644_v47  ;;  %v5769_v31 = vld [vmem:[%s9324_s11 + $0x48] sm:$0xff]  ;;  %v5770_v47 = vld [vmem:[%s9324_s11 + $0x50] sm:$0xff] }
0x1164   : > { %4330 = vadd.xlane.f32.xlu0 %v8986_v46  ;;  %v4263_v54 = vpop.xlane.xlu0 %4262  ;;  %v8997_v10 = vpop.eup %6931  ;;  %6941 = vpow2.f32 %v4306_v20  ;;  %v5771_v20 = vld [vmem:[%s9324_s11 + $0x58] sm:$0xff] }
0x1165   : > { %v4279_v1 = vsub.f32 %v8894_v34, %v4263_v54  ;;  %v9001_v61 = vpop.eup %6933  ;;  %6943 = vpow2.f32 %v4671_v63  ;;  %v5758_v54 = vld [vmem:[%s9322_s9 + $0x30] sm:$0xff]  ;;  %v5773_v63 = vld [vmem:[%s9324_s11 + $0x68] sm:$0xff] }
0x1166   : > { %4695 = vadd.xlane.f32.xlu1 %v8990_v12 }
0x1167   : > { %v4310_v29 = vmul.f32 1.442695, %v4279_v1  ;;  %v5768_v1 = vld [vmem:[%s9324_s11 + $0x40] sm:$0xff] }
0x1168   : > { %4334 = vadd.xlane.f32.xlu0 %v8994_v6  ;;  %v4630_v60 = vpop.xlane.xlu0 %4629 }
0x1169   : > { %v9004_v34 = vpop.eup %6935  ;;  %6945 = vpow2.f32 %v4310_v29  ;;  %v4646_v3 = vsub.f32 %v8898_v27, %v4630_v60  ;;  %v5775_v29 = vld [vmem:[%s9324_s11 + $0x78] sm:$0xff]  ;;  %v5772_v60 = vld [vmem:[%s9324_s11 + $0x60] sm:$0xff] }
0x116a   : > { %4336 = vadd.xlane.f32.xlu1 %v8997_v10  ;;  %v9008_v8 = vpop.eup %6937  ;;  %6947 = vpow2.f32 %v4673_v55  ;;  %v5789_v55 = vld [vmem:[%s9326_s13 + $0x28] sm:$0xff] }
0x116b   : > { %v4677_v28 = vmul.f32 1.442695, %v4646_v3  ;;  %v5774_v3 = vld [vmem:[%s9324_s11 + $0x70] sm:$0xff] }
0x116c   : > { %4697 = vadd.xlane.f32.xlu0 %v9001_v61 }
0x116d   : > { %v9011_v4 = vpop.eup %6939  ;;  %6949 = vpow2.f32 %v4677_v28  ;;  %v5791_v28 = vld [vmem:[%s9326_s13 + $0x38] sm:$0xff] }
0x116e   : > { %4340 = vadd.xlane.f32.xlu1 %v9004_v34  ;;  %v9014_v25 = vpop.eup %6941 }
0x116f   : > { %v9017_v11 = vpop.eup %6943 }
0x1170   : > { %4701 = vadd.xlane.f32.xlu0 %v9008_v8 }
0x1172   : > { %4707 = vadd.xlane.f32.xlu1 %v9011_v4 }
0x1173   : > { %v9020_v27 = vpop.eup %6945 }
0x1174   : > { %4338 = vadd.xlane.f32.xlu0 %v9014_v25  ;;  %v9023_v33 = vpop.eup %6947 }
0x1176   : > { %4703 = vadd.xlane.f32.xlu1 %v9017_v11 }
0x1177   : > { %v9026_v32 = vpop.eup %6949 }
0x1178   : > { %4342 = vadd.xlane.f32.xlu0 %v9020_v27 }
0x117c   : > { %4705 = vadd.xlane.f32.xlu0 %v9023_v33 }
0x1180   : > { %4709 = vadd.xlane.f32.xlu0 %v9026_v32 }
0x1187   : > { %3155 = vperm.xlu1 %6450, %v5694_v56   ;;  %v5788_v56 = vld [vmem:[%s9326_s13 + $0x20] sm:$0xff] }
0x118b   : > { %4810 = vperm.xlu1 %6450, %v5744_v23   ;;  %v5797_v23 = vld [vmem:[%s9327_s14 + $0x28] sm:$0xff] }
0x118f   : > { %4815 = vperm.xlu1 %6450, %v5745_v9   ;;  %v5790_v9 = vld [vmem:[%s9326_s13 + $0x30] sm:$0xff] }
0x1193   : > { %4825 = vperm.xlu1 %6450, %v5747_v62   ;;  %v5801_v62 = vld [vmem:[%s9328_s15 + $0x28] sm:$0xff] }
0x1196   : > { %3160 = vperm.xlu0 %6449, %v5695_v48   ;;  %v5796_v48 = vld [vmem:[%s9327_s14 + $0x20] sm:$0xff] }
0x1197   : > { %4948 = vperm.xlu1 %6450, %v5753_v38   ;;  %v5799_v38 = vld [vmem:[%s9327_s14 + $0x38] sm:$0xff] }
0x119a   : > { %4820 = vperm.xlu0 %6449, %v5746_v24  }
0x119b   : > { %4972 = vperm.xlu1 %6450, %v5757_v17   ;;  %v5800_v17 = vld [vmem:[%s9328_s15 + $0x20] sm:$0xff] }
0x119e   : > { %4943 = vperm.xlu0 %6449, %v5752_v22   ;;  %v5803_v22 = vld [vmem:[%s9328_s15 + $0x38] sm:$0xff] }
0x119f   : > { %4958 = vperm.xlu1 %6450, %v5755_v21  }
0x11a2   : > { %4967 = vperm.xlu0 %6449, %v5756_v19   ;;  %v5798_v19 = vld [vmem:[%s9327_s14 + $0x30] sm:$0xff] }
0x11a3   : > { %4982 = vperm.xlu1 %6450, %v5759_v16  }
0x11a6   : > { %4953 = vperm.xlu0 %6449, %v5754_v53   ;;  %v5802_v53 = vld [vmem:[%s9328_s15 + $0x30] sm:$0xff] }
0x11a7   : > { %5016 = vperm.xlu1 %6450, %v5769_v31  }
0x11aa   : > { %4977 = vperm.xlu0 %6449, %v5758_v54  }
0x11ab   : > { %5026 = vperm.xlu1 %6450, %v5771_v20  }
0x11ae   : > { %5011 = vperm.xlu0 %6449, %v5768_v1  }
0x11af   : > { %5036 = vperm.xlu1 %6450, %v5773_v63  }
0x11b2   : > { %5021 = vperm.xlu0 %6449, %v5770_v47  }
0x11b3   : > { %5046 = vperm.xlu1 %6450, %v5775_v29  }
0x11b6   : > { %5031 = vperm.xlu0 %6449, %v5772_v60  }
0x11b7   : > { %5239 = vperm.xlu1 %6450, %v5789_v55  }
0x11ba   : > { %5041 = vperm.xlu0 %6449, %v5774_v3  }
0x11bb   : > { %5249 = vperm.xlu1 %6450, %v5791_v28  }
0x11be   : > { %5234 = vperm.xlu0 %6449, %v5788_v56  }
0x11bf   : > { %5372 = vperm.xlu1 %6450, %v5797_v23  }
0x11c2   : > { %5244 = vperm.xlu0 %6449, %v5790_v9  }
0x11c3   : > { %5396 = vperm.xlu1 %6450, %v5801_v62  }
0x11c6   : > { %5367 = vperm.xlu0 %6449, %v5796_v48  }
0x11c7   : > { %v4317_v24 = vpop.xlane.xlu1 %4316  ;;  %5382 = vperm.xlu1 %6450, %v5799_v38  }
0x11ca   : > { %5391 = vperm.xlu0 %6449, %v5800_v17  }
0x11cb   : > { %v4313_v21 = vpop.xlane.xlu1 %4312  ;;  %5406 = vperm.xlu1 %6450, %v5803_v22  }
0x11cc   : > { %6951 = vrcp.f32 %v4313_v21 }
0x11ce   : > { %5377 = vperm.xlu0 %6449, %v5798_v19  }
0x11cf   : > { %v4684_v16 = vpop.xlane.xlu1 %4683 }
0x11d1   : > { %v4319_v31 = vpop.xlane.xlu0 %4318 }
0x11d2   : > { %5401 = vperm.xlu0 %6449, %v5802_v53  }
0x11d3   : > { %v4680_v54 = vpop.xlane.xlu1 %4679 }
0x11d5   : > { %v4315_v20 = vpop.xlane.xlu0 %4314 }
0x11d6   : > { %6953 = vrcp.f32 %v4315_v20  ;;  %v6952_v60 = vpop.eup %6951 }
0x11d7   : > { %v4321_v1 = vpop.xlane.xlu1 %4320  ;;  %6955 = vrcp.f32 %v4680_v54  ;;  %v4360_v56 = vmul.f32 %v6952_v60, %v8913_v51 }
0x11d8   : > { %6957 = vrcp.f32 %v4319_v31 }
0x11d9   : > { %v4682_v63 = vpop.xlane.xlu0 %4681 }
0x11da   : > { %6959 = vrcp.f32 %v4682_v63 }
0x11db   : > { %v4325_v47 = vpop.xlane.xlu1 %4324  ;;  %6961 = vrcp.f32 %v4317_v24 }
0x11dd   : > { %v4686_v29 = vpop.xlane.xlu0 %4685 }
0x11de   : > { %6963 = vrcp.f32 %v4686_v29 }
0x11df   : > { %v4692_v55 = vpop.xlane.xlu1 %4691  ;;  %6965 = vrcp.f32 %v4684_v16 }
0x11e0   : > { %v6954_v3 = vpop.eup %6953 }
0x11e1   : > { %v4323_v28 = vpop.xlane.xlu0 %4322  ;;  %v4361_v23 = vmul.f32 %v6954_v3, %v8930_v18  ;;  %v6956_v9 = vpop.eup %6955 }
0x11e2   : > { %6967 = vrcp.f32 %v4323_v28  ;;  %v6958_v62 = vpop.eup %6957  ;;  %v4727_v22 = vmul.f32 %v6956_v9, %v8926_v15 }
0x11e3   : > { %v4688_v48 = vpop.xlane.xlu1 %4687  ;;  %v4376_v38 = vpack.c.bf16 %v4361_v23, %v4360_v56  ;;  %6969 = vrcp.f32 %v4321_v1  ;;  %v4363_v18 = vmul.f32 %v6958_v62, %v8922_v49 }
0x11e4   : > { %v6960_v17 = vpop.eup %6959  ;;  %6971 = vrcp.f32 %v4688_v48 }
0x11e5   : > { %6322 = vmatpush3.bf16.xpose.msra.mxu0 %v4376_v38  ;;  %v4327_v24 = vpop.xlane.xlu0 %4326  ;;  %v4728_v21 = vmul.f32 %v6960_v17, %v8938_v5  ;;  %v6962_v19 = vpop.eup %6961 }
0x11e6   : > { %6323 = vmatprep.subr.bf16.mxu0 %v9358_v13  ;;  %6973 = vrcp.f32 %v4327_v24  ;;  %v4362_v54 = vmul.f32 %v6962_v19, %v8908_v57 }
0x11e7   : > { %v4329_v16 = vpop.xlane.xlu1 %4328  ;;  %v4743_v51 = vpack.c.bf16 %v4728_v21, %v4727_v22 }
0x11e8   : > { %v6964_v53 = vpop.eup %6963  ;;  %v4377_v5 = vpack.c.bf16 %v4363_v18, %v4362_v54 }
0x11e9   : > { %6360 = vmatpush3.bf16.xpose.msra.mxu1 %v4743_v51  ;;  %v4690_v31 = vpop.xlane.xlu0 %4689  ;;  %v6966_v20 = vpop.eup %6965  ;;  %v4730_v1 = vmul.f32 %v6964_v53, %v8946_v43 }
0x11ea   : > { %6975 = vrcp.f32 %v4690_v31  ;;  %6361 = vmatprep.subr.bf16.mxu1 %v9358_v13  ;;  %v4729_v49 = vmul.f32 %v6966_v20, %v8918_v42 }
0x11eb   : > { %v4333_v15 = vpop.xlane.xlu1 %4332  ;;  %6977 = vrcp.f32 %v4325_v47 }
0x11ec   : > { %v6968_v63 = vpop.eup %6967  ;;  %v4744_v57 = vpack.c.bf16 %v4730_v1, %v4729_v49 }
0x11ed   : > { %6324 = vmatpush3.bf16.xpose.msra.mxu0 %v4377_v5  ;;  %v4694_v29 = vpop.xlane.xlu0 %4693  ;;  %v6970_v60 = vpop.eup %6969  ;;  %v4365_v28 = vmul.f32 %v6968_v63, %v8954_v36 }
0x11ee   : > { %6979 = vrcp.f32 %v4694_v29  ;;  %6325 = vmatprep.subr.bf16.mxu0 %v9358_v13  ;;  %v4364_v23 = vmul.f32 %v6970_v60, %v8934_v0  ;;  %v6972_v43 = vpop.eup %6971 }
0x11ef   : > { %v4700_v3 = vpop.xlane.xlu1 %4699  ;;  %6981 = vrcp.f32 %v4692_v55  ;;  %v4731_v38 = vmul.f32 %v6972_v43, %v8958_v50 }
0x11f0   : > { %v6974_v47 = vpop.eup %6973  ;;  %v4378_v42 = vpack.c.bf16 %v4365_v28, %v4364_v23 }
0x11f1   : > { %6362 = vmatpush3.bf16.xpose.msra.mxu1 %v4744_v57  ;;  %v4331_v56 = vpop.xlane.xlu0 %4330  ;;  %v4367_v24 = vmul.f32 %v6974_v47, %v8962_v59 }
0x11f2   : > { %6983 = vrcp.f32 %v4331_v56  ;;  %6363 = vmatprep.subr.bf16.mxu1 %v9358_v13 }
0x11f3   : > { %v4696_v9 = vpop.xlane.xlu1 %4695  ;;  %6985 = vrcp.f32 %v4329_v16 }
0x11f4   : > { %v6976_v62 = vpop.eup %6975  ;;  %6987 = vrcp.f32 %v4696_v9 }
0x11f5   : > { %6326 = vmatpush3.bf16.xpose.msra.mxu0 %v4378_v42  ;;  %v4335_v48 = vpop.xlane.xlu0 %4334  ;;  %v4732_v36 = vmul.f32 %v6976_v62, %v8970_v39  ;;  %v6978_v55 = vpop.eup %6977 }
0x11f6   : > { %6327 = vmatprep.subr.bf16.mxu0 %v9358_v13  ;;  %6989 = vrcp.f32 %v4335_v48  ;;  %v4366_v19 = vmul.f32 %v6978_v55, %v8942_v2 }
0x11f7   : > { %v4337_v17 = vpop.xlane.xlu1 %4336  ;;  %v4745_v0 = vpack.c.bf16 %v4732_v36, %v4731_v38 }
0x11f8   : > { %v6980_v22 = vpop.eup %6979  ;;  %v4379_v39 = vpack.c.bf16 %v4367_v24, %v4366_v19 }
0x11f9   : > { %6364 = vmatpush3.bf16.xpose.msra.mxu1 %v4745_v0  ;;  %v4698_v21 = vpop.xlane.xlu0 %4697  ;;  %v6982_v16 = vpop.eup %6981  ;;  %v4734_v51 = vmul.f32 %v6980_v22, %v8978_v7 }
0x11fa   : > { %6991 = vrcp.f32 %v4698_v21  ;;  %6365 = vmatprep.subr.bf16.mxu1 %v9358_v13  ;;  %v4733_v59 = vmul.f32 %v6982_v16, %v8950_v40 }
0x11fb   : > { %v4341_v50 = vpop.xlane.xlu1 %4340  ;;  %6993 = vrcp.f32 %v4333_v15 }
0x11fc   : > { %v6984_v18 = vpop.eup %6983  ;;  %v4746_v2 = vpack.c.bf16 %v4734_v51, %v4733_v59 }
0x11fd   : > { %6328 = vmatpush3.bf16.xpose.msra.mxu0 %v4379_v39  ;;  %v4702_v53 = vpop.xlane.xlu0 %4701  ;;  %v6986_v31 = vpop.eup %6985  ;;  %v4369_v20 = vmul.f32 %v6984_v18, %v8986_v46 }
0x11fe   : > { %6995 = vrcp.f32 %v4702_v53  ;;  %6329 = vmatprep.subr.bf16.mxu0 %v9358_v13  ;;  %v4368_v1 = vmul.f32 %v6986_v31, %v8966_v41  ;;  %v6988_v7 = vpop.eup %6987 }
0x11ff   : > { %v4708_v54 = vpop.xlane.xlu1 %4707  ;;  %6997 = vrcp.f32 %v4700_v3  ;;  %v4735_v60 = vmul.f32 %v6988_v7, %v8990_v12 }
0x1200   : > { %v6990_v15 = vpop.eup %6989  ;;  %v4380_v63 = vpack.c.bf16 %v4369_v20, %v4368_v1  ;;  %v6472_v20 = vld [vmem:[%s9319_s6 + $0x18] sm:$0xff]  }
0x1201   : > { %6366 = vmatpush3.bf16.xpose.msra.mxu1 %v4746_v2  ;;  %v4339_v5 = vpop.xlane.xlu0 %4338  ;;  %v4371_v41 = vmul.f32 %v6990_v15, %v8994_v6 }
0x1202   : > { %6999 = vrcp.f32 %v4339_v5  ;;  %6367 = vmatprep.subr.bf16.mxu1 %v9358_v13  ;;  %v6473_v5 = vld [vmem:[%s9323_s10 + $0x20] sm:$0xff]  }
0x1203   : > { %7001 = vrcp.f32 %v4337_v17  ;;  %v4704_v29 = vpop.xlane.xlu1 %4703 }
0x1204   : > { %v6992_v40 = vpop.eup %6991  ;;  %7003 = vrcp.f32 %v4704_v29 }
0x1205   : > { %6330 = vmatpush3.bf16.xpose.msra.mxu0 %v4380_v63  ;;  %v4343_v49 = vpop.xlane.xlu0 %4342  ;;  %v4736_v46 = vmul.f32 %v6992_v40, %v9001_v61  ;;  %v6994_v3 = vpop.eup %6993 }
0x1206   : > { %6331 = vmatprep.subr.bf16.mxu0 %v9358_v13  ;;  %7005 = vrcp.f32 %v4343_v49  ;;  %v4370_v23 = vmul.f32 %v6994_v3, %v8974_v52 }
0x1207   : > { %v4747_v57 = vpack.c.bf16 %v4736_v46, %v4735_v60  ;;  %v3156_v19 = vpop.permute.xlu1 %3155 }
0x1208   : > { %v6996_v28 = vpop.eup %6995  ;;  %v4381_v12 = vpack.c.bf16 %v4371_v41, %v4370_v23 }
0x1209   : > { %6368 = vmatpush3.bf16.xpose.msra.mxu1 %v4747_v57  ;;  %v4706_v56 = vpop.xlane.xlu0 %4705  ;;  %v6998_v43 = vpop.eup %6997  ;;  %v4738_v61 = vmul.f32 %v6996_v28, %v9008_v8 }
0x120a   : > { %7007 = vrcp.f32 %v4706_v56  ;;  %6369 = vmatprep.subr.bf16.mxu1 %v9358_v13  ;;  %v4737_v6 = vmul.f32 %v6998_v43, %v8982_v44 }
0x120b   : > { %7009 = vrcp.f32 %v4341_v50  ;;  %v4811_v1 = vpop.permute.xlu1 %4810 }
0x120c   : > { %v7000_v47 = vpop.eup %6999  ;;  %v4748_v62 = vpack.c.bf16 %v4738_v61, %v4737_v6 }
0x120d   : > { %6332 = vmatpush3.bf16.xpose.msra.mxu0 %v4381_v12  ;;  %v4710_v9 = vpop.xlane.xlu0 %4709  ;;  %v7002_v42 = vpop.eup %7001  ;;  %v4373_v52 = vmul.f32 %v7000_v47, %v9014_v25 }
0x120e   : > { %7011 = vrcp.f32 %v4710_v9  ;;  %6333 = vmatprep.subr.bf16.mxu0 %v9358_v13  ;;  %v4372_v48 = vmul.f32 %v7002_v42, %v8997_v10  ;;  %v7004_v38 = vpop.eup %7003 }
0x120f   : > { %7013 = vrcp.f32 %v4708_v54  ;;  %v4739_v44 = vmul.f32 %v7004_v38, %v9017_v11  ;;  %v4816_v7 = vpop.permute.xlu1 %4815 }
0x1210   : > { %v7006_v8 = vpop.eup %7005  ;;  %v4382_v36 = vpack.c.bf16 %v4373_v52, %v4372_v48 }
0x1211   : > { %6370 = vmatpush3.bf16.xpose.msra.mxu1 %v4748_v62  ;;  %v4375_v25 = vmul.f32 %v7006_v8, %v9020_v27 }
0x1212   : > { %6371 = vmatprep.subr.bf16.mxu1 %v9358_v13 }
0x1213   : > { %v4826_v57 = vpop.permute.xlu1 %4825 }
0x1214   : > { %v7008_v55 = vpop.eup %7007 }
0x1215   : > { %6334 = vmatpush3.bf16.xpose.msra.mxu0 %v4382_v36  ;;  %v4740_v17 = vmul.f32 %v7008_v55, %v9023_v33  ;;  %v7010_v0 = vpop.eup %7009  ;;  %v3286_v33 = vadd.f32 %v8655_v26, %v3156_v19  ;;  %v3161_v39 = vpop.permute.xlu0 %3160  ;;  %v6471_v26 = vld [vmem:[%s9319_s6 + $0x10] sm:$0xff]  }
0x1216   : > { %6335 = vmatprep.subr.bf16.mxu0 %v9358_v13  ;;  %v4374_v10 = vmul.f32 %v7010_v0, %v9004_v34  ;;  %v3289_v34 = vadd.f32 %v8661_v37, %v3161_v39 }
0x1217   : > { %v4749_v24 = vpack.c.bf16 %v4740_v17, %v4739_v44  ;;  %v4059_v51 = vpack.c.bf16 %v3286_v33, %v3286_v33 }
0x1218   : > { %v7012_v22 = vpop.eup %7011  ;;  %v4383_v16 = vpack.c.bf16 %v4375_v25, %v4374_v10  ;;  %v4426_v18 = vpack.c.bf16 %v3289_v34, %v3289_v34 }
0x1219   : > { %6372 = vmatpush3.bf16.xpose.msra.mxu1 %v4749_v24  ;;  %v7014_v21 = vpop.eup %7013  ;;  %v4742_v50 = vmul.f32 %v7012_v22, %v9026_v32  ;;  %v4821_v49 = vpop.permute.xlu0 %4820 }
0x121a   : > { %6373 = vmatprep.subr.bf16.mxu1 %v9358_v13  ;;  %v4741_v11 = vmul.f32 %v7014_v21, %v9011_v4 }
0x121c   : > { %v4750_v27 = vpack.c.bf16 %v4742_v50, %v4741_v11  ;;  %v4949_v50 = vpop.permute.xlu1 %4948 }
0x121d   : > { %6336 = vmatpush3.bf16.xpose.msra.mxu0 %v4383_v16  ;;  %v4944_v11 = vpop.permute.xlu0 %4943 }
0x121e   : > { %6379 = vmatprep.subr.bf16.mxu0 %v8768_v30 }
0x1221   : > { %6374 = vmatpush3.bf16.xpose.msra.mxu1 %v4750_v27  ;;  %v4973_v27 = vpop.permute.xlu1 %4972 }
0x1222   : > { %6419 = vmatprep.subr.bf16.mxu1 %v9358_v13 }
0x1224   : > { %6338 = vmatmul.mubr.bf16.vlgmr.msra.gmra.mrb[84].mxu0 %v4059_v51  ;;  %v4968_v51 = vpop.permute.xlu0 %4967 }
0x1225   : > { %6380 = vmatpush3.bf16.msra.mxu0 %v8768_v30  ;;  %6383 = vmatprep.mubr.msk.bf16.mxu0 %vm855_vm0, %v6471_v26  ;;  %v4959_v34 = vpop.permute.xlu1 %4958 }
0x1228   : > { %6376 = vmatmul.mubr.bf16.vlgmr.msra.gmra.mrb[108].mxu1 %v4426_v18  ;;  %v4954_v18 = vpop.permute.xlu0 %4953 }
0x1229   : > { %6423 = vmatprep.mubr.msk.bf16.mxu1 %vm7059_vm3, %v9358_v13 }
0x12f7   : > { %v4418_v4 = vpop.f32.mrb[84].mxu0 }
0x12f8   : > { %v6339_v32 = vpop.f32.mrb[85].mxu0 }
0x12f9   : > { %v4421_v53 = vpop.f32.mrb[86].mxu0 }
0x12fa   : > { %v6340_v37 = vpop.f32.mrb[87].mxu0 }
0x12fb   : > { %v4785_v59 = vpop.f32.mrb[108].mxu1 }
0x12fc   : > { %v4802_v31 = vpack.c.bf16 %v4785_v59, %v4418_v4  ;;  %v6377_v54 = vpop.f32.mrb[109].mxu1 }
0x12fd   : > { %v4788_v2 = vpop.f32.mrb[110].mxu1 }
0x12fe   : > { %v6378_v30 = vpop.f32.mrb[111].mxu1  ;;  %6381 = vmatprep.subr.bf16.mxu0 %v4802_v31 }
0x12ff   : > { %6382 = vmatpush3.bf16.msra.mxu0 %v4802_v31  ;;  %v4983_v30 = vpop.permute.xlu1 %4982 }
0x1302   : > { %6384 = vmatmul.mubr.msk.bf16.vlgmr.msra.gmra.mrb[88].mxu0 %vm855_vm0, %v6472_v20  ;;  %v4978_v20 = vpop.permute.xlu0 %4977 }
0x1303   : > { %6391 = vmatprep.mubr.msk.bf16.mxu0 %vm855_vm0, %v6473_v5 }
0x13d5   : > { %v6385_v15 = vpop.f32.mrb[88].mxu0 }
0x13d6   : > { %v4878_v63 = vpop.f32.mrb[89].mxu0  ;;  %v4887_v46 = vadd.f32 %v6385_v15, %v4821_v49  ;;  %v6475_v49 = vld [vmem:[%s9323_s10 + $0x30] sm:$0xff]  }
0x13d7   : > { %v4879_v40 = vadd.f32 %v4878_v63, %v4811_v1  ;;  %v6386_v29 = vpop.f32.mrb[90].mxu0 }
0x13d8   : > { %v4881_v60 = vpop.f32.mrb[91].mxu0  ;;  %v4890_v28 = vadd.f32 %v6386_v29, %v4826_v57  ;;  %v4895_v23 = vadd.f32 %v4887_v46, %v8271_v45  ;;  %v6474_v29 = vld [vmem:[%s9323_s10 + $0x28] sm:$0xff]   ;;  %v6477_v46 = vld [vmem:[%s9325_s12 + $0x10] sm:$0xff]   ;;  %v5017_v57 = vpop.permute.xlu1 %5016 }
0x13d9   : > { %v4882_v3 = vadd.f32 %v4881_v60, %v4816_v7  ;;  %v4893_v41 = vadd.f32 %v4879_v40, %v8267_v14  ;;  %v6476_v60 = vld [vmem:[%s9323_s10 + $0x38] sm:$0xff]  }
0x13da   : > { %v4896_v12 = vadd.f32 %v4890_v28, %v8273_v58 }
0x13db   : > { %v4894_v56 = vadd.f32 %v4882_v3, %v8269_v35  ;;  %v5012_v3 = vpop.permute.xlu0 %5011 }
0x13dc   : > { %v5027_v28 = vpop.permute.xlu1 %5026 }
0x13dd   : > { %v4907_v43 = vadd.f32 %v4894_v56, %v4893_v41 }
0x13df   : > { %v4908_v61 = vadd.f32 %v4907_v43, %v4895_v23 }
0x13e1   : > { %v4909_v47 = vadd.f32 %v4908_v61, %v4896_v12 }
0x13e3   : > { %v4910_v9 = vrot.slane %v4909_v47, 4 }
0x13e5   : > { %v4911_v6 = vadd.f32 %v4910_v9, %v4909_v47 }
0x13e7   : > { %v4912_v42 = vrot.slane %v4911_v6, 2 }
0x13e9   : > { %v4913_v62 = vadd.f32 %v4912_v42, %v4911_v6 }
0x13eb   : > { %v4914_v52 = vrot.slane %v4913_v62, 1 }
0x13ed   : > { %v4915_v48 = vadd.f32 %v4914_v52, %v4913_v62  ;;  %v5037_v62 = vpop.permute.xlu1 %5036 }
0x13ef   : > { %v4916_v38 = vmul.f32 0.03125, %v4915_v48 }
0x13f1   : > { %v4917_v8 = vsub.f32 %v4893_v41, %v4916_v38  ;;  %v4918_v36 = vsub.f32 %v4894_v56, %v4916_v38  ;;  %v4919_v14 = vsub.f32 %v4895_v23, %v4916_v38  ;;  %v4920_v55 = vsub.f32 %v4896_v12, %v4916_v38  ;;  %v5022_v41 = vpop.permute.xlu0 %5021 }
0x13f3   : > { %v4921_v44 = vmul.f32 %v4917_v8, %v4917_v8  ;;  %v4922_v35 = vmul.f32 %v4918_v36, %v4918_v36  ;;  %v4923_v17 = vmul.f32 %v4919_v14, %v4919_v14  ;;  %v4924_v0 = vmul.f32 %v4920_v55, %v4920_v55 }
0x13f5   : > { %v4925_v45 = vadd.f32 %v4922_v35, %v4921_v44  ;;  %v5032_v12 = vpop.permute.xlu0 %5031 }
0x13f7   : > { %v4926_v24 = vadd.f32 %v4925_v45, %v4923_v17 }
0x13f9   : > { %v4927_v58 = vadd.f32 %v4926_v24, %v4924_v0  ;;  %v5042_v35 = vpop.permute.xlu0 %5041 }
0x13fb   : > { %v4928_v25 = vrot.slane %v4927_v58, 4 }
0x13fd   : > { %v4929_v22 = vadd.f32 %v4928_v25, %v4927_v58 }
0x13ff   : > { %v4930_v10 = vrot.slane %v4929_v22, 2 }
0x1401   : > { %v4931_v21 = vadd.f32 %v4930_v10, %v4929_v22  ;;  %v5047_v10 = vpop.permute.xlu1 %5046 }
0x1403   : > { %v4932_v19 = vrot.slane %v4931_v21, 1 }
0x1405   : > { %v4933_v16 = vadd.f32 %v4932_v19, %v4931_v21 }
0x1407   : > { %v4934_v33 = vmul.f32 0.03125, %v4933_v16 }
0x1409   : > { %v4935_v39 = vadd.f32 1e-12, %v4934_v33 }
0x140b   : > { %7015 = vrsqrt.f32 %v4935_v39 }
0x1415   : > { %v7016_v26 = vpop.eup %7015 }
0x1416   : > { %v4938_v4 = vmul.f32 %v7016_v26, %v4918_v36  ;;  %v4937_v32 = vmul.f32 %v7016_v26, %v4917_v8  ;;  %v4939_v53 = vmul.f32 %v7016_v26, %v4919_v14  ;;  %v4940_v37 = vmul.f32 %v7016_v26, %v4920_v55 }
0x1418   : > { %v4961_v59 = vmul.f32 %v4944_v11, %v4937_v32  ;;  %v4962_v31 = vmul.f32 %v4949_v50, %v4938_v4  ;;  %v4963_v54 = vmul.f32 %v4954_v18, %v4939_v53  ;;  %v4964_v2 = vmul.f32 %v4959_v34, %v4940_v37 }
0x141a   : > { %v9200_v5 = vadd.f32 %v4968_v51, %v4961_v59  ;;  %v9202_v1 = vadd.f32 %v4973_v27, %v4962_v31  ;;  %v9204_v7 = vadd.f32 %v4978_v20, %v4963_v54  ;;  %v9206_v15 = vadd.f32 %v4983_v30, %v4964_v2 }
0x141c   : > { %v4998_v63 = vpack.c.bf16 %v9202_v1, %v9200_v5  ;;  %v4999_v40 = vpack.c.bf16 %v9206_v15, %v9204_v7 }
0x141e   : > { %6387 = vmatprep.subr.bf16.mxu0 %v4998_v63 }
0x141f   : > { %6388 = vmatpush3.bf16.msra.mxu0 %v4998_v63 }
0x1420   : > { %6389 = vmatprep.subr.bf16.mxu0 %v4999_v40 }
0x1423   : > { %6390 = vmatpush3.bf16.msra.mxu0 %v4999_v40 }
0x1426   : > { %6392 = vmatmul.mubr.msk.bf16.vlgmr.msra.gmra.mrb[92].mxu0 %vm855_vm0, %v6474_v29 }
0x1427   : > { %6395 = vmatprep.mubr.msk.bf16.mxu0 %vm855_vm0, %v6475_v49 }
0x142e   : > { %6396 = vmatmul.mubr.msk.bf16.gmra.mrb[96].mxu0 %vm855_vm0, %v6476_v60 }
0x142f   : > { %6407 = vmatprep.mubr.msk.bf16.mxu0 %vm2925_vm4, %v6477_v46 }
0x14f9   : > { %v6393_v56 = vpop.f32.mrb[92].mxu0 }
0x14fa   : > { %v9228_v23 = vadd.f32 %v6393_v56, %v5022_v41  ;;  %v5115_v43 = vpop.f32.mrb[93].mxu0 }
0x14fb   : > { %v9230_v61 = vadd.f32 %v5115_v43, %v5012_v3  ;;  %v6394_v47 = vpop.f32.mrb[94].mxu0 }
0x14fc   : > { %v5156_v9 = vmul.f32 0.044715, %v9228_v23  ;;  %v9233_v6 = vadd.f32 %v6394_v47, %v5027_v28  ;;  %v5118_v42 = vpop.f32.mrb[95].mxu0 }
0x14fd   : > { %v5154_v52 = vmul.f32 0.044715, %v9230_v61  ;;  %v9236_v48 = vadd.f32 %v5118_v42, %v5017_v57 }
0x14fe   : > { %v5164_v38 = vmul.f32 %v5156_v9, %v9228_v23  ;;  %v5157_v8 = vmul.f32 0.044715, %v9233_v6 }
0x14ff   : > { %v5162_v36 = vmul.f32 %v5154_v52, %v9230_v61  ;;  %v5155_v14 = vmul.f32 0.044715, %v9236_v48  ;;  %v5148_v52 = vmul.f32 0.5, %v9228_v23 }
0x1500   : > { %v5172_v55 = vmul.f32 %v5164_v38, %v9228_v23  ;;  %v5165_v44 = vmul.f32 %v5157_v8, %v9233_v6  ;;  %v5149_v38 = vmul.f32 0.5, %v9233_v6 }
0x1501   : > { %v5170_v17 = vmul.f32 %v5162_v36, %v9230_v61  ;;  %v5163_v45 = vmul.f32 %v5155_v14, %v9236_v48  ;;  %v6397_v0 = vpop.f32.mrb[96].mxu0  ;;  %v5146_v36 = vmul.f32 0.5, %v9230_v61  ;;  %v5147_v14 = vmul.f32 0.5, %v9236_v48 }
0x1502   : > { %v5173_v24 = vmul.f32 %v5165_v44, %v9233_v6  ;;  %v9247_v58 = vadd.f32 %v6397_v0, %v5042_v35  ;;  %v5131_v25 = vpop.f32.mrb[97].mxu0  ;;  %v5180_v22 = vadd.f32 %v5172_v55, %v9228_v23 }
0x1503   : > { %v5171_v21 = vmul.f32 %v5163_v45, %v9236_v48  ;;  %v9251_v19 = vadd.f32 %v5131_v25, %v5032_v12  ;;  %v6398_v16 = vpop.f32.mrb[98].mxu0  ;;  %v5178_v50 = vadd.f32 %v5170_v17, %v9230_v61 }
0x1504   : > { %v5160_v11 = vmul.f32 0.044715, %v9247_v58  ;;  %v5143_v33 = vadd.f32 %v6398_v16, %v5047_v10  ;;  %v5134_v39 = vpop.f32.mrb[99].mxu0  ;;  %v5181_v27 = vadd.f32 %v5173_v24, %v9233_v6  ;;  %v5188_v51 = vmul.f32 0.7978846, %v5180_v22 }
0x1505   : > { %v5158_v34 = vmul.f32 0.044715, %v9251_v19  ;;  %v5135_v18 = vadd.f32 %v5134_v39, %v5037_v62  ;;  %v5179_v26 = vadd.f32 %v5171_v21, %v9236_v48  ;;  %v5186_v4 = vmul.f32 0.7978846, %v5178_v50 }
0x1506   : > { %v5168_v32 = vmul.f32 %v5160_v11, %v9247_v58  ;;  %v5161_v53 = vmul.f32 0.044715, %v5143_v33  ;;  %v5189_v37 = vmul.f32 0.7978846, %v5181_v27  ;;  %7017 = vtanh.f32 %v5188_v51 }
0x1507   : > { %v5166_v59 = vmul.f32 %v5158_v34, %v9251_v19  ;;  %v5159_v31 = vmul.f32 0.044715, %v5135_v18  ;;  %v5187_v54 = vmul.f32 0.7978846, %v5179_v26  ;;  %7019 = vtanh.f32 %v5186_v4 }
0x1508   : > { %v5176_v2 = vmul.f32 %v5168_v32, %v9247_v58  ;;  %v5169_v30 = vmul.f32 %v5161_v53, %v5143_v33  ;;  %7021 = vtanh.f32 %v5189_v37  ;;  %v5152_v6 = vmul.f32 0.5, %v9247_v58 }
0x1509   : > { %v5174_v20 = vmul.f32 %v5166_v59, %v9251_v19  ;;  %v5167_v63 = vmul.f32 %v5159_v31, %v5135_v18  ;;  %7023 = vtanh.f32 %v5187_v54  ;;  %v5153_v61 = vmul.f32 0.5, %v5143_v33 }
0x150a   : > { %v5177_v40 = vmul.f32 %v5169_v30, %v5143_v33  ;;  %v5184_v29 = vadd.f32 %v5176_v2, %v9247_v58  ;;  %v5150_v48 = vmul.f32 0.5, %v9251_v19  ;;  %v5151_v11 = vmul.f32 0.5, %v5135_v18  ;;  %v6478_v58 = vld [vmem:[%s9325_s12 + $0x18] sm:$0xff]  }
0x150b   : > { %v5175_v49 = vmul.f32 %v5167_v63, %v5135_v18  ;;  %v5182_v60 = vadd.f32 %v5174_v20, %v9251_v19  ;;  %v6479_v19 = vld [vmem:[%s9329_s16] sm:$0xff]  }
0x150c   : > { %v5185_v46 = vadd.f32 %v5177_v40, %v5143_v33  ;;  %v5192_v3 = vmul.f32 0.7978846, %v5184_v29  ;;  %v5235_v33 = vpop.permute.xlu0 %5234 }
0x150d   : > { %v5183_v57 = vadd.f32 %v5175_v49, %v5135_v18  ;;  %v5190_v41 = vmul.f32 0.7978846, %v5182_v60  ;;  %v5240_v18 = vpop.permute.xlu1 %5239 }
0x150e   : > { %v5193_v28 = vmul.f32 0.7978846, %v5185_v46  ;;  %7025 = vtanh.f32 %v5192_v3 }
0x150f   : > { %v5191_v56 = vmul.f32 0.7978846, %v5183_v57  ;;  %7027 = vtanh.f32 %v5190_v41 }
0x1510   : > { %v7018_v43 = vpop.eup %7017  ;;  %7029 = vtanh.f32 %v5193_v28  ;;  %v5245_v54 = vpop.permute.xlu0 %5244 }
0x1511   : > { %v7020_v12 = vpop.eup %7019  ;;  %v5204_v47 = vadd.f32 1.0, %v7018_v43  ;;  %7031 = vtanh.f32 %v5191_v56  ;;  %v5250_v63 = vpop.permute.xlu1 %5249 }
0x1512   : > { %v7022_v9 = vpop.eup %7021  ;;  %v5202_v42 = vadd.f32 1.0, %v7020_v12 }
0x1513   : > { %v7024_v62 = vpop.eup %7023  ;;  %v5205_v8 = vadd.f32 1.0, %v7022_v9  ;;  %v5212_v44 = vmul.f32 %v5204_v47, %v5148_v52 }
0x1514   : > { %v5203_v55 = vadd.f32 1.0, %v7024_v62  ;;  %v5210_v17 = vmul.f32 %v5202_v42, %v5146_v36 }
0x1515   : > { %v5213_v35 = vmul.f32 %v5205_v8, %v5149_v38 }
0x1516   : > { %v5211_v45 = vmul.f32 %v5203_v55, %v5147_v14 }
0x1517   : > { %v5224_v0 = vpack.c.bf16 %v5213_v35, %v5212_v44 }
0x1518   : > { %v7026_v24 = vpop.eup %7025  ;;  %v5223_v25 = vpack.c.bf16 %v5211_v45, %v5210_v17 }
0x1519   : > { %v7028_v22 = vpop.eup %7027  ;;  %v5208_v10 = vadd.f32 1.0, %v7026_v24 }
0x151a   : > { %v7030_v21 = vpop.eup %7029  ;;  %6399 = vmatprep.subr.bf16.mxu0 %v5223_v25  ;;  %v5206_v23 = vadd.f32 1.0, %v7028_v22  ;;  %v5368_v22 = vpop.permute.xlu0 %5367 }
0x151b   : > { %v7032_v16 = vpop.eup %7031  ;;  %6400 = vmatpush3.bf16.msra.mxu0 %v5223_v25  ;;  %v5209_v50 = vadd.f32 1.0, %v7030_v21  ;;  %v5216_v27 = vmul.f32 %v5208_v10, %v5152_v6  ;;  %v5373_v25 = vpop.permute.xlu1 %5372 }
0x151c   : > { %6401 = vmatprep.subr.bf16.mxu0 %v5224_v0  ;;  %v5207_v39 = vadd.f32 1.0, %v7032_v16  ;;  %v5214_v34 = vmul.f32 %v5206_v23, %v5150_v48 }
0x151d   : > { %v5217_v51 = vmul.f32 %v5209_v50, %v5153_v61 }
0x151e   : > { %v5215_v26 = vmul.f32 %v5207_v39, %v5151_v11  ;;  %v5392_v16 = vpop.permute.xlu0 %5391 }
0x151f   : > { %6402 = vmatpush3.bf16.msra.mxu0 %v5224_v0  ;;  %v5226_v4 = vpack.c.bf16 %v5217_v51, %v5216_v27  ;;  %v5397_v23 = vpop.permute.xlu1 %5396 }
0x1520   : > { %v5225_v32 = vpack.c.bf16 %v5215_v26, %v5214_v34 }
0x1522   : > { %6403 = vmatprep.subr.bf16.mxu0 %v5225_v32  ;;  %v5378_v61 = vpop.permute.xlu0 %5377 }
0x1523   : > { %6404 = vmatpush3.bf16.msra.mxu0 %v5225_v32  ;;  %v5383_v6 = vpop.permute.xlu1 %5382 }
0x1524   : > { %6405 = vmatprep.subr.bf16.mxu0 %v5226_v4 }
0x1527   : > { %6406 = vmatpush3.bf16.msra.mxu0 %v5226_v4  ;;  %v5407_v32 = vpop.permute.xlu1 %5406 }
0x152a   : > { %6408 = vmatmul.mubr.msk.bf16.vlgmr.msra.gmra.mrb[100].mxu0 %vm2925_vm4, %v6478_v58  ;;  %v5402_v58 = vpop.permute.xlu0 %5401 }
0x152b   : > { %6415 = vmatprep.mubr.msk.bf16.mxu0 %vm855_vm0, %v6479_v19 }
0x15fd   : > { %v6409_v53 = vpop.f32.mrb[100].mxu0 }
0x15fe   : > { %v5302_v37 = vpop.f32.mrb[101].mxu0  ;;  %v5311_v30 = vadd.f32 %v6409_v53, %v5245_v54  ;;  %v5421_v54 = vld [vmem:[%s9330_s17 + $0x10] sm:$0xff] }
0x15ff   : > { %v5303_v59 = vadd.f32 %v5302_v37, %v5235_v33  ;;  %v6410_v31 = vpop.f32.mrb[102].mxu0 }
0x1600   : > { %v5305_v2 = vpop.f32.mrb[103].mxu0  ;;  %v5314_v29 = vadd.f32 %v6410_v31, %v5250_v63  ;;  %v5319_v60 = vadd.f32 %v5311_v30, %v9204_v7  ;;  %v6480_v31 = vld [vmem:[%s9329_s16 + $0x8] sm:$0xff]  }
0x1601   : > { %v5306_v20 = vadd.f32 %v5305_v2, %v5240_v18  ;;  %v5317_v40 = vadd.f32 %v5303_v59, %v9200_v5  ;;  %v5419_v2 = vld [vmem:[%s9330_s17] sm:$0xff] }
0x1602   : > { %v5320_v3 = vadd.f32 %v5314_v29, %v9206_v15  ;;  %v5420_v29 = vld [vmem:[%s9330_s17 + $0x8] sm:$0xff] }
0x1603   : > { %v5318_v49 = vadd.f32 %v5306_v20, %v9202_v1  ;;  %v5422_v20 = vld [vmem:[%s9330_s17 + $0x18] sm:$0xff] }
0x1605   : > { %v5331_v46 = vadd.f32 %v5318_v49, %v5317_v40 }
0x1607   : > { %v5332_v57 = vadd.f32 %v5331_v46, %v5319_v60 }
0x1609   : > { %v5333_v41 = vadd.f32 %v5332_v57, %v5320_v3 }
0x160b   : > { %v5334_v28 = vrot.slane %v5333_v41, 4 }
0x160d   : > { %v5335_v56 = vadd.f32 %v5334_v28, %v5333_v41 }
0x160f   : > { %v5336_v43 = vrot.slane %v5335_v56, 2 }
0x1611   : > { %v5337_v12 = vadd.f32 %v5336_v43, %v5335_v56 }
0x1613   : > { %v5338_v47 = vrot.slane %v5337_v12, 1 }
0x1615   : > { %v5339_v9 = vadd.f32 %v5338_v47, %v5337_v12 }
0x1617   : > { %v5340_v42 = vmul.f32 0.03125, %v5339_v9  ;;  %v5492_v9 = vld [vmem:[%s9331_s18] sm:$0x3] }
0x1619   : > { %v5341_v62 = vsub.f32 %v5317_v40, %v5340_v42  ;;  %v5342_v52 = vsub.f32 %v5318_v49, %v5340_v42  ;;  %v5343_v5 = vsub.f32 %v5319_v60, %v5340_v42  ;;  %v5344_v38 = vsub.f32 %v5320_v3, %v5340_v42  ;;  %v5495_v42 = vld [vmem:[%s9332_s19] sm:$0xf] }
0x161b   : > { %v5345_v8 = vmul.f32 %v5341_v62, %v5341_v62  ;;  %v5346_v1 = vmul.f32 %v5342_v52, %v5342_v52  ;;  %v5347_v36 = vmul.f32 %v5343_v5, %v5343_v5  ;;  %v5348_v14 = vmul.f32 %v5344_v38, %v5344_v38 }
0x161d   : > { %v5349_v7 = vadd.f32 %v5346_v1, %v5345_v8 }
0x161f   : > { %v5350_v55 = vadd.f32 %v5349_v7, %v5347_v36 }
0x1621   : > { %v5351_v15 = vadd.f32 %v5350_v55, %v5348_v14 }
0x1623   : > { %v5352_v44 = vrot.slane %v5351_v15, 4 }
0x1625   : > { %v5353_v35 = vadd.f32 %v5352_v44, %v5351_v15 }
0x1627   : > { %v5354_v17 = vrot.slane %v5353_v35, 2 }
0x1629   : > { %v5355_v45 = vadd.f32 %v5354_v17, %v5353_v35 }
0x162b   : > { %v5356_v0 = vrot.slane %v5355_v45, 1 }
0x162d   : > { %v5357_v24 = vadd.f32 %v5356_v0, %v5355_v45 }
0x162f   : > { %v5358_v10 = vmul.f32 0.03125, %v5357_v24 }
0x1631   : > { %v5359_v21 = vadd.f32 1e-12, %v5358_v10 }
0x1633   : > { %7033 = vrsqrt.f32 %v5359_v21 }
0x163d   : > { %v7034_v50 = vpop.eup %7033 }
0x163e   : > { %v5362_v48 = vmul.f32 %v7034_v50, %v5342_v52  ;;  %v5361_v11 = vmul.f32 %v7034_v50, %v5341_v62  ;;  %v5363_v39 = vmul.f32 %v7034_v50, %v5343_v5  ;;  %v5364_v27 = vmul.f32 %v7034_v50, %v5344_v38 }
0x1640   : > { %v5385_v51 = vmul.f32 %v5368_v22, %v5361_v11  ;;  %v5386_v34 = vmul.f32 %v5373_v25, %v5362_v48  ;;  %v5387_v26 = vmul.f32 %v5378_v61, %v5363_v39  ;;  %v5388_v4 = vmul.f32 %v5383_v6, %v5364_v27 }
0x1642   : > { %v5409_v19 = vadd.f32 %v5392_v16, %v5385_v51  ;;  %v5410_v33 = vadd.f32 %v5397_v23, %v5386_v34  ;;  %v5411_v18 = vadd.f32 %v5402_v58, %v5387_v26  ;;  %v5412_v53 = vadd.f32 %v5407_v32, %v5388_v4 }
0x1644   : > { %v5417_v37 = vpack.c.bf16 %v5410_v33, %v5409_v19  ;;  %v5418_v59 = vpack.c.bf16 %v5412_v53, %v5411_v18 }
0x1646   : > { %6411 = vmatprep.subr.bf16.mxu0 %v5417_v37 }
0x1647   : > { %6412 = vmatpush3.bf16.msra.mxu0 %v5417_v37 }
0x1648   : > { %6413 = vmatprep.subr.bf16.mxu0 %v5418_v59 }
0x164b   : > { %6414 = vmatpush3.bf16.msra.mxu0 %v5418_v59 }
0x164e   : > { %6416 = vmatmul.mubr.msk.bf16.vlgmr.msra.gmra.mrb[104].mxu0 %vm855_vm0, %v6480_v31 }
0x1721   : > { %v6417_v30 = vpop.f32.mrb[104].mxu0 }
0x1722   : > { %v5482_v63 = vadd.f32 %v6417_v30, %v5421_v54  ;;  %v5473_v40 = vpop.f32.mrb[105].mxu0 }
0x1723   : > { %v5474_v49 = vadd.f32 %v5473_v40, %v5419_v2  ;;  %v6418_v60 = vpop.f32.mrb[106].mxu0 }
0x1724   : > { %7035 = vtanh.f32 %v5482_v63  ;;  %v5485_v46 = vadd.f32 %v6418_v60, %v5422_v20  ;;  %v5476_v3 = vpop.f32.mrb[107].mxu0 }
0x1725   : > { %7037 = vtanh.f32 %v5474_v49  ;;  %v5477_v57 = vadd.f32 %v5476_v3, %v5420_v29 }
0x1726   : > { %7039 = vtanh.f32 %v5485_v46 }
0x1727   : > { %7041 = vtanh.f32 %v5477_v57 }
0x172e   : > { %v7036_v41 = vpop.eup %7035 }
0x172f   : > { %v7038_v28 = vpop.eup %7037 }
0x1730   : > { %v7040_v56 = vpop.eup %7039 }
0x1731   : > { %v7042_v43 = vpop.eup %7041  ;;  %v5494_v12 = vpack.c.bf16 %v7040_v56, %v7036_v41 }
0x1732   : > { %v5493_v47 = vpack.c.bf16 %v7042_v43, %v7038_v28 }
0x1734   : > { %6420 = vmatpush3.bf16.msra.mxu1 %v5493_v47 }
0x1735   : > { %6421 = vmatprep.subr.bf16.mxu1 %v9358_v13 }
0x1738   : > { %6422 = vmatpush3.bf16.msra.mxu1 %v5494_v12 }
0x173b   : > { %6424 = vmatmul.mubr.msk.bf16.vlgmr.msra.gmra.mrb[112].mxu1 %vm855_vm0, %v5492_v9 }
0x180e   : > { %v5533_v62 = vpop.f32.mrb[112].mxu1 }
0x180f   : > { %v5534_v52 = vadd.f32 %v5533_v62, %v5495_v42  ;;  %v6425_v13 = vpop.f32.mrb[113].mxu1 }
0x1810   : > { %v5536_v5 = vpop.f32.mrb[114].mxu1 }
0x1811   : > { %5540 = vst.msk [vmem:[%s641_s28] sm:$0xf] %vm5539_vm5, %v5534_v52  ;;  %v6426_v38 = vpop.f32.mrb[115].mxu1 }
0x1812 PF: > { %s9362_s4 = sld [smem:[#allocation3_spill]] }
0x1818   : > { %s30_s1 = sadd.s32 1, %s9362_s4  }
0x1819   : > { %p27_p4 = scmp.ge.s32.totalorder %s30_s1, 4  }
0x181b   :  { %29 = sbr.rel (!%p27_p4) target bundleno = 6 (0x6), region = 145 }

</bundles_post_ra>
